<compile_context>
chip_gen: v7x
topology: tpu7x:2x2x1
jax: 0.10.0
libtpu: 0.0.40
codegen_flags: <defaults>
</compile_context>

<pallas_src>
import jax
import jax.numpy as jnp
from jax.experimental import pallas as pl
from jax.experimental.pallas import tpu as pltpu


# ---------------------------------------------------------------------------
# Helpers
# ---------------------------------------------------------------------------
def _vmem_limit_bytes():
    """Generation-aware VMEM budget (leave headroom below physical capacity)."""
    try:
        cap = int(pltpu.get_tpu_info().vmem_capacity_bytes)
    except Exception:
        cap = 64 * 1024 * 1024  # conservative fallback (v7x-sized)
    # v5e/v6e (128 MiB) -> 100 MiB budget; v7x (64 MiB) -> 40 MiB budget.
    return max(32 * 1024 * 1024, min(100 * 1024 * 1024, cap - 24 * 1024 * 1024))


def _conv_row_block(H, W, Cout):
    """Smallest divisor TH of H with TH*W >= 256 (MXU M-dim), capped so the
    f32 accumulator stays <= ~2 MiB; falls back to the largest fitting divisor."""
    acc_cap = max(1, (2 * 1024 * 1024) // (W * Cout * 4))
    cap = max(1, min(H, acc_cap))
    best = 1
    for t in range(1, H + 1):
        if H % t == 0 and t <= cap:
            best = t
            if t * W >= 256:
                break
    return best


def _pool_row_block(Ho, Wo, C):
    """Largest divisor TP of Ho keeping the (2*TP, Wo, 2C) f32 input block <= ~2 MiB."""
    unit = 2 * Wo * 2 * C * 4
    best = 1
    for t in range(1, Ho + 1):
        if Ho % t == 0 and t * unit <= 2 * 1024 * 1024:
            best = t
    return best


# ---------------------------------------------------------------------------
# Conv 3x3 (padding = dilation, so H, W are preserved) + fused ReLU.
# Grid = (N, H // TH): TH output rows per grid step; 9 MXU dots of shape
# (TH*W, Cin) x (Cin, Cout) accumulated into a VMEM f32 scratch.
# ---------------------------------------------------------------------------
def conv3x3_relu(x, w, b, dilation=1):
    N, H, W, Cin = x.shape
    Cout = w.shape[-1]
    pad = dilation                       # padding == dilation for every VGG layer here
    xp = jnp.pad(x, ((0, 0), (pad, pad), (pad, pad), (0, 0)))
    Hp, Wp = H + 2 * pad, W + 2 * pad
    b2 = b.reshape(1, Cout)

    TH = _conv_row_block(H, W, Cout)
    M = TH * W

    def kernel(x_ref, w_ref, b_ref, o_ref, acc_ref):
        h0 = pl.program_id(1) * TH
        step = 0
        for dy in range(3):
            for dx in range(3):
                patch = x_ref[0, pl.ds(h0 + dy * dilation, TH),
                              pl.ds(dx * dilation, W), :]            # (TH, W, Cin)
                contrib = jnp.dot(patch.reshape(M, Cin), w_ref[dy, dx],
                                  preferred_element_type=jnp.float32)
                if step == 0:
                    acc_ref[...] = contrib        # first tap initializes (no zero-fill)
                else:
                    acc_ref[...] += contrib
                step += 1
        out = jnp.maximum(acc_ref[...] + b_ref[0], 0.0)
        o_ref[0] = out.reshape(TH, W, Cout).astype(o_ref.dtype)

    return pl.pallas_call(
        kernel,
        out_shape=jax.ShapeDtypeStruct((N, H, W, Cout), x.dtype),
        grid=(N, H // TH),
        in_specs=[
            # Whole padded image per batch element (row windows are sliced
            # in-kernel); for VGG feature-map sizes this plus double-buffered
            # weights fits well inside even v7x's 64 MiB VMEM.
            # TODO(synk): for very large inputs switch to a manual sliding
            # row-window DMA (memory_space=pl.ANY) to bound VMEM by the tile.
            pl.BlockSpec((1, Hp, Wp, Cin), lambda n, h: (n, 0, 0, 0)),
            pl.BlockSpec((3, 3, Cin, Cout), lambda n, h: (0, 0, 0, 0)),
            pl.BlockSpec((1, Cout), lambda n, h: (0, 0)),
        ],
        out_specs=pl.BlockSpec((1, TH, W, Cout), lambda n, h: (n, h, 0, 0)),
        scratch_shapes=[pltpu.VMEM((M, Cout), jnp.float32)],
        compiler_params=pltpu.CompilerParams(
            dimension_semantics=("parallel", "parallel"),
            vmem_limit_bytes=_vmem_limit_bytes()),
    )(xp, w, b2)


# ---------------------------------------------------------------------------
# MaxPool2d(kernel=2, stride=2, ceil_mode=True).
# The wrapper reshape (W, C) -> (Wo, 2C) is a row-major bitcast (no HBM
# relayout) that packs each column pair into the lane dim; the kernel does a
# row-pair max and a column-pair max on a multi-row block.
# ---------------------------------------------------------------------------
def maxpool2x2_ceil(x):
    N, H, W, C = x.shape
    ph, pw = H % 2, W % 2
    if ph or pw:                          # ceil_mode: pad bottom/right with -inf
        # Safe here: a 2x2/stride-2 window always contains >=1 real element.
        x = jnp.pad(x, ((0, 0), (0, ph), (0, pw), (0, 0)),
                    constant_values=-jnp.inf)
        H, W = H + ph, W + pw
    Ho, Wo = H // 2, W // 2
    xr = x.reshape(N, H, Wo, 2 * C)       # column pairs packed into lanes (free)
    TP = _pool_row_block(Ho, Wo, C)

    def kernel(x_ref, o_ref):
        v = x_ref[0].reshape(TP, 2, Wo, 2 * C)
        m = jnp.maximum(v[:, 0], v[:, 1])                # max over row pairs
        o_ref[0] = jnp.maximum(m[..., :C], m[..., C:])   # max over column pairs

    return pl.pallas_call(
        kernel,
        out_shape=jax.ShapeDtypeStruct((N, Ho, Wo, C), x.dtype),
        grid=(N, Ho // TP),
        in_specs=[pl.BlockSpec((1, 2 * TP, Wo, 2 * C), lambda n, i: (n, i, 0, 0))],
        out_specs=pl.BlockSpec((1, TP, Wo, C), lambda n, i: (n, i, 0, 0)),
        compiler_params=pltpu.CompilerParams(
            dimension_semantics=("parallel", "parallel")),
    )(xr)


# ---------------------------------------------------------------------------
# MaxPool2d(kernel=3, stride=1, padding=1, ceil_mode=True): same-size output.
# Separable reduction: 2 maxes over H (outer dim, cheap) then 2 shifted maxes
# over W on the already H-reduced tensor.
# ---------------------------------------------------------------------------
def maxpool3x3_s1_p1(x):
    N, H, W, C = x.shape
    xp = jnp.pad(x, ((0, 0), (1, 1), (1, 1), (0, 0)), constant_values=-jnp.inf)

    def kernel(x_ref, o_ref):
        v = x_ref[0]                                                    # (H+2, W+2, C)
        hm = jnp.maximum(jnp.maximum(v[0:H], v[1:H + 1]), v[2:H + 2])   # (H, W+2, C)
        o_ref[0] = jnp.maximum(jnp.maximum(hm[:, 0:W], hm[:, 1:W + 1]),
                               hm[:, 2:W + 2])

    return pl.pallas_call(
        kernel,
        out_shape=jax.ShapeDtypeStruct((N, H, W, C), x.dtype),
        grid=(N,),
        in_specs=[pl.BlockSpec((1, H + 2, W + 2, C), lambda n: (n, 0, 0, 0))],
        out_specs=pl.BlockSpec((1, H, W, C), lambda n: (n, 0, 0, 0)),
        compiler_params=pltpu.CompilerParams(dimension_semantics=("parallel",)),
    )(xp)


# ---------------------------------------------------------------------------
# Network definition (mirrors the nn.Sequential in Vgg16.__init__).
# Every conv is followed by ReLU (fused into the conv kernel).
# nn.MaxPool2d(1, stride=1, ceil_mode=True) is the identity and is omitted.
# ---------------------------------------------------------------------------
CFG = [
    ("conv", 3, 64, 1), ("conv", 64, 64, 1), ("pool2",),
    ("conv", 64, 128, 1), ("conv", 128, 128, 1), ("pool2",),
    ("conv", 128, 256, 1), ("conv", 256, 256, 1), ("conv", 256, 256, 1), ("pool2",),
    ("conv", 256, 512, 1), ("conv", 512, 512, 1), ("conv", 512, 512, 1),
    # MaxPool2d(1, stride=1, ceil_mode=True) == identity, skipped
    ("conv", 512, 512, 2), ("conv", 512, 512, 2), ("conv", 512, 512, 2),
    ("pool3",),
]


def init_params(key):
    # TODO(synk): torchvision pretrained-weight copy has no Pallas equivalent;
    # parameters are deterministic He-init here.
    params = []
    for layer in CFG:
        if layer[0] == "conv":
            _, cin, cout, _dil = layer
            key, kw, kb = jax.random.split(key, 3)
            std = (2.0 / (9.0 * cin)) ** 0.5
            w = jax.random.normal(kw, (3, 3, cin, cout), jnp.float32) * std
            b = jax.random.normal(kb, (cout,), jnp.float32) * 0.01
            params.append((w, b))
        else:
            params.append(None)
    return params


def vgg16_forward(x_nchw, params):
    # layout: NCHW in / NCHW out; NHWC inside.
    x = jnp.transpose(x_nchw, (0, 2, 3, 1))
    for layer, p in zip(CFG, params):
        if layer[0] == "conv":
            w, b = p
            x = conv3x3_relu(x, w, b, dilation=layer[3])
        elif layer[0] == "pool2":
            x = maxpool2x2_ceil(x)
        elif layer[0] == "pool3":
            x = maxpool3x3_s1_p1(x)
    return jnp.transpose(x, (0, 3, 1, 2))


if __name__ == "__main__":
    key = jax.random.PRNGKey(0)
    k_in, k_par = jax.random.split(key)
    # Small but consistent with the module: 3 input channels are required.
    x = jax.random.normal(k_in, (2, 3, 16, 16), jnp.float32)
    params = init_params(k_par)

    out = vgg16_forward(x, params)
    out = jax.block_until_ready(out)

    assert out.shape == (2, 512, 2, 2), out.shape
    assert bool(jnp.all(jnp.isfinite(out)))
    print("KERNEL_OK")
</pallas_src>

<mosaic_0001>
module attributes {stable_mosaic.version = 11 : i64} {
  func.func @kernel(%arg0: i32, %arg1: i32, %arg2: memref<1x18x18x3xf32, #tpu.memory_space<vmem>>, %arg3: memref<3x3x3x64xf32, #tpu.memory_space<vmem>>, %arg4: memref<1x64xf32, #tpu.memory_space<vmem>>, %arg5: memref<1x16x16x64xf32, #tpu.memory_space<vmem>>, %arg6: memref<256x64xf32, #tpu.memory_space<vmem>>) attributes {dimension_semantics = [#tpu.dimension_semantics<parallel>, #tpu.dimension_semantics<parallel>], iteration_bounds = array<i64: 2, 1>, scalar_prefetch = 0 : i64, scratch_operands = 1 : i64, tpu.core_type = #tpu.core_type<tc>, window_params = [{transform_indices = @transform_0, window_bounds = array<i64: 1, 18, 18, 3>}, {pipeline_mode = #tpu.pipeline_mode<synchronous>, transform_indices = @transform_1, window_bounds = array<i64: 3, 3, 3, 64>}, {pipeline_mode = #tpu.pipeline_mode<synchronous>, transform_indices = @transform_2, window_bounds = array<i64: 1, 64>}, {transform_indices = @transform_3, window_bounds = array<i64: 1, 16, 16, 64>}]} {
    %c16_i32 = arith.constant 16 : i32
    %0 = arith.muli %arg1, %c16_i32 : i32
    %c0_i32 = arith.constant 0 : i32
    %1 = arith.addi %0, %c0_i32 : i32
    %c0 = arith.constant 0 : index
    %2 = arith.index_cast %1 : i32 to index
    %c0_0 = arith.constant 0 : index
    %c0_1 = arith.constant 0 : index
    %3 = vector.load %arg2[%c0, %2, %c0_0, %c0_1] : memref<1x18x18x3xf32, #tpu.memory_space<vmem>>, vector<1x16x16x3xf32>
    %4 = vector.shape_cast %3 : vector<1x16x16x3xf32> to vector<16x16x3xf32>
    %5 = vector.shape_cast %4 : vector<16x16x3xf32> to vector<256x3xf32>
    %c0_2 = arith.constant 0 : index
    %c0_3 = arith.constant 0 : index
    %c0_4 = arith.constant 0 : index
    %c0_5 = arith.constant 0 : index
    %6 = vector.load %arg3[%c0_2, %c0_3, %c0_4, %c0_5] : memref<3x3x3x64xf32, #tpu.memory_space<vmem>>, vector<1x1x3x64xf32>
    %7 = vector.shape_cast %6 : vector<1x1x3x64xf32> to vector<3x64xf32>
    %cst = arith.constant dense<0.000000e+00> : vector<256x64xf32>
    %8 = tpu.matmul %5, %7, %cst {dimension_numbers = #tpu.dot_dimension_numbers<[1], [0], [0], [1], [0, 0, 1, 1], [], []>} : vector<256x3xf32>, vector<3x64xf32>, vector<256x64xf32> -> vector<256x64xf32>
    %c0_6 = arith.constant 0 : index
    %c0_7 = arith.constant 0 : index
    %9 = vector.load %arg6[%c0_6, %c0_7] : memref<256x64xf32, #tpu.memory_space<vmem>>, vector<256x64xf32>
    tpu.vector_store %arg6[%c0_6, %c0_7], %8 {strides = array<i32>} : memref<256x64xf32, #tpu.memory_space<vmem>>, vector<256x64xf32>,
    %c0_i32_8 = arith.constant 0 : i32
    %10 = arith.addi %0, %c0_i32_8 : i32
    %c0_9 = arith.constant 0 : index
    %11 = arith.index_cast %10 : i32 to index
    %c1 = arith.constant 1 : index
    %c0_10 = arith.constant 0 : index
    %12 = vector.load %arg2[%c0_9, %11, %c1, %c0_10] : memref<1x18x18x3xf32, #tpu.memory_space<vmem>>, vector<1x16x16x3xf32>
    %13 = vector.shape_cast %12 : vector<1x16x16x3xf32> to vector<16x16x3xf32>
    %14 = vector.shape_cast %13 : vector<16x16x3xf32> to vector<256x3xf32>
    %c0_11 = arith.constant 0 : index
    %c1_12 = arith.constant 1 : index
    %c0_13 = arith.constant 0 : index
    %c0_14 = arith.constant 0 : index
    %15 = vector.load %arg3[%c0_11, %c1_12, %c0_13, %c0_14] : memref<3x3x3x64xf32, #tpu.memory_space<vmem>>, vector<1x1x3x64xf32>
    %16 = vector.shape_cast %15 : vector<1x1x3x64xf32> to vector<3x64xf32>
    %cst_15 = arith.constant dense<0.000000e+00> : vector<256x64xf32>
    %17 = tpu.matmul %14, %16, %cst_15 {dimension_numbers = #tpu.dot_dimension_numbers<[1], [0], [0], [1], [0, 0, 1, 1], [], []>} : vector<256x3xf32>, vector<3x64xf32>, vector<256x64xf32> -> vector<256x64xf32>
    %c0_16 = arith.constant 0 : index
    %c0_17 = arith.constant 0 : index
    %18 = vector.load %arg6[%c0_16, %c0_17] : memref<256x64xf32, #tpu.memory_space<vmem>>, vector<256x64xf32>
    %19 = arith.addf %18, %17 : vector<256x64xf32>
    %c0_18 = arith.constant 0 : index
    %c0_19 = arith.constant 0 : index
    %20 = vector.load %arg6[%c0_18, %c0_19] : memref<256x64xf32, #tpu.memory_space<vmem>>, vector<256x64xf32>
    tpu.vector_store %arg6[%c0_18, %c0_19], %19 {strides = array<i32>} : memref<256x64xf32, #tpu.memory_space<vmem>>, vector<256x64xf32>,
    %c0_i32_20 = arith.constant 0 : i32
    %21 = arith.addi %0, %c0_i32_20 : i32
    %c0_21 = arith.constant 0 : index
    %22 = arith.index_cast %21 : i32 to index
    %c2 = arith.constant 2 : index
    %c0_22 = arith.constant 0 : index
    %23 = vector.load %arg2[%c0_21, %22, %c2, %c0_22] : memref<1x18x18x3xf32, #tpu.memory_space<vmem>>, vector<1x16x16x3xf32>
    %24 = vector.shape_cast %23 : vector<1x16x16x3xf32> to vector<16x16x3xf32>
    %25 = vector.shape_cast %24 : vector<16x16x3xf32> to vector<256x3xf32>
    %c0_23 = arith.constant 0 : index
    %c2_24 = arith.constant 2 : index
    %c0_25 = arith.constant 0 : index
    %c0_26 = arith.constant 0 : index
    %26 = vector.load %arg3[%c0_23, %c2_24, %c0_25, %c0_26] : memref<3x3x3x64xf32, #tpu.memory_space<vmem>>, vector<1x1x3x64xf32>
    %27 = vector.shape_cast %26 : vector<1x1x3x64xf32> to vector<3x64xf32>
    %cst_27 = arith.constant dense<0.000000e+00> : vector<256x64xf32>
    %28 = tpu.matmul %25, %27, %cst_27 {dimension_numbers = #tpu.dot_dimension_numbers<[1], [0], [0], [1], [0, 0, 1, 1], [], []>} : vector<256x3xf32>, vector<3x64xf32>, vector<256x64xf32> -> vector<256x64xf32>
    %c0_28 = arith.constant 0 : index
    %c0_29 = arith.constant 0 : index
    %29 = vector.load %arg6[%c0_28, %c0_29] : memref<256x64xf32, #tpu.memory_space<vmem>>, vector<256x64xf32>
    %30 = arith.addf %29, %28 : vector<256x64xf32>
    %c0_30 = arith.constant 0 : index
    %c0_31 = arith.constant 0 : index
    %31 = vector.load %arg6[%c0_30, %c0_31] : memref<256x64xf32, #tpu.memory_space<vmem>>, vector<256x64xf32>
    tpu.vector_store %arg6[%c0_30, %c0_31], %30 {strides = array<i32>} : memref<256x64xf32, #tpu.memory_space<vmem>>, vector<256x64xf32>,
    %c1_i32 = arith.constant 1 : i32
    %32 = arith.addi %0, %c1_i32 : i32
    %c0_32 = arith.constant 0 : index
    %33 = arith.index_cast %32 : i32 to index
    %c0_33 = arith.constant 0 : index
    %c0_34 = arith.constant 0 : index
    %34 = vector.load %arg2[%c0_32, %33, %c0_33, %c0_34] : memref<1x18x18x3xf32, #tpu.memory_space<vmem>>, vector<1x16x16x3xf32>
    %35 = vector.shape_cast %34 : vector<1x16x16x3xf32> to vector<16x16x3xf32>
    %36 = vector.shape_cast %35 : vector<16x16x3xf32> to vector<256x3xf32>
    %c1_35 = arith.constant 1 : index
    %c0_36 = arith.constant 0 : index
    %c0_37 = arith.constant 0 : index
    %c0_38 = arith.constant 0 : index
    %37 = vector.load %arg3[%c1_35, %c0_36, %c0_37, %c0_38] : memref<3x3x3x64xf32, #tpu.memory_space<vmem>>, vector<1x1x3x64xf32>
    %38 = vector.shape_cast %37 : vector<1x1x3x64xf32> to vector<3x64xf32>
    %cst_39 = arith.constant dense<0.000000e+00> : vector<256x64xf32>
    %39 = tpu.matmul %36, %38, %cst_39 {dimension_numbers = #tpu.dot_dimension_numbers<[1], [0], [0], [1], [0, 0, 1, 1], [], []>} : vector<256x3xf32>, vector<3x64xf32>, vector<256x64xf32> -> vector<256x64xf32>
    %c0_40 = arith.constant 0 : index
    %c0_41 = arith.constant 0 : index
    %40 = vector.load %arg6[%c0_40, %c0_41] : memref<256x64xf32, #tpu.memory_space<vmem>>, vector<256x64xf32>
    %41 = arith.addf %40, %39 : vector<256x64xf32>
    %c0_42 = arith.constant 0 : index
    %c0_43 = arith.constant 0 : index
    %42 = vector.load %arg6[%c0_42, %c0_43] : memref<256x64xf32, #tpu.memory_space<vmem>>, vector<256x64xf32>
    tpu.vector_store %arg6[%c0_42, %c0_43], %41 {strides = array<i32>} : memref<256x64xf32, #tpu.memory_space<vmem>>, vector<256x64xf32>,
    %c1_i32_44 = arith.constant 1 : i32
    %43 = arith.addi %0, %c1_i32_44 : i32
    %c0_45 = arith.constant 0 : index
    %44 = arith.index_cast %43 : i32 to index
    %c1_46 = arith.constant 1 : index
    %c0_47 = arith.constant 0 : index
    %45 = vector.load %arg2[%c0_45, %44, %c1_46, %c0_47] : memref<1x18x18x3xf32, #tpu.memory_space<vmem>>, vector<1x16x16x3xf32>
    %46 = vector.shape_cast %45 : vector<1x16x16x3xf32> to vector<16x16x3xf32>
    %47 = vector.shape_cast %46 : vector<16x16x3xf32> to vector<256x3xf32>
    %c1_48 = arith.constant 1 : index
    %c1_49 = arith.constant 1 : index
    %c0_50 = arith.constant 0 : index
    %c0_51 = arith.constant 0 : index
    %48 = vector.load %arg3[%c1_48, %c1_49, %c0_50, %c0_51] : memref<3x3x3x64xf32, #tpu.memory_space<vmem>>, vector<1x1x3x64xf32>
    %49 = vector.shape_cast %48 : vector<1x1x3x64xf32> to vector<3x64xf32>
    %cst_52 = arith.constant dense<0.000000e+00> : vector<256x64xf32>
    %50 = tpu.matmul %47, %49, %cst_52 {dimension_numbers = #tpu.dot_dimension_numbers<[1], [0], [0], [1], [0, 0, 1, 1], [], []>} : vector<256x3xf32>, vector<3x64xf32>, vector<256x64xf32> -> vector<256x64xf32>
    %c0_53 = arith.constant 0 : index
    %c0_54 = arith.constant 0 : index
    %51 = vector.load %arg6[%c0_53, %c0_54] : memref<256x64xf32, #tpu.memory_space<vmem>>, vector<256x64xf32>
    %52 = arith.addf %51, %50 : vector<256x64xf32>
    %c0_55 = arith.constant 0 : index
    %c0_56 = arith.constant 0 : index
    %53 = vector.load %arg6[%c0_55, %c0_56] : memref<256x64xf32, #tpu.memory_space<vmem>>, vector<256x64xf32>
    tpu.vector_store %arg6[%c0_55, %c0_56], %52 {strides = array<i32>} : memref<256x64xf32, #tpu.memory_space<vmem>>, vector<256x64xf32>,
    %c1_i32_57 = arith.constant 1 : i32
    %54 = arith.addi %0, %c1_i32_57 : i32
    %c0_58 = arith.constant 0 : index
    %55 = arith.index_cast %54 : i32 to index
    %c2_59 = arith.constant 2 : index
    %c0_60 = arith.constant 0 : index
    %56 = vector.load %arg2[%c0_58, %55, %c2_59, %c0_60] : memref<1x18x18x3xf32, #tpu.memory_space<vmem>>, vector<1x16x16x3xf32>
    %57 = vector.shape_cast %56 : vector<1x16x16x3xf32> to vector<16x16x3xf32>
    %58 = vector.shape_cast %57 : vector<16x16x3xf32> to vector<256x3xf32>
    %c1_61 = arith.constant 1 : index
    %c2_62 = arith.constant 2 : index
    %c0_63 = arith.constant 0 : index
    %c0_64 = arith.constant 0 : index
    %59 = vector.load %arg3[%c1_61, %c2_62, %c0_63, %c0_64] : memref<3x3x3x64xf32, #tpu.memory_space<vmem>>, vector<1x1x3x64xf32>
    %60 = vector.shape_cast %59 : vector<1x1x3x64xf32> to vector<3x64xf32>
    %cst_65 = arith.constant dense<0.000000e+00> : vector<256x64xf32>
    %61 = tpu.matmul %58, %60, %cst_65 {dimension_numbers = #tpu.dot_dimension_numbers<[1], [0], [0], [1], [0, 0, 1, 1], [], []>} : vector<256x3xf32>, vector<3x64xf32>, vector<256x64xf32> -> vector<256x64xf32>
    %c0_66 = arith.constant 0 : index
    %c0_67 = arith.constant 0 : index
    %62 = vector.load %arg6[%c0_66, %c0_67] : memref<256x64xf32, #tpu.memory_space<vmem>>, vector<256x64xf32>
    %63 = arith.addf %62, %61 : vector<256x64xf32>
    %c0_68 = arith.constant 0 : index
    %c0_69 = arith.constant 0 : index
    %64 = vector.load %arg6[%c0_68, %c0_69] : memref<256x64xf32, #tpu.memory_space<vmem>>, vector<256x64xf32>
    tpu.vector_store %arg6[%c0_68, %c0_69], %63 {strides = array<i32>} : memref<256x64xf32, #tpu.memory_space<vmem>>, vector<256x64xf32>,
    %c2_i32 = arith.constant 2 : i32
    %65 = arith.addi %0, %c2_i32 : i32
    %c0_70 = arith.constant 0 : index
    %66 = arith.index_cast %65 : i32 to index
    %c0_71 = arith.constant 0 : index
    %c0_72 = arith.constant 0 : index
    %67 = vector.load %arg2[%c0_70, %66, %c0_71, %c0_72] : memref<1x18x18x3xf32, #tpu.memory_space<vmem>>, vector<1x16x16x3xf32>
    %68 = vector.shape_cast %67 : vector<1x16x16x3xf32> to vector<16x16x3xf32>
    %69 = vector.shape_cast %68 : vector<16x16x3xf32> to vector<256x3xf32>
    %c2_73 = arith.constant 2 : index
    %c0_74 = arith.constant 0 : index
    %c0_75 = arith.constant 0 : index
    %c0_76 = arith.constant 0 : index
    %70 = vector.load %arg3[%c2_73, %c0_74, %c0_75, %c0_76] : memref<3x3x3x64xf32, #tpu.memory_space<vmem>>, vector<1x1x3x64xf32>
    %71 = vector.shape_cast %70 : vector<1x1x3x64xf32> to vector<3x64xf32>
    %cst_77 = arith.constant dense<0.000000e+00> : vector<256x64xf32>
    %72 = tpu.matmul %69, %71, %cst_77 {dimension_numbers = #tpu.dot_dimension_numbers<[1], [0], [0], [1], [0, 0, 1, 1], [], []>} : vector<256x3xf32>, vector<3x64xf32>, vector<256x64xf32> -> vector<256x64xf32>
    %c0_78 = arith.constant 0 : index
    %c0_79 = arith.constant 0 : index
    %73 = vector.load %arg6[%c0_78, %c0_79] : memref<256x64xf32, #tpu.memory_space<vmem>>, vector<256x64xf32>
    %74 = arith.addf %73, %72 : vector<256x64xf32>
    %c0_80 = arith.constant 0 : index
    %c0_81 = arith.constant 0 : index
    %75 = vector.load %arg6[%c0_80, %c0_81] : memref<256x64xf32, #tpu.memory_space<vmem>>, vector<256x64xf32>
    tpu.vector_store %arg6[%c0_80, %c0_81], %74 {strides = array<i32>} : memref<256x64xf32, #tpu.memory_space<vmem>>, vector<256x64xf32>,
    %c2_i32_82 = arith.constant 2 : i32
    %76 = arith.addi %0, %c2_i32_82 : i32
    %c0_83 = arith.constant 0 : index
    %77 = arith.index_cast %76 : i32 to index
    %c1_84 = arith.constant 1 : index
    %c0_85 = arith.constant 0 : index
    %78 = vector.load %arg2[%c0_83, %77, %c1_84, %c0_85] : memref<1x18x18x3xf32, #tpu.memory_space<vmem>>, vector<1x16x16x3xf32>
    %79 = vector.shape_cast %78 : vector<1x16x16x3xf32> to vector<16x16x3xf32>
    %80 = vector.shape_cast %79 : vector<16x16x3xf32> to vector<256x3xf32>
    %c2_86 = arith.constant 2 : index
    %c1_87 = arith.constant 1 : index
    %c0_88 = arith.constant 0 : index
    %c0_89 = arith.constant 0 : index
    %81 = vector.load %arg3[%c2_86, %c1_87, %c0_88, %c0_89] : memref<3x3x3x64xf32, #tpu.memory_space<vmem>>, vector<1x1x3x64xf32>
    %82 = vector.shape_cast %81 : vector<1x1x3x64xf32> to vector<3x64xf32>
    %cst_90 = arith.constant dense<0.000000e+00> : vector<256x64xf32>
    %83 = tpu.matmul %80, %82, %cst_90 {dimension_numbers = #tpu.dot_dimension_numbers<[1], [0], [0], [1], [0, 0, 1, 1], [], []>} : vector<256x3xf32>, vector<3x64xf32>, vector<256x64xf32> -> vector<256x64xf32>
    %c0_91 = arith.constant 0 : index
    %c0_92 = arith.constant 0 : index
    %84 = vector.load %arg6[%c0_91, %c0_92] : memref<256x64xf32, #tpu.memory_space<vmem>>, vector<256x64xf32>
    %85 = arith.addf %84, %83 : vector<256x64xf32>
    %c0_93 = arith.constant 0 : index
    %c0_94 = arith.constant 0 : index
    %86 = vector.load %arg6[%c0_93, %c0_94] : memref<256x64xf32, #tpu.memory_space<vmem>>, vector<256x64xf32>
    tpu.vector_store %arg6[%c0_93, %c0_94], %85 {strides = array<i32>} : memref<256x64xf32, #tpu.memory_space<vmem>>, vector<256x64xf32>,
    %c2_i32_95 = arith.constant 2 : i32
    %87 = arith.addi %0, %c2_i32_95 : i32
    %c0_96 = arith.constant 0 : index
    %88 = arith.index_cast %87 : i32 to index
    %c2_97 = arith.constant 2 : index
    %c0_98 = arith.constant 0 : index
    %89 = vector.load %arg2[%c0_96, %88, %c2_97, %c0_98] : memref<1x18x18x3xf32, #tpu.memory_space<vmem>>, vector<1x16x16x3xf32>
    %90 = vector.shape_cast %89 : vector<1x16x16x3xf32> to vector<16x16x3xf32>
    %91 = vector.shape_cast %90 : vector<16x16x3xf32> to vector<256x3xf32>
    %c2_99 = arith.constant 2 : index
    %c2_100 = arith.constant 2 : index
    %c0_101 = arith.constant 0 : index
    %c0_102 = arith.constant 0 : index
    %92 = vector.load %arg3[%c2_99, %c2_100, %c0_101, %c0_102] : memref<3x3x3x64xf32, #tpu.memory_space<vmem>>, vector<1x1x3x64xf32>
    %93 = vector.shape_cast %92 : vector<1x1x3x64xf32> to vector<3x64xf32>
    %cst_103 = arith.constant dense<0.000000e+00> : vector<256x64xf32>
    %94 = tpu.matmul %91, %93, %cst_103 {dimension_numbers = #tpu.dot_dimension_numbers<[1], [0], [0], [1], [0, 0, 1, 1], [], []>} : vector<256x3xf32>, vector<3x64xf32>, vector<256x64xf32> -> vector<256x64xf32>
    %c0_104 = arith.constant 0 : index
    %c0_105 = arith.constant 0 : index
    %95 = vector.load %arg6[%c0_104, %c0_105] : memref<256x64xf32, #tpu.memory_space<vmem>>, vector<256x64xf32>
    %96 = arith.addf %95, %94 : vector<256x64xf32>
    %c0_106 = arith.constant 0 : index
    %c0_107 = arith.constant 0 : index
    %97 = vector.load %arg6[%c0_106, %c0_107] : memref<256x64xf32, #tpu.memory_space<vmem>>, vector<256x64xf32>
    tpu.vector_store %arg6[%c0_106, %c0_107], %96 {strides = array<i32>} : memref<256x64xf32, #tpu.memory_space<vmem>>, vector<256x64xf32>,
    %c0_108 = arith.constant 0 : index
    %c0_109 = arith.constant 0 : index
    %98 = vector.load %arg6[%c0_108, %c0_109] : memref<256x64xf32, #tpu.memory_space<vmem>>, vector<256x64xf32>
    %c0_110 = arith.constant 0 : index
    %c0_111 = arith.constant 0 : index
    %99 = vector.load %arg4[%c0_110, %c0_111] : memref<1x64xf32, #tpu.memory_space<vmem>>, vector<1x64xf32>
    %100 = vector.shape_cast %99 : vector<1x64xf32> to vector<64xf32>
    %101 = vector.shape_cast %100 : vector<64xf32> to vector<1x64xf32>
    %102 = vector.broadcast %101 : vector<1x64xf32> to vector<256x64xf32>
    %103 = arith.addf %98, %102 : vector<256x64xf32>
    %cst_112 = arith.constant 0.000000e+00 : f32
    %104 = vector.broadcast %cst_112 : f32 to vector<256x64xf32>
    %105 = arith.maximumf %103, %104 : vector<256x64xf32>
    %106 = vector.shape_cast %105 : vector<256x64xf32> to vector<16x16x64xf32>
    %c0_113 = arith.constant 0 : index
    %c0_114 = arith.constant 0 : index
    %c0_115 = arith.constant 0 : index
    %c0_116 = arith.constant 0 : index
    %107 = vector.load %arg5[%c0_113, %c0_114, %c0_115, %c0_116] : memref<1x16x16x64xf32, #tpu.memory_space<vmem>>, vector<1x16x16x64xf32>
    %108 = vector.shape_cast %107 : vector<1x16x16x64xf32> to vector<16x16x64xf32>
    %109 = vector.shape_cast %106 : vector<16x16x64xf32> to vector<1x16x16x64xf32>
    tpu.vector_store %arg5[%c0_113, %c0_114, %c0_115, %c0_116], %109 {strides = array<i32>} : memref<1x16x16x64xf32, #tpu.memory_space<vmem>>, vector<1x16x16x64xf32>,
    return
  }
  func.func @transform_0(%arg0: i32, %arg1: i32) -> (i32, i32, i32, i32) {
    %c0_i32 = arith.constant 0 : i32
    %c0_i32_0 = arith.constant 0 : i32
    %c0_i32_1 = arith.constant 0 : i32
    %c0_i32_2 = arith.constant 0 : i32
    return %arg0, %c0_i32, %c0_i32_0, %c0_i32_1 : i32, i32, i32, i32
  }
  func.func @transform_1(%arg0: i32, %arg1: i32) -> (i32, i32, i32, i32) {
    %c0_i32 = arith.constant 0 : i32
    %c0_i32_0 = arith.constant 0 : i32
    %c0_i32_1 = arith.constant 0 : i32
    %c0_i32_2 = arith.constant 0 : i32
    %c0_i32_3 = arith.constant 0 : i32
    return %c0_i32, %c0_i32_0, %c0_i32_1, %c0_i32_2 : i32, i32, i32, i32
  }
  func.func @transform_2(%arg0: i32, %arg1: i32) -> (i32, i32) {
    %c0_i32 = arith.constant 0 : i32
    %c0_i32_0 = arith.constant 0 : i32
    %c0_i32_1 = arith.constant 0 : i32
    return %c0_i32, %c0_i32_0 : i32, i32
  }
  func.func @transform_3(%arg0: i32, %arg1: i32) -> (i32, i32, i32, i32) {
    %c0_i32 = arith.constant 0 : i32
    %c0_i32_0 = arith.constant 0 : i32
    %c0_i32_1 = arith.constant 0 : i32
    return %arg0, %arg1, %c0_i32, %c0_i32_0 : i32, i32, i32, i32
  }
}

</mosaic_0001>

<bundles_post_ra>
// kernel: tpu_custom_call.1
= control target key start
LH: loop header
LB: loop body
LE: loop exit
PB: predicated region body
PF: predicated region fallthrough
CT: control target
= control target key end

     0   :  { %8 = vsyncpa [#allocation4], 0  ;;  %s7324_s0 = inlined_call_operand.vmem [shape: f32[2,18,18,3], index: 0, kind: input, shape index: {}]   ;;  %s7325_s1 = inlined_call_operand.vmem [shape: f32[3,3,3,64], index: 1, kind: input, shape index: {}]   ;;  %s7326_s2 = inlined_call_operand.vmem [shape: f32[1,64], index: 2, kind: input, shape index: {}]   ;;  %s7327_s3 = inlined_call_operand.hbm [shape: f32[2,16,16,64], index: 3, kind: output, shape index: {}]  }
   0x1   :  { %10 = vsyncpa [#allocation4 + $0x1], 0  ;;  %s5873_s12 = smov 0   ;;  %s5875_s13 = smov 0  }
   0x2   :  { %s5877_s14 = smov 0   ;;  %s5879_s15 = smov 0  }
   0x3   :  { %s5881_s16 = smov 0   ;;  %s5883_s17 = smov 0  }
   0x4 LB: > { %s4452_s18 = sadd.s32 4294967295, %s5848_s17   ;;  %s4453_s19 = sadd.s32 4294967294, %s5848_s17   ;;  %s5848_s17 = sphi %s5883_s17, %s16_s17   ;;  %s5844_s16 = sphi %s5881_s16, %s7439_s16   ;;  %s5840_s15 = sphi %s5879_s15, %s7438_s15   ;;  %s5836_s14 = sphi %s5877_s14, %s7437_s14   ;;  %s5832_s13 = sphi %s5875_s13, %s7436_s13   ;;  %s5828_s12 = sphi %s5873_s12, %s7435_s12  }
   0x5   : > { %s28_s20 = sadd.s32 1, %s5844_s16  ;;  %s105_s21 = sadd.s32 1, %s5836_s14 }
   0x6   : > { %p30_p0 = scmp.ge.s32.totalorder %s28_s20, 2  ;;  %p115_p1 = scmp.ne.s32.totalorder %s5836_s14, %s5832_s13 }
   0x7   : > { %p116_p2 = scmp.eq.s32.totalorder %s4452_s18, 1  ;;  %p121_p3 = scmp.ne.s32.totalorder %s5832_s13, %s5828_s12 }
   0x8   : > { %s7441_s20 = smov (%p30_p0, %s28_s20), 0  ;;  %p122_p5 = scmp.eq.s32.totalorder %s4453_s19, 1 }
   0x9   : > { %p5913_p4 = por %p116_p2, %p115_p1  ;;  %s100_s23 = ssub.s32 %s5844_s16, %s7441_s20 }
   0xa   : > { %p4456_p6 = scmp.ge.s32.totalorder %s5848_s17, 1  ;;  %p103_p7 = scmp.eq.s32.totalorder %s100_s23, 0 }
   0xb   : > { %p5920_p8 = por %p122_p5, %p121_p3  ;;  %p154_p9 = scmp.lt.s32.totalorder %s5848_s17, 3 }
   0xc   : > { %s5926_s25 = scalar_select %p103_p7, %s5836_s14, %s105_s21  }
   0xd   : > { %p155_p10 = pnand %p4456_p6, %p154_p9 }
   0xf   : > { %158 = sbr.rel (%p155_p10) target bundleno = 567 (0x237), region = 32 }
  0x16   : > { %v219_v0 = vld [vmem:[%s7325_s1] sm:$0x7]  ;;  %vm317_vm0 = vcmask 1042432   ;;  %p178_p11 = scmp.lt.s32.totalorder %s5840_s15, 1  ;;  %v4492_v1 = vld [vmem:[%s7325_s1 + $0x4] sm:$0x7] }
  0x17   : > { %5710 = vmatprep.subr.msk.mxu1 %vm317_vm0, %v219_v0  ;;  %5260 = vmatprep.subr.msk.mxu0 %vm317_vm0, %v219_v0  ;;  %v4526_v2 = vld [vmem:[%s7325_s1 + $0x8] sm:$0x7]  ;;  %vm220_vm1 = vcmask 23552   ;;  %v5965_v7 = vld [vmem:[%s7325_s1 + $0xc] sm:$0x7]  ;;  %vm546_vm2 = vcmask 523264  }
  0x18   : > { %5711 = vmatpush3.msk.msra.mxu1 %vm317_vm0, %v219_v0  ;;  %s179_s5 = scalar_select %p178_p11, %s5840_s15, 1  ;;  %5261 = vmatpush3.msk.msra.mxu0 %vm317_vm0, %v219_v0  ;;  %v5983_v11 = vld [vmem:[%s7325_s1 + $0x10] sm:$0x7]  ;;  %v6132_v42 = vld [vmem:[%s7325_s1 + $0x14] sm:$0x7] }
  0x19   : > { %5310 = vmatprep.subr.msk.mxu1 %vm317_vm0, %v4492_v1  ;;  %5360 = vmatprep.subr.msk.mxu0 %vm317_vm0, %v4526_v2  ;;  %v6148_v45 = vld [vmem:[%s7325_s1 + $0x18] sm:$0x7]  ;;  %s4962_s10 = sshll.u32 %s5840_s15, 12  ;;  %s5850_s26 = smov [#allocation3]  }
  0x1a   : > { %s5712_s6 = smul.u32 432, %s179_s5  ;;  %s175_s5 = sand.u32 1, %s5832_s13  }
  0x1b   : > { %s7114_s8 = sshll.u32 %s175_s5, 8  ;;  %s7268_s21 = scalar_lea.hbm %s7327_s3, %s4962_s10 }
  0x1c   : > { %s5948_s9 = scalar_lea.vmem %s7324_s0, %s5712_s6  ;;  %s7278_s15 = scalar_lea.sflag [#allocation4], %s175_s5 }
  0x1d   : > { %v5951_v3 = vld [vmem:[%s5948_s9 + $0xc0] sm:$0xff]  ;;  %v5954_v4 = vld [vmem:[%s5948_s9 + $0xc8] sm:$0xff]  ;;  %v5957_v5 = vld [vmem:[%s5948_s9 + $0xd8] sm:$0xff]  ;;  %s5774_s27 = sshll.u32 %s5850_s26, 4  ;;  %s5775_s27 = int_to_ptr.vmem [resolvable:$false] %s5774_s27 }
  0x1e   : > { %5286 = vmatprep.mubr.msk.f32.mxu1 %vm220_vm1, %v5951_v3  ;;  %v187_v6 = vld [vmem:[%s5948_s9] sm:$0xff]  ;;  %v188_v8 = vld [vmem:[%s5948_s9 + $0x8] sm:$0xff]  ;;  %v5978_v10 = vld [vmem:[%s5948_s9 + $0x18] sm:$0xff]  ;;  %s5776_s28 = scalar_lea.vmem %s5775_s27, 8192 }
  0x1f   : > { %5287 = vmatmul.mubr.msk.f32.vlgmr.msra.gmra.mrb[0].mxu1 %vm220_vm1, %v5954_v4  ;;  %5262 = vmatprep.mubr.msk.f32.mxu0 %vm220_vm1, %v187_v6  ;;  %v5975_v9 = vld [vmem:[%s5948_s9 + $0xe0] sm:$0xff]  ;;  %v5986_v12 = vld [vmem:[%s5948_s9 + $0xf0] sm:$0xff]  ;;  %v6007_v15 = vld [vmem:[%s5948_s9 + $0xf8] sm:$0xff] }
  0x20   : > { %5311 = vmatpush3.msk.msra.mxu1 %vm317_vm0, %v4492_v1  ;;  %5289 = vmatprep.mubr.msk.f32.mxu1 %vm220_vm1, %v5957_v5  ;;  %v5995_v13 = vld [vmem:[%s5948_s9 + $0x20] sm:$0xff]  ;;  %v6000_v14 = vld [vmem:[%s5948_s9 + $0x30] sm:$0xff]  ;;  %v6010_v16 = vld [vmem:[%s5948_s9 + $0x108] sm:$0xff] }
  0x21   : > { %5263 = vmatmul.mubr.msk.f32.vlgmr.msra.gmra.mrb[0].mxu0 %vm220_vm1, %v188_v8  ;;  %5410 = vmatprep.subr.msk.mxu1 %vm317_vm0, %v5965_v7  ;;  %v6017_v17 = vld [vmem:[%s5948_s9 + $0x38] sm:$0xff]  ;;  %v6022_v18 = vld [vmem:[%s5948_s9 + $0x48] sm:$0xff]  ;;  %v6027_v19 = vld [vmem:[%s5948_s9 + $0x110] sm:$0xff] }
  0x22   : > { %5361 = vmatpush3.msk.msra.mxu0 %vm317_vm0, %v4526_v2  ;;  %5265 = vmatprep.mubr.msk.f32.mxu0 %vm220_vm1, %v5978_v10  ;;  %v6030_v20 = vld [vmem:[%s5948_s9 + $0x120] sm:$0xff]  ;;  %v6037_v21 = vld [vmem:[%s5948_s9 + $0x50] sm:$0xff]  ;;  %v6047_v23 = vld [vmem:[%s5948_s9 + $0x128] sm:$0xff] }
  0x23   : > { %5290 = vmatmul.mubr.msk.f32.gmra.mrb[2].mxu1 %vm220_vm1, %v5975_v9  ;;  %5460 = vmatprep.subr.msk.mxu0 %vm317_vm0, %v5983_v11  ;;  %v6042_v22 = vld [vmem:[%s5948_s9 + $0x60] sm:$0xff]  ;;  %v6050_v24 = vld [vmem:[%s5948_s9 + $0x138] sm:$0xff]  ;;  %v6057_v25 = vld [vmem:[%s5948_s9 + $0x68] sm:$0xff] }
  0x24   : > { %5292 = vmatprep.mubr.msk.f32.mxu1 %vm220_vm1, %v5986_v12  ;;  %v6062_v26 = vld [vmem:[%s5948_s9 + $0x78] sm:$0xff]  ;;  %v6067_v27 = vld [vmem:[%s5948_s9 + $0x140] sm:$0xff]  ;;  %v6070_v28 = vld [vmem:[%s5948_s9 + $0x150] sm:$0xff] }
  0x25   : > { %5266 = vmatmul.mubr.msk.f32.gmra.mrb[2].mxu0 %vm220_vm1, %v5995_v13  ;;  %v6077_v29 = vld [vmem:[%s5948_s9 + $0x80] sm:$0xff]  ;;  %v6082_v30 = vld [vmem:[%s5948_s9 + $0x90] sm:$0xff]  ;;  %v6087_v31 = vld [vmem:[%s5948_s9 + $0x158] sm:$0xff] }
  0x26   : > { %5268 = vmatprep.mubr.msk.f32.mxu0 %vm220_vm1, %v6000_v14  ;;  %v6090_v32 = vld [vmem:[%s5948_s9 + $0x168] sm:$0xff]  ;;  %v6097_v33 = vld [vmem:[%s5948_s9 + $0x98] sm:$0xff]  ;;  %v6107_v35 = vld [vmem:[%s5948_s9 + $0x170] sm:$0xff] }
  0x27   : > { %5293 = vmatmul.mubr.msk.f32.gmra.mrb[4].mxu1 %vm220_vm1, %v6007_v15  ;;  %7377 = vst [vmem:[#allocation6_spill] sm:$0xff] %v6090_v32  ;;  %v6102_v34 = vld [vmem:[%s5948_s9 + $0xa8] sm:$0xff]  ;;  %7378 = vst [vmem:[#allocation7_spill] sm:$0xff] %v6107_v35  ;;  %v6115_v37 = vld [vmem:[%s5948_s9 + $0xb0] sm:$0xff] }
  0x28   : > { %5295 = vmatprep.mubr.msk.f32.mxu1 %vm220_vm1, %v6010_v16  ;;  %v579_v36 = vld [vmem:[%s5948_s9 + $0x1] sm:$0xff]  ;;  %v580_v39 = vld [vmem:[%s5948_s9 + $0x9] sm:$0xff]  ;;  %v6123_v40 = vld [vmem:[%s5948_s9 + $0x19] sm:$0xff] }
  0x29   : > { %5269 = vmatmul.mubr.msk.f32.gmra.mrb[4].mxu0 %vm220_vm1, %v6017_v17  ;;  %v1033_v38 = vld [vmem:[%s5948_s9 + $0x2] sm:$0xff]  ;;  %v1034_v41 = vld [vmem:[%s5948_s9 + $0xa] sm:$0xff]  ;;  %v6136_v43 = vld [vmem:[%s5948_s9 + $0x1a] sm:$0xff] }
  0x2a   : > { %5271 = vmatprep.mubr.msk.f32.mxu0 %vm220_vm1, %v6022_v18  ;;  %7379 = vst [vmem:[#allocation8_spill] sm:$0xff] %v6136_v43  ;;  %v6143_v44 = vld [vmem:[%s5948_s9 + $0x21] sm:$0xff]  ;;  %v6151_v46 = vld [vmem:[%s5948_s9 + $0x31] sm:$0xff]  ;;  %v6173_v49 = vld [vmem:[%s5948_s9 + $0x39] sm:$0xff] }
  0x2b   : > { %5296 = vmatmul.mubr.msk.f32.gmra.mrb[6].mxu1 %vm220_vm1, %v6027_v19  ;;  %v6161_v47 = vld [vmem:[%s5948_s9 + $0x22] sm:$0xff]  ;;  %v6166_v48 = vld [vmem:[%s5948_s9 + $0x32] sm:$0xff]  ;;  %v6183_v51 = vld [vmem:[%s5948_s9 + $0x3a] sm:$0xff] }
  0x2c   : > { %5298 = vmatprep.mubr.msk.f32.mxu1 %vm220_vm1, %v6030_v20  ;;  %7380 = vst [vmem:[#allocation9_spill] sm:$0xff] %v6161_v47  ;;  %7381 = vst [vmem:[#allocation10_spill] sm:$0xff] %v6166_v48  ;;  %v6176_v50 = vld [vmem:[%s5948_s9 + $0x49] sm:$0xff]  ;;  %v6193_v53 = vld [vmem:[%s5948_s9 + $0x51] sm:$0xff] }
  0x2d   : > { %5272 = vmatmul.mubr.msk.f32.gmra.mrb[6].mxu0 %vm220_vm1, %v6037_v21  ;;  %7382 = vst [vmem:[#allocation11_spill] sm:$0xff] %v6183_v51  ;;  %v6188_v52 = vld [vmem:[%s5948_s9 + $0x4a] sm:$0xff]  ;;  %v6196_v54 = vld [vmem:[%s5948_s9 + $0x61] sm:$0xff]  ;;  %v6203_v55 = vld [vmem:[%s5948_s9 + $0x52] sm:$0xff] }
  0x2e   : > { %5274 = vmatprep.mubr.msk.f32.mxu0 %vm220_vm1, %v6042_v22  ;;  %7383 = vst [vmem:[#allocation12_spill] sm:$0xff] %v6188_v52  ;;  %7384 = vst [vmem:[#allocation13_spill] sm:$0xff] %v6203_v55  ;;  %v6208_v56 = vld [vmem:[%s5948_s9 + $0x62] sm:$0xff]  ;;  %v6216_v58 = vld [vmem:[%s5948_s9 + $0x79] sm:$0xff] }
  0x2f   : > { %5299 = vmatmul.mubr.msk.f32.gmra.mrb[8].mxu1 %vm220_vm1, %v6047_v23  ;;  %7385 = vst [vmem:[#allocation14_spill] sm:$0xff] %v6208_v56  ;;  %v6213_v57 = vld [vmem:[%s5948_s9 + $0x69] sm:$0xff]  ;;  %v6228_v60 = vld [vmem:[%s5948_s9 + $0x7a] sm:$0xff]  ;;  %v6236_v62 = vld [vmem:[%s5948_s9 + $0x91] sm:$0xff] }
  0x30   : > { %5301 = vmatprep.mubr.msk.f32.mxu1 %vm220_vm1, %v6050_v24  ;;  %v6223_v59 = vld [vmem:[%s5948_s9 + $0x6a] sm:$0xff]  ;;  %7387 = vst [vmem:[#allocation16_spill] sm:$0xff] %v6228_v60  ;;  %v6233_v61 = vld [vmem:[%s5948_s9 + $0x81] sm:$0xff]  ;;  %v6248_v0 = vld [vmem:[%s5948_s9 + $0x92] sm:$0xff] }
  0x31   : > { %5275 = vmatmul.mubr.msk.f32.gmra.mrb[8].mxu0 %vm220_vm1, %v6057_v25  ;;  %7386 = vst [vmem:[#allocation15_spill] sm:$0xff] %v6223_v59  ;;  %v6243_v63 = vld [vmem:[%s5948_s9 + $0x82] sm:$0xff]  ;;  %7389 = vst [vmem:[#allocation18_spill] sm:$0xff] %v6248_v0  ;;  %v6253_v1 = vld [vmem:[%s5948_s9 + $0x99] sm:$0xff] }
  0x32   : > { %5277 = vmatprep.mubr.msk.f32.mxu0 %vm220_vm1, %v6062_v26  ;;  %7388 = vst [vmem:[#allocation17_spill] sm:$0xff] %v6243_v63  ;;  %v6256_v2 = vld [vmem:[%s5948_s9 + $0xa9] sm:$0xff]  ;;  %v6263_v6 = vld [vmem:[%s5948_s9 + $0x9a] sm:$0xff]  ;;  %v6273_v8 = vld [vmem:[%s5948_s9 + $0xb1] sm:$0xff] }
  0x33   : > { %5302 = vmatmul.mubr.msk.f32.gmra.mrb[10].mxu1 %vm220_vm1, %v6067_v27  ;;  %7390 = vst [vmem:[#allocation19_spill] sm:$0xff] %v6263_v6 }
  0x34   : > { %5304 = vmatprep.mubr.msk.f32.mxu1 %vm220_vm1, %v6070_v28 }
  0x35   : > { %5278 = vmatmul.mubr.msk.f32.gmra.mrb[10].mxu0 %vm220_vm1, %v6077_v29 }
  0x36   : > { %5280 = vmatprep.mubr.msk.f32.mxu0 %vm220_vm1, %v6082_v30 }
  0x37   : > { %5305 = vmatmul.mubr.msk.f32.gmra.mrb[12].mxu1 %vm220_vm1, %v6087_v31 }
  0x38   : > { %5307 = vmatprep.mubr.msk.f32.mxu1 %vm220_vm1, %v6090_v32  ;;  %v6433_v32 = vld [vmem:[%s5948_s9 + $0x171] sm:$0xff] }
  0x39   : > { %5281 = vmatmul.mubr.msk.f32.gmra.mrb[12].mxu0 %vm220_vm1, %v6097_v33 }
  0x3a   : > { %5283 = vmatprep.mubr.msk.f32.mxu0 %vm220_vm1, %v6102_v34 }
  0x3b   : > { %5308 = vmatmul.mubr.msk.f32.gmra.mrb[14].mxu1 %vm220_vm1, %v6107_v35  ;;  %v6416_v35 = vld [vmem:[%s5948_s9 + $0x169] sm:$0xff] }
  0x3c   : > { %5312 = vmatprep.mubr.msk.f32.mxu1 %vm220_vm1, %v579_v36  ;;  %v6283_v36 = vld [vmem:[%s5948_s9 + $0xb2] sm:$0xff] }
  0x3d   : > { %5284 = vmatmul.mubr.msk.f32.gmra.mrb[14].mxu0 %vm220_vm1, %v6115_v37  ;;  %7392 = vst [vmem:[#allocation21_spill] sm:$0xff] %v6283_v36 }
  0x3e   : > { %5362 = vmatprep.mubr.msk.f32.mxu0 %vm220_vm1, %v1033_v38  ;;  %v6288_v38 = vld [vmem:[%s5948_s9 + $0xc2] sm:$0xff] }
  0x3f   : > { %5313 = vmatmul.mubr.msk.f32.vlgmr.msra.gmra.mrb[16].mxu1 %vm220_vm1, %v580_v39  ;;  %7393 = vst [vmem:[#allocation22_spill] sm:$0xff] %v6288_v38  ;;  %v6293_v39 = vld [vmem:[%s5948_s9 + $0xc9] sm:$0xff] }
  0x40   : > { %5411 = vmatpush3.msk.msra.mxu1 %vm317_vm0, %v5965_v7  ;;  %5315 = vmatprep.mubr.msk.f32.mxu1 %vm220_vm1, %v6123_v40  ;;  %v6268_v7 = vld [vmem:[%s5948_s9 + $0xaa] sm:$0xff] }
  0x41   : > { %5363 = vmatmul.mubr.msk.f32.vlgmr.msra.gmra.mrb[16].mxu0 %vm220_vm1, %v1034_v41  ;;  %5510 = vmatprep.subr.msk.mxu1 %vm317_vm0, %v6132_v42  ;;  %7391 = vst [vmem:[#allocation20_spill] sm:$0xff] %v6268_v7  ;;  %v6296_v41 = vld [vmem:[%s5948_s9 + $0xd9] sm:$0xff] }
  0x42   : > { %5461 = vmatpush3.msk.msra.mxu0 %vm317_vm0, %v5983_v11  ;;  %5365 = vmatprep.mubr.msk.f32.mxu0 %vm220_vm1, %v6136_v43  ;;  %v6276_v11 = vld [vmem:[%s5948_s9 + $0xc1] sm:$0xff]  ;;  %v6413_v43 = vld [vmem:[%s5948_s9 + $0x159] sm:$0xff] }
  0x43   : > { %5316 = vmatmul.mubr.msk.f32.gmra.mrb[18].mxu1 %vm220_vm1, %v6143_v44  ;;  %5560 = vmatprep.subr.msk.mxu0 %vm317_vm0, %v6148_v45 }
  0x44   : > { %5318 = vmatprep.mubr.msk.f32.mxu1 %vm220_vm1, %v6151_v46 }
  0x45   : > { %5366 = vmatmul.mubr.msk.f32.gmra.mrb[18].mxu0 %vm220_vm1, %v6161_v47  ;;  %v6396_v47 = vld [vmem:[%s5948_s9 + $0x151] sm:$0xff] }
  0x46   : > { %5368 = vmatprep.mubr.msk.f32.mxu0 %vm220_vm1, %v6166_v48  ;;  %v6393_v48 = vld [vmem:[%s5948_s9 + $0x141] sm:$0xff] }
  0x47   : > { %5319 = vmatmul.mubr.msk.f32.gmra.mrb[20].mxu1 %vm220_vm1, %v6173_v49 }
  0x48   : > { %5321 = vmatprep.mubr.msk.f32.mxu1 %vm220_vm1, %v6176_v50 }
  0x49   : > { %5369 = vmatmul.mubr.msk.f32.gmra.mrb[20].mxu0 %vm220_vm1, %v6183_v51  ;;  %v6376_v51 = vld [vmem:[%s5948_s9 + $0x139] sm:$0xff] }
  0x4a   : > { %5371 = vmatprep.mubr.msk.f32.mxu0 %vm220_vm1, %v6188_v52  ;;  %v6373_v52 = vld [vmem:[%s5948_s9 + $0x129] sm:$0xff] }
  0x4b   : > { %5322 = vmatmul.mubr.msk.f32.gmra.mrb[22].mxu1 %vm220_vm1, %v6193_v53 }
  0x4c   : > { %5324 = vmatprep.mubr.msk.f32.mxu1 %vm220_vm1, %v6196_v54 }
  0x4d   : > { %5372 = vmatmul.mubr.msk.f32.gmra.mrb[22].mxu0 %vm220_vm1, %v6203_v55  ;;  %v6356_v55 = vld [vmem:[%s5948_s9 + $0x121] sm:$0xff] }
  0x4e   : > { %5374 = vmatprep.mubr.msk.f32.mxu0 %vm220_vm1, %v6208_v56  ;;  %v6353_v56 = vld [vmem:[%s5948_s9 + $0x111] sm:$0xff] }
  0x4f   : > { %5325 = vmatmul.mubr.msk.f32.gmra.mrb[24].mxu1 %vm220_vm1, %v6213_v57 }
  0x50   : > { %5327 = vmatprep.mubr.msk.f32.mxu1 %vm220_vm1, %v6216_v58 }
  0x51   : > { %5375 = vmatmul.mubr.msk.f32.gmra.mrb[24].mxu0 %vm220_vm1, %v6223_v59  ;;  %v6336_v59 = vld [vmem:[%s5948_s9 + $0x109] sm:$0xff] }
  0x52   : > { %5377 = vmatprep.mubr.msk.f32.mxu0 %vm220_vm1, %v6228_v60  ;;  %v6333_v60 = vld [vmem:[%s5948_s9 + $0xf9] sm:$0xff] }
  0x53   : > { %5328 = vmatmul.mubr.msk.f32.gmra.mrb[26].mxu1 %vm220_vm1, %v6233_v61 }
  0x54   : > { %5330 = vmatprep.mubr.msk.f32.mxu1 %vm220_vm1, %v6236_v62 }
  0x55   : > { %5378 = vmatmul.mubr.msk.f32.gmra.mrb[26].mxu0 %vm220_vm1, %v6243_v63  ;;  %v6316_v63 = vld [vmem:[%s5948_s9 + $0xf1] sm:$0xff] }
  0x56   : > { %5380 = vmatprep.mubr.msk.f32.mxu0 %vm220_vm1, %v6248_v0  ;;  %v6313_v0 = vld [vmem:[%s5948_s9 + $0xe1] sm:$0xff] }
  0x57   : > { %5331 = vmatmul.mubr.msk.f32.gmra.mrb[28].mxu1 %vm220_vm1, %v6253_v1 }
  0x58   : > { %5333 = vmatprep.mubr.msk.f32.mxu1 %vm220_vm1, %v6256_v2 }
  0x59   : > { %5381 = vmatmul.mubr.msk.f32.gmra.mrb[28].mxu0 %vm220_vm1, %v6263_v6  ;;  %v6308_v6 = vld [vmem:[%s5948_s9 + $0xda] sm:$0xff] }
  0x5a   : > { %5383 = vmatprep.mubr.msk.f32.mxu0 %vm220_vm1, %v6268_v7  ;;  %v6303_v7 = vld [vmem:[%s5948_s9 + $0xca] sm:$0xff]  ;;  %7395 = vst [vmem:[#allocation24_spill] sm:$0xff] %v6308_v6 }
  0x5b   : > { %5334 = vmatmul.mubr.msk.f32.gmra.mrb[30].mxu1 %vm220_vm1, %v6273_v8  ;;  %7394 = vst [vmem:[#allocation23_spill] sm:$0xff] %v6303_v7 }
  0x5c   : > { %5336 = vmatprep.mubr.msk.f32.mxu1 %vm220_vm1, %v6276_v11 }
  0x5d   : > { %5384 = vmatmul.mubr.msk.f32.gmra.mrb[30].mxu0 %vm220_vm1, %v6283_v36  ;;  %v6328_v36 = vld [vmem:[%s5948_s9 + $0xf2] sm:$0xff] }
  0x5e   : > { %5386 = vmatprep.mubr.msk.f32.mxu0 %vm220_vm1, %v6288_v38  ;;  %v6323_v38 = vld [vmem:[%s5948_s9 + $0xe2] sm:$0xff]  ;;  %7397 = vst [vmem:[#allocation26_spill] sm:$0xff] %v6328_v36 }
  0x5f   : > { %5337 = vmatmul.mubr.msk.f32.gmra.mrb[32].mxu1 %vm220_vm1, %v6293_v39  ;;  %7396 = vst [vmem:[#allocation25_spill] sm:$0xff] %v6323_v38 }
  0x60   : > { %5339 = vmatprep.mubr.msk.f32.mxu1 %vm220_vm1, %v6296_v41 }
  0x61   : > { %5387 = vmatmul.mubr.msk.f32.gmra.mrb[32].mxu0 %vm220_vm1, %v6303_v7  ;;  %v6348_v7 = vld [vmem:[%s5948_s9 + $0x10a] sm:$0xff] }
  0x62   : > { %5389 = vmatprep.mubr.msk.f32.mxu0 %vm220_vm1, %v6308_v6  ;;  %v6343_v6 = vld [vmem:[%s5948_s9 + $0xfa] sm:$0xff]  ;;  %7399 = vst [vmem:[#allocation28_spill] sm:$0xff] %v6348_v7 }
  0x63   : > { %5340 = vmatmul.mubr.msk.f32.gmra.mrb[34].mxu1 %vm220_vm1, %v6313_v0  ;;  %7398 = vst [vmem:[#allocation27_spill] sm:$0xff] %v6343_v6 }
  0x64   : > { %5342 = vmatprep.mubr.msk.f32.mxu1 %vm220_vm1, %v6316_v63 }
  0x65   : > { %5390 = vmatmul.mubr.msk.f32.gmra.mrb[34].mxu0 %vm220_vm1, %v6323_v38  ;;  %v6368_v38 = vld [vmem:[%s5948_s9 + $0x122] sm:$0xff] }
  0x66   : > { %5392 = vmatprep.mubr.msk.f32.mxu0 %vm220_vm1, %v6328_v36  ;;  %v6363_v36 = vld [vmem:[%s5948_s9 + $0x112] sm:$0xff]  ;;  %7401 = vst [vmem:[#allocation30_spill] sm:$0xff] %v6368_v38 }
  0x67   : > { %5343 = vmatmul.mubr.msk.f32.gmra.mrb[36].mxu1 %vm220_vm1, %v6333_v60  ;;  %7400 = vst [vmem:[#allocation29_spill] sm:$0xff] %v6363_v36 }
  0x68   : > { %5345 = vmatprep.mubr.msk.f32.mxu1 %vm220_vm1, %v6336_v59 }
  0x69   : > { %5393 = vmatmul.mubr.msk.f32.gmra.mrb[36].mxu0 %vm220_vm1, %v6343_v6  ;;  %v6388_v6 = vld [vmem:[%s5948_s9 + $0x13a] sm:$0xff] }
  0x6a   : > { %5395 = vmatprep.mubr.msk.f32.mxu0 %vm220_vm1, %v6348_v7  ;;  %v6383_v7 = vld [vmem:[%s5948_s9 + $0x12a] sm:$0xff]  ;;  %7403 = vst [vmem:[#allocation32_spill] sm:$0xff] %v6388_v6 }
  0x6b   : > { %5346 = vmatmul.mubr.msk.f32.gmra.mrb[38].mxu1 %vm220_vm1, %v6353_v56  ;;  %7402 = vst [vmem:[#allocation31_spill] sm:$0xff] %v6383_v7 }
  0x6c   : > { %5348 = vmatprep.mubr.msk.f32.mxu1 %vm220_vm1, %v6356_v55 }
  0x6d   : > { %5396 = vmatmul.mubr.msk.f32.gmra.mrb[38].mxu0 %vm220_vm1, %v6363_v36  ;;  %v6408_v36 = vld [vmem:[%s5948_s9 + $0x152] sm:$0xff] }
  0x6e   : > { %5398 = vmatprep.mubr.msk.f32.mxu0 %vm220_vm1, %v6368_v38  ;;  %v6403_v38 = vld [vmem:[%s5948_s9 + $0x142] sm:$0xff] }
  0x6f   : > { %5349 = vmatmul.mubr.msk.f32.gmra.mrb[40].mxu1 %vm220_vm1, %v6373_v52  ;;  %7404 = vst [vmem:[#allocation33_spill] sm:$0xff] %v6403_v38 }
  0x70   : > { %5351 = vmatprep.mubr.msk.f32.mxu1 %vm220_vm1, %v6376_v51 }
  0x71   : > { %5399 = vmatmul.mubr.msk.f32.gmra.mrb[40].mxu0 %vm220_vm1, %v6383_v7  ;;  %v6428_v7 = vld [vmem:[%s5948_s9 + $0x16a] sm:$0xff] }
  0x72   : > { %5401 = vmatprep.mubr.msk.f32.mxu0 %vm220_vm1, %v6388_v6  ;;  %v6423_v6 = vld [vmem:[%s5948_s9 + $0x15a] sm:$0xff] }
  0x73   : > { %5352 = vmatmul.mubr.msk.f32.gmra.mrb[42].mxu1 %vm220_vm1, %v6393_v48  ;;  %7405 = vst [vmem:[#allocation34_spill] sm:$0xff] %v6423_v6 }
  0x74   : > { %5354 = vmatprep.mubr.msk.f32.mxu1 %vm220_vm1, %v6396_v47 }
  0x75   : > { %5402 = vmatmul.mubr.msk.f32.gmra.mrb[42].mxu0 %vm220_vm1, %v6403_v38  ;;  %v6440_v38 = vld [vmem:[%s5948_s9 + $0x172] sm:$0xff] }
  0x76   : > { %5404 = vmatprep.mubr.msk.f32.mxu0 %vm220_vm1, %v6408_v36 }
  0x77   : > { %5355 = vmatmul.mubr.msk.f32.gmra.mrb[44].mxu1 %vm220_vm1, %v6413_v43 }
  0x78   : > { %5357 = vmatprep.mubr.msk.f32.mxu1 %vm220_vm1, %v6416_v35 }
  0x79   : > { %5405 = vmatmul.mubr.msk.f32.gmra.mrb[44].mxu0 %vm220_vm1, %v6423_v6  ;;  %v6453_v6 = vld [vmem:[%s7325_s1 + $0x1c] sm:$0x7] }
  0x7a   : > { %5407 = vmatprep.mubr.msk.f32.mxu0 %vm220_vm1, %v6428_v7 }
  0x7b   : > { %5358 = vmatmul.mubr.msk.f32.gmra.mrb[46].mxu1 %vm220_vm1, %v6433_v32 }
  0x7c   : > { %5412 = vmatprep.mubr.msk.f32.mxu1 %vm220_vm1, %v5978_v10  ;;  %v6464_v10 = vld [vmem:[%s7325_s1 + $0x20] sm:$0x7] }
  0x7d   : > { %5408 = vmatmul.mubr.msk.f32.gmra.mrb[46].mxu0 %vm220_vm1, %v6440_v38 }
  0x7e   : > { %5462 = vmatprep.mubr.msk.f32.mxu0 %vm220_vm1, %v6123_v40  ;;  %v6577_v40 = vld [vmem:[%s5948_s9 + $0x180] sm:$0xff] }
  0x7f   : > { %5413 = vmatmul.mubr.msk.f32.vlgmr.msra.gmra.mrb[48].mxu1 %vm220_vm1, %v5995_v13  ;;  %v7406_v13 = vld [vmem:[#allocation6_spill] sm:$0xff] }
  0x80   : > { %5511 = vmatpush3.msk.msra.mxu1 %vm317_vm0, %v6132_v42  ;;  %5415 = vmatprep.mubr.msk.f32.mxu1 %vm220_vm1, %v6000_v14  ;;  %v7407_v42 = vld [vmem:[#allocation7_spill] sm:$0xff] }
  0x81   : > { %5463 = vmatmul.mubr.msk.f32.vlgmr.msra.gmra.mrb[48].mxu0 %vm220_vm1, %v6143_v44  ;;  %5610 = vmatprep.subr.msk.mxu1 %vm317_vm0, %v6453_v6  ;;  %v6586_v44 = vld [vmem:[%s5948_s9 + $0x181] sm:$0xff] }
  0x82   : > { %5561 = vmatpush3.msk.msra.mxu0 %vm317_vm0, %v6148_v45  ;;  %5465 = vmatprep.mubr.msk.f32.mxu0 %vm220_vm1, %v6151_v46  ;;  %v6591_v45 = vld [vmem:[%s5948_s9 + $0x188] sm:$0xff] }
  0x83   : > { %5416 = vmatmul.mubr.msk.f32.gmra.mrb[50].mxu1 %vm220_vm1, %v6017_v17  ;;  %5660 = vmatprep.subr.msk.mxu0 %vm317_vm0, %v6464_v10 }
  0x84   : > { %5418 = vmatprep.mubr.msk.f32.mxu1 %vm220_vm1, %v6022_v18 }
  0x85   : > { %5466 = vmatmul.mubr.msk.f32.gmra.mrb[50].mxu0 %vm220_vm1, %v6173_v49 }
  0x86   : > { %5468 = vmatprep.mubr.msk.f32.mxu0 %vm220_vm1, %v6176_v50 }
  0x87   : > { %5419 = vmatmul.mubr.msk.f32.gmra.mrb[52].mxu1 %vm220_vm1, %v6037_v21 }
  0x88   : > { %5421 = vmatprep.mubr.msk.f32.mxu1 %vm220_vm1, %v6042_v22 }
  0x89   : > { %5469 = vmatmul.mubr.msk.f32.gmra.mrb[52].mxu0 %vm220_vm1, %v6193_v53 }
  0x8a   : > { %5471 = vmatprep.mubr.msk.f32.mxu0 %vm220_vm1, %v6196_v54 }
  0x8b   : > { %5422 = vmatmul.mubr.msk.f32.gmra.mrb[54].mxu1 %vm220_vm1, %v6057_v25 }
  0x8c   : > { %5424 = vmatprep.mubr.msk.f32.mxu1 %vm220_vm1, %v6062_v26 }
  0x8d   : > { %5472 = vmatmul.mubr.msk.f32.gmra.mrb[54].mxu0 %vm220_vm1, %v6213_v57 }
  0x8e   : > { %5474 = vmatprep.mubr.msk.f32.mxu0 %vm220_vm1, %v6216_v58 }
  0x8f   : > { %5425 = vmatmul.mubr.msk.f32.gmra.mrb[56].mxu1 %vm220_vm1, %v6077_v29 }
  0x90   : > { %5427 = vmatprep.mubr.msk.f32.mxu1 %vm220_vm1, %v6082_v30 }
  0x91   : > { %5475 = vmatmul.mubr.msk.f32.gmra.mrb[56].mxu0 %vm220_vm1, %v6233_v61 }
  0x92   : > { %5477 = vmatprep.mubr.msk.f32.mxu0 %vm220_vm1, %v6236_v62 }
  0x93   : > { %5428 = vmatmul.mubr.msk.f32.gmra.mrb[58].mxu1 %vm220_vm1, %v6097_v33 }
  0x94   : > { %5430 = vmatprep.mubr.msk.f32.mxu1 %vm220_vm1, %v6102_v34 }
  0x95   : > { %5478 = vmatmul.mubr.msk.f32.gmra.mrb[58].mxu0 %vm220_vm1, %v6253_v1 }
  0x96   : > { %5480 = vmatprep.mubr.msk.f32.mxu0 %vm220_vm1, %v6256_v2 }
  0x97   : > { %5431 = vmatmul.mubr.msk.f32.gmra.mrb[60].mxu1 %vm220_vm1, %v6115_v37 }
  0x98   : > { %5433 = vmatprep.mubr.msk.f32.mxu1 %vm220_vm1, %v5951_v3 }
  0x99   : > { %5481 = vmatmul.mubr.msk.f32.gmra.mrb[60].mxu0 %vm220_vm1, %v6273_v8 }
  0x9a   : > { %5483 = vmatprep.mubr.msk.f32.mxu0 %vm220_vm1, %v6276_v11 }
  0x9b   : > { %5434 = vmatmul.mubr.msk.f32.gmra.mrb[62].mxu1 %vm220_vm1, %v5954_v4 }
  0x9c   : > { %5436 = vmatprep.mubr.msk.f32.mxu1 %vm220_vm1, %v5957_v5 }
  0x9d   : > { %5484 = vmatmul.mubr.msk.f32.gmra.mrb[62].mxu0 %vm220_vm1, %v6293_v39 }
  0x9e   : > { %5486 = vmatprep.mubr.msk.f32.mxu0 %vm220_vm1, %v6296_v41 }
  0x9f   : > { %5437 = vmatmul.mubr.msk.f32.gmra.mrb[64].mxu1 %vm220_vm1, %v5975_v9 }
  0xa0   : > { %5439 = vmatprep.mubr.msk.f32.mxu1 %vm220_vm1, %v5986_v12 }
  0xa1   : > { %5487 = vmatmul.mubr.msk.f32.gmra.mrb[64].mxu0 %vm220_vm1, %v6313_v0 }
  0xa2   : > { %5489 = vmatprep.mubr.msk.f32.mxu0 %vm220_vm1, %v6316_v63 }
  0xa3   : > { %5440 = vmatmul.mubr.msk.f32.gmra.mrb[66].mxu1 %vm220_vm1, %v6007_v15 }
  0xa4   : > { %5442 = vmatprep.mubr.msk.f32.mxu1 %vm220_vm1, %v6010_v16 }
  0xa5   : > { %5490 = vmatmul.mubr.msk.f32.gmra.mrb[66].mxu0 %vm220_vm1, %v6333_v60 }
  0xa6   : > { %5492 = vmatprep.mubr.msk.f32.mxu0 %vm220_vm1, %v6336_v59 }
  0xa7   : > { %5443 = vmatmul.mubr.msk.f32.gmra.mrb[68].mxu1 %vm220_vm1, %v6027_v19 }
  0xa8   : > { %5445 = vmatprep.mubr.msk.f32.mxu1 %vm220_vm1, %v6030_v20 }
  0xa9   : > { %5493 = vmatmul.mubr.msk.f32.gmra.mrb[68].mxu0 %vm220_vm1, %v6353_v56 }
  0xaa   : > { %5495 = vmatprep.mubr.msk.f32.mxu0 %vm220_vm1, %v6356_v55 }
  0xab   : > { %5446 = vmatmul.mubr.msk.f32.gmra.mrb[70].mxu1 %vm220_vm1, %v6047_v23 }
  0xac   : > { %5448 = vmatprep.mubr.msk.f32.mxu1 %vm220_vm1, %v6050_v24 }
  0xad   : > { %5496 = vmatmul.mubr.msk.f32.gmra.mrb[70].mxu0 %vm220_vm1, %v6373_v52  ;;  %v7416_v52 = vld [vmem:[#allocation16_spill] sm:$0xff] }
  0xae   : > { %5498 = vmatprep.mubr.msk.f32.mxu0 %vm220_vm1, %v6376_v51  ;;  %v7413_v51 = vld [vmem:[#allocation13_spill] sm:$0xff] }
  0xaf   : > { %5449 = vmatmul.mubr.msk.f32.gmra.mrb[72].mxu1 %vm220_vm1, %v6067_v27 }
  0xb0   : > { %5451 = vmatprep.mubr.msk.f32.mxu1 %vm220_vm1, %v6070_v28 }
  0xb1   : > { %5499 = vmatmul.mubr.msk.f32.gmra.mrb[72].mxu0 %vm220_vm1, %v6393_v48  ;;  %v7411_v48 = vld [vmem:[#allocation11_spill] sm:$0xff] }
  0xb2   : > { %5501 = vmatprep.mubr.msk.f32.mxu0 %vm220_vm1, %v6396_v47  ;;  %v7409_v47 = vld [vmem:[#allocation9_spill] sm:$0xff] }
  0xb3   : > { %5452 = vmatmul.mubr.msk.f32.gmra.mrb[74].mxu1 %vm220_vm1, %v6087_v31 }
  0xb4   : > { %5454 = vmatprep.mubr.msk.f32.mxu1 %vm220_vm1, %v7406_v13 }
  0xb5   : > { %5502 = vmatmul.mubr.msk.f32.gmra.mrb[74].mxu0 %vm220_vm1, %v6413_v43  ;;  %v6598_v43 = vld [vmem:[%s5948_s9 + $0x189] sm:$0xff] }
  0xb6   : > { %5504 = vmatprep.mubr.msk.f32.mxu0 %vm220_vm1, %v6416_v35  ;;  %v7408_v35 = vld [vmem:[#allocation8_spill] sm:$0xff] }
  0xb7   : > { %5455 = vmatmul.mubr.msk.f32.gmra.mrb[76].mxu1 %vm220_vm1, %v7407_v42 }
  0xb8   : > { %5457 = vmatprep.mubr.msk.f32.mxu1 %vm220_vm1, %v6577_v40 }
  0xb9   : > { %5505 = vmatmul.mubr.msk.f32.gmra.mrb[76].mxu0 %vm220_vm1, %v6433_v32  ;;  %v7410_v32 = vld [vmem:[#allocation10_spill] sm:$0xff] }
  0xba   : > { %5507 = vmatprep.mubr.msk.f32.mxu0 %vm220_vm1, %v6586_v44 }
  0xbb   : > { %5458 = vmatmul.mubr.msk.f32.gmra.mrb[78].mxu1 %vm220_vm1, %v6591_v45 }
  0xbc   : > { %5512 = vmatprep.mubr.msk.f32.mxu1 %vm220_vm1, %v7408_v35 }
  0xbd   : > { %5508 = vmatmul.mubr.msk.f32.gmra.mrb[78].mxu0 %vm220_vm1, %v6598_v43 }
  0xbe   : > { %5562 = vmatprep.mubr.msk.f32.mxu0 %vm220_vm1, %v6000_v14  ;;  %v7412_v14 = vld [vmem:[#allocation12_spill] sm:$0xff] }
  0xbf   : > { %5513 = vmatmul.mubr.msk.f32.vlgmr.msra.gmra.mrb[80].mxu1 %vm220_vm1, %v7409_v47 }
  0xc0   : > { %5611 = vmatpush3.msk.msra.mxu1 %vm317_vm0, %v6453_v6  ;;  %5515 = vmatprep.mubr.msk.f32.mxu1 %vm220_vm1, %v7410_v32 }
  0xc1   : > { %5563 = vmatmul.mubr.msk.f32.vlgmr.msra.gmra.mrb[80].mxu0 %vm220_vm1, %v6017_v17  ;;  %v7414_v17 = vld [vmem:[#allocation14_spill] sm:$0xff] }
  0xc2   : > { %5661 = vmatpush3.msk.msra.mxu0 %vm317_vm0, %v6464_v10  ;;  %5565 = vmatprep.mubr.msk.f32.mxu0 %vm220_vm1, %v6022_v18  ;;  %v7415_v18 = vld [vmem:[#allocation15_spill] sm:$0xff] }
  0xc3   : > { %5516 = vmatmul.mubr.msk.f32.gmra.mrb[82].mxu1 %vm220_vm1, %v7411_v48 }
  0xc4   : > { %5518 = vmatprep.mubr.msk.f32.mxu1 %vm220_vm1, %v7412_v14 }
  0xc5   : > { %5566 = vmatmul.mubr.msk.f32.gmra.mrb[82].mxu0 %vm220_vm1, %v6037_v21  ;;  %v7417_v21 = vld [vmem:[#allocation17_spill] sm:$0xff] }
  0xc6   : > { %5568 = vmatprep.mubr.msk.f32.mxu0 %vm220_vm1, %v6042_v22  ;;  %v7418_v22 = vld [vmem:[#allocation18_spill] sm:$0xff] }
  0xc7   : > { %5519 = vmatmul.mubr.msk.f32.gmra.mrb[84].mxu1 %vm220_vm1, %v7413_v51 }
  0xc8   : > { %5521 = vmatprep.mubr.msk.f32.mxu1 %vm220_vm1, %v7414_v17 }
  0xc9   : > { %5569 = vmatmul.mubr.msk.f32.gmra.mrb[84].mxu0 %vm220_vm1, %v6057_v25  ;;  %v7419_v25 = vld [vmem:[#allocation19_spill] sm:$0xff] }
  0xca   : > { %5571 = vmatprep.mubr.msk.f32.mxu0 %vm220_vm1, %v6062_v26  ;;  %v7420_v26 = vld [vmem:[#allocation20_spill] sm:$0xff] }
  0xcb   : > { %5522 = vmatmul.mubr.msk.f32.gmra.mrb[86].mxu1 %vm220_vm1, %v7415_v18 }
  0xcc   : > { %5524 = vmatprep.mubr.msk.f32.mxu1 %vm220_vm1, %v7416_v52 }
  0xcd   : > { %5572 = vmatmul.mubr.msk.f32.gmra.mrb[86].mxu0 %vm220_vm1, %v6077_v29  ;;  %v7421_v29 = vld [vmem:[#allocation21_spill] sm:$0xff] }
  0xce   : > { %5574 = vmatprep.mubr.msk.f32.mxu0 %vm220_vm1, %v6082_v30  ;;  %v7422_v30 = vld [vmem:[#allocation22_spill] sm:$0xff] }
  0xcf   : > { %5525 = vmatmul.mubr.msk.f32.gmra.mrb[88].mxu1 %vm220_vm1, %v7417_v21 }
  0xd0   : > { %5527 = vmatprep.mubr.msk.f32.mxu1 %vm220_vm1, %v7418_v22 }
  0xd1   : > { %5575 = vmatmul.mubr.msk.f32.gmra.mrb[88].mxu0 %vm220_vm1, %v6097_v33  ;;  %v7423_v33 = vld [vmem:[#allocation23_spill] sm:$0xff] }
  0xd2   : > { %5577 = vmatprep.mubr.msk.f32.mxu0 %vm220_vm1, %v6102_v34  ;;  %v7424_v34 = vld [vmem:[#allocation24_spill] sm:$0xff] }
  0xd3   : > { %5528 = vmatmul.mubr.msk.f32.gmra.mrb[90].mxu1 %vm220_vm1, %v7419_v25 }
  0xd4   : > { %5530 = vmatprep.mubr.msk.f32.mxu1 %vm220_vm1, %v7420_v26 }
  0xd5   : > { %5578 = vmatmul.mubr.msk.f32.gmra.mrb[90].mxu0 %vm220_vm1, %v6115_v37  ;;  %v7426_v37 = vld [vmem:[#allocation26_spill] sm:$0xff] }
  0xd6   : > { %5580 = vmatprep.mubr.msk.f32.mxu0 %vm220_vm1, %v5951_v3  ;;  %v7425_v3 = vld [vmem:[#allocation25_spill] sm:$0xff] }
  0xd7   : > { %5531 = vmatmul.mubr.msk.f32.gmra.mrb[92].mxu1 %vm220_vm1, %v7421_v29 }
  0xd8   : > { %5533 = vmatprep.mubr.msk.f32.mxu1 %vm220_vm1, %v7422_v30 }
  0xd9   : > { %5581 = vmatmul.mubr.msk.f32.gmra.mrb[92].mxu0 %vm220_vm1, %v5954_v4  ;;  %v7427_v4 = vld [vmem:[#allocation27_spill] sm:$0xff] }
  0xda   : > { %5583 = vmatprep.mubr.msk.f32.mxu0 %vm220_vm1, %v5957_v5  ;;  %v7428_v5 = vld [vmem:[#allocation28_spill] sm:$0xff] }
  0xdb   : > { %5534 = vmatmul.mubr.msk.f32.gmra.mrb[94].mxu1 %vm220_vm1, %v7423_v33 }
  0xdc   : > { %5536 = vmatprep.mubr.msk.f32.mxu1 %vm220_vm1, %v7424_v34 }
  0xdd   : > { %5584 = vmatmul.mubr.msk.f32.gmra.mrb[94].mxu0 %vm220_vm1, %v5975_v9  ;;  %v7429_v9 = vld [vmem:[#allocation29_spill] sm:$0xff] }
  0xde   : > { %5586 = vmatprep.mubr.msk.f32.mxu0 %vm220_vm1, %v5986_v12  ;;  %v7430_v12 = vld [vmem:[#allocation30_spill] sm:$0xff] }
  0xdf   : > { %5537 = vmatmul.mubr.msk.f32.gmra.mrb[96].mxu1 %vm220_vm1, %v7425_v3 }
  0xe0   : > { %5539 = vmatprep.mubr.msk.f32.mxu1 %vm220_vm1, %v7426_v37 }
  0xe1   : > { %5587 = vmatmul.mubr.msk.f32.gmra.mrb[96].mxu0 %vm220_vm1, %v6007_v15  ;;  %v7431_v15 = vld [vmem:[#allocation31_spill] sm:$0xff] }
  0xe2   : > { %5589 = vmatprep.mubr.msk.f32.mxu0 %vm220_vm1, %v6010_v16  ;;  %v7432_v16 = vld [vmem:[#allocation32_spill] sm:$0xff] }
  0xe3   : > { %5540 = vmatmul.mubr.msk.f32.gmra.mrb[98].mxu1 %vm220_vm1, %v7427_v4 }
  0xe4   : > { %5542 = vmatprep.mubr.msk.f32.mxu1 %vm220_vm1, %v7428_v5 }
  0xe5   : > { %5590 = vmatmul.mubr.msk.f32.gmra.mrb[98].mxu0 %vm220_vm1, %v6027_v19  ;;  %v7433_v19 = vld [vmem:[#allocation33_spill] sm:$0xff] }
  0xe6   : > { %5592 = vmatprep.mubr.msk.f32.mxu0 %vm220_vm1, %v6030_v20 }
  0xe7   : > { %5543 = vmatmul.mubr.msk.f32.gmra.mrb[100].mxu1 %vm220_vm1, %v7429_v9 }
  0xe8   : > { %5545 = vmatprep.mubr.msk.f32.mxu1 %vm220_vm1, %v7430_v12 }
  0xe9   : > { %5593 = vmatmul.mubr.msk.f32.gmra.mrb[100].mxu0 %vm220_vm1, %v6047_v23 }
  0xea   : > { %5595 = vmatprep.mubr.msk.f32.mxu0 %vm220_vm1, %v6050_v24  ;;  %v7434_v24 = vld [vmem:[#allocation34_spill] sm:$0xff] }
  0xeb   : > { %5546 = vmatmul.mubr.msk.f32.gmra.mrb[102].mxu1 %vm220_vm1, %v7431_v15 }
  0xec   : > { %5548 = vmatprep.mubr.msk.f32.mxu1 %vm220_vm1, %v7432_v16 }
  0xed   : > { %5596 = vmatmul.mubr.msk.f32.gmra.mrb[102].mxu0 %vm220_vm1, %v6067_v27 }
  0xee   : > { %5598 = vmatprep.mubr.msk.f32.mxu0 %vm220_vm1, %v6070_v28  ;;  %v6723_v28 = vld [vmem:[%s5948_s9 + $0x182] sm:$0xff] }
  0xef   : > { %5549 = vmatmul.mubr.msk.f32.gmra.mrb[104].mxu1 %vm220_vm1, %v7433_v19 }
  0xf0   : > { %5551 = vmatprep.mubr.msk.f32.mxu1 %vm220_vm1, %v6408_v36  ;;  %v6739_v36 = vld [vmem:[%s5948_s9 + $0x18a] sm:$0xff] }
  0xf1   : > { %5599 = vmatmul.mubr.msk.f32.gmra.mrb[104].mxu0 %vm220_vm1, %v6087_v31 }
  0xf2   : > { %v5288_v20 = vpop.f32.mrb[0].mxu1  ;;  %5601 = vmatprep.mubr.msk.f32.mxu0 %vm220_vm1, %v7406_v13 }
  0xf3   : > { %564 = vst.msk [vmem:[#allocation2 + $0x88] sm:$0xff] %vm546_vm2, %v5288_v20  ;;  %v467_v23 = vpop.f32.mrb[1].mxu1  ;;  %5552 = vmatmul.mubr.msk.f32.gmra.mrb[106].mxu1 %vm220_vm1, %v7434_v24 }
  0xf4   : > { %563 = vst.msk [vmem:[#allocation2 + $0x80] sm:$0xff] %vm546_vm2, %v467_v23  ;;  %5554 = vmatprep.mubr.msk.f32.mxu1 %vm220_vm1, %v6428_v7  ;;  %v5264_v27 = vpop.f32.mrb[0].mxu0  ;;  %v4788_v7 = vld [vmem:[%s5948_s9 + $0x198] sm:$0xff] }
  0xf5   : > { %548 = vst.msk [vmem:[#allocation2 + $0x8] sm:$0xff] %vm546_vm2, %v5264_v27  ;;  %v387_v31 = vpop.f32.mrb[1].mxu0  ;;  %5602 = vmatmul.mubr.msk.f32.gmra.mrb[106].mxu0 %vm220_vm1, %v7407_v42 }
  0xf6   : > { %v5291_v55 = vpop.f32.mrb[2].mxu1  ;;  %547 = vst.msk [vmem:[#allocation2] sm:$0xff] %vm546_vm2, %v387_v31  ;;  %5604 = vmatprep.mubr.msk.f32.mxu0 %vm220_vm1, %v6577_v40 }
  0xf7   : > { %566 = vst.msk [vmem:[#allocation2 + $0x98] sm:$0xff] %vm546_vm2, %v5291_v55  ;;  %v477_v6 = vpop.f32.mrb[3].mxu1  ;;  %5555 = vmatmul.mubr.msk.f32.gmra.mrb[108].mxu1 %vm220_vm1, %v6440_v38  ;;  %v4789_v38 = vld [vmem:[%s5948_s9 + $0x1a0] sm:$0xff] }
  0xf8   : > { %565 = vst.msk [vmem:[#allocation2 + $0x90] sm:$0xff] %vm546_vm2, %v477_v6  ;;  %5557 = vmatprep.mubr.msk.f32.mxu1 %vm220_vm1, %v6723_v28  ;;  %v5267_v10 = vpop.f32.mrb[2].mxu0 }
  0xf9   : > { %550 = vst.msk [vmem:[#allocation2 + $0x18] sm:$0xff] %vm546_vm2, %v5267_v10  ;;  %v397_v13 = vpop.f32.mrb[3].mxu0  ;;  %5605 = vmatmul.mubr.msk.f32.gmra.mrb[108].mxu0 %vm220_vm1, %v6591_v45 }
  0xfa   : > { %v5294_v40 = vpop.f32.mrb[4].mxu1  ;;  %549 = vst.msk [vmem:[#allocation2 + $0x10] sm:$0xff] %vm546_vm2, %v397_v13  ;;  %5607 = vmatprep.mubr.msk.f32.mxu0 %vm220_vm1, %v4788_v7 }
  0xfb   : > { %568 = vst.msk [vmem:[#allocation2 + $0xa8] sm:$0xff] %vm546_vm2, %v5294_v40  ;;  %v487_v42 = vpop.f32.mrb[5].mxu1  ;;  %5558 = vmatmul.mubr.msk.f32.gmra.mrb[110].mxu1 %vm220_vm1, %v6739_v36 }
  0xfc   : > { %567 = vst.msk [vmem:[#allocation2 + $0xa0] sm:$0xff] %vm546_vm2, %v487_v42  ;;  %5612 = vmatprep.mubr.msk.f32.mxu1 %vm220_vm1, %v6151_v46  ;;  %v5270_v35 = vpop.f32.mrb[4].mxu0 }
  0xfd   : > { %552 = vst.msk [vmem:[#allocation2 + $0x28] sm:$0xff] %vm546_vm2, %v5270_v35  ;;  %v407_v45 = vpop.f32.mrb[5].mxu0  ;;  %5608 = vmatmul.mubr.msk.f32.gmra.mrb[110].mxu0 %vm220_vm1, %v4789_v38  ;;  %v937_v12 = vld [vmem:[#allocation2] sm:$0xff] }
  0xfe   : > { %v5297_v47 = vpop.f32.mrb[6].mxu1  ;;  %551 = vst.msk [vmem:[#allocation2 + $0x20] sm:$0xff] %vm546_vm2, %v407_v45  ;;  %5662 = vmatprep.mubr.msk.f32.mxu0 %vm220_vm1, %v7410_v32  ;;  %v4907_v38 = vld [vmem:[%s5948_s9 + $0xfa] sm:$0xff]  ;;  %v4908_v45 = vld [vmem:[%s5948_s9 + $0x10a] sm:$0xff] }
  0xff   : > { %570 = vst.msk [vmem:[#allocation2 + $0xb8] sm:$0xff] %vm546_vm2, %v5297_v47  ;;  %v497_v37 = vpop.f32.mrb[7].mxu1  ;;  %5613 = vmatmul.mubr.msk.f32.vlgmr.msra.gmra.mrb[112].mxu1 %vm220_vm1, %v6173_v49 }
 0x100   : > { %569 = vst.msk [vmem:[#allocation2 + $0xb0] sm:$0xff] %vm546_vm2, %v497_v37  ;;  %5615 = vmatprep.mubr.msk.f32.mxu1 %vm220_vm1, %v6176_v50  ;;  %v5273_v46 = vpop.f32.mrb[6].mxu0  ;;  %v940_v16 = vld [vmem:[#allocation2 + $0x18] sm:$0xff] }
 0x101   : > { %554 = vst.msk [vmem:[#allocation2 + $0x38] sm:$0xff] %vm546_vm2, %v5273_v46  ;;  %v417_v4 = vpop.f32.mrb[7].mxu0  ;;  %5663 = vmatmul.mubr.msk.f32.vlgmr.msra.gmra.mrb[112].mxu0 %vm220_vm1, %v7411_v48  ;;  %v939_v20 = vld [vmem:[#allocation2 + $0x10] sm:$0xff] }
 0x102   : > { %v5300_v5 = vpop.f32.mrb[8].mxu1  ;;  %553 = vst.msk [vmem:[#allocation2 + $0x30] sm:$0xff] %vm546_vm2, %v417_v4  ;;  %5665 = vmatprep.mubr.msk.f32.mxu0 %vm220_vm1, %v7412_v14 }
 0x103   : > { %572 = vst.msk [vmem:[#allocation2 + $0xc8] sm:$0xff] %vm546_vm2, %v5300_v5  ;;  %v507_v49 = vpop.f32.mrb[9].mxu1  ;;  %5616 = vmatmul.mubr.msk.f32.gmra.mrb[114].mxu1 %vm220_vm1, %v6193_v53  ;;  %v4844_v5 = vld [vmem:[%s5948_s9 + $0x121] sm:$0xff] }
 0x104   : > { %571 = vst.msk [vmem:[#allocation2 + $0xc0] sm:$0xff] %vm546_vm2, %v507_v49  ;;  %5618 = vmatprep.mubr.msk.f32.mxu1 %vm220_vm1, %v6196_v54  ;;  %v5276_v50 = vpop.f32.mrb[8].mxu0  ;;  %v942_v24 = vld [vmem:[#allocation2 + $0x28] sm:$0xff] }
 0x105   : > { %556 = vst.msk [vmem:[#allocation2 + $0x48] sm:$0xff] %vm546_vm2, %v5276_v50  ;;  %v427_v32 = vpop.f32.mrb[9].mxu0  ;;  %5666 = vmatmul.mubr.msk.f32.gmra.mrb[114].mxu0 %vm220_vm1, %v7413_v51  ;;  %v941_v31 = vld [vmem:[#allocation2 + $0x20] sm:$0xff] }
 0x106   : > { %v5303_v48 = vpop.f32.mrb[10].mxu1  ;;  %555 = vst.msk [vmem:[#allocation2 + $0x40] sm:$0xff] %vm546_vm2, %v427_v32  ;;  %5668 = vmatprep.mubr.msk.f32.mxu0 %vm220_vm1, %v7414_v17 }
 0x107   : > { %574 = vst.msk [vmem:[#allocation2 + $0xd8] sm:$0xff] %vm546_vm2, %v5303_v48  ;;  %v517_v53 = vpop.f32.mrb[11].mxu1  ;;  %5619 = vmatmul.mubr.msk.f32.gmra.mrb[116].mxu1 %vm220_vm1, %v6213_v57  ;;  %v4909_v48 = vld [vmem:[%s5948_s9 + $0x112] sm:$0xff] }
 0x108   : > { %573 = vst.msk [vmem:[#allocation2 + $0xd0] sm:$0xff] %vm546_vm2, %v517_v53  ;;  %5621 = vmatprep.mubr.msk.f32.mxu1 %vm220_vm1, %v6216_v58  ;;  %v5279_v54 = vpop.f32.mrb[10].mxu0  ;;  %v944_v40 = vld [vmem:[#allocation2 + $0x38] sm:$0xff] }
 0x109   : > { %558 = vst.msk [vmem:[#allocation2 + $0x58] sm:$0xff] %vm546_vm2, %v5279_v54  ;;  %v437_v14 = vpop.f32.mrb[11].mxu0  ;;  %5669 = vmatmul.mubr.msk.f32.gmra.mrb[116].mxu0 %vm220_vm1, %v7415_v18  ;;  %v943_v35 = vld [vmem:[#allocation2 + $0x30] sm:$0xff] }
 0x10a   : > { %v5306_v51 = vpop.f32.mrb[12].mxu1  ;;  %557 = vst.msk [vmem:[#allocation2 + $0x50] sm:$0xff] %vm546_vm2, %v437_v14  ;;  %5671 = vmatprep.mubr.msk.f32.mxu0 %vm220_vm1, %v7416_v52  ;;  %v4910_v14 = vld [vmem:[%s5948_s9 + $0x122] sm:$0xff] }
 0x10b   : > { %576 = vst.msk [vmem:[#allocation2 + $0xe8] sm:$0xff] %vm546_vm2, %v5306_v51  ;;  %v527_v57 = vpop.f32.mrb[13].mxu1  ;;  %5622 = vmatmul.mubr.msk.f32.gmra.mrb[118].mxu1 %vm220_vm1, %v6233_v61 }
 0x10c   : > { %575 = vst.msk [vmem:[#allocation2 + $0xe0] sm:$0xff] %vm546_vm2, %v527_v57  ;;  %5624 = vmatprep.mubr.msk.f32.mxu1 %vm220_vm1, %v6236_v62  ;;  %v5282_v58 = vpop.f32.mrb[12].mxu0  ;;  %v946_v32 = vld [vmem:[#allocation2 + $0x48] sm:$0xff] }
 0x10d   : > { %560 = vst.msk [vmem:[#allocation2 + $0x68] sm:$0xff] %vm546_vm2, %v5282_v58  ;;  %v447_v17 = vpop.f32.mrb[13].mxu0  ;;  %5672 = vmatmul.mubr.msk.f32.gmra.mrb[118].mxu0 %vm220_vm1, %v7417_v21  ;;  %v945_v54 = vld [vmem:[#allocation2 + $0x40] sm:$0xff]  ;;  %v4845_v58 = vld [vmem:[%s5948_s9 + $0x129] sm:$0xff] }
 0x10e   : > { %v5309_v18 = vpop.f32.mrb[14].mxu1  ;;  %559 = vst.msk [vmem:[#allocation2 + $0x60] sm:$0xff] %vm546_vm2, %v447_v17  ;;  %5674 = vmatprep.mubr.msk.f32.mxu0 %vm220_vm1, %v7418_v22  ;;  %v938_v22 = vld [vmem:[#allocation2 + $0x8] sm:$0xff] }
 0x10f   : > { %578 = vst.msk [vmem:[#allocation2 + $0xf8] sm:$0xff] %vm546_vm2, %v5309_v18  ;;  %v537_v61 = vpop.f32.mrb[15].mxu1  ;;  %5625 = vmatmul.mubr.msk.f32.gmra.mrb[120].mxu1 %vm220_vm1, %v6253_v1 }
 0x110   : > { %577 = vst.msk [vmem:[#allocation2 + $0xf0] sm:$0xff] %vm546_vm2, %v537_v61  ;;  %5627 = vmatprep.mubr.msk.f32.mxu1 %vm220_vm1, %v6256_v2  ;;  %v5285_v62 = vpop.f32.mrb[14].mxu0 }
 0x111   : > { %562 = vst.msk [vmem:[#allocation2 + $0x78] sm:$0xff] %vm546_vm2, %v5285_v62  ;;  %v457_v52 = vpop.f32.mrb[15].mxu0  ;;  %5675 = vmatmul.mubr.msk.f32.gmra.mrb[120].mxu0 %vm220_vm1, %v7419_v25  ;;  %v4846_v62 = vld [vmem:[%s5948_s9 + $0x139] sm:$0xff] }
 0x112   : > { %v5314_v21 = vpop.f32.mrb[16].mxu1  ;;  %561 = vst.msk [vmem:[#allocation2 + $0x70] sm:$0xff] %vm546_vm2, %v457_v52  ;;  %5677 = vmatprep.mubr.msk.f32.mxu0 %vm220_vm1, %v7420_v26 }
 0x113   : > { %v970_v1 = vadd.f32 %v5314_v21, %v938_v22  ;;  %v778_v9 = vpop.f32.mrb[17].mxu1  ;;  %5628 = vmatmul.mubr.msk.f32.gmra.mrb[122].mxu1 %vm220_vm1, %v6273_v8  ;;  %v948_v22 = vld [vmem:[#allocation2 + $0x58] sm:$0xff] }
 0x114   : > { %v969_v2 = vadd.f32 %v937_v12, %v778_v9  ;;  %5630 = vmatprep.mubr.msk.f32.mxu1 %vm220_vm1, %v6276_v11  ;;  %v5364_v15 = vpop.f32.mrb[16].mxu0 }
 0x115   : > { %1002 = vst.msk [vmem:[#allocation2 + $0x8] sm:$0xff] %vm546_vm2, %v970_v1  ;;  %v1232_v25 = vpop.f32.mrb[17].mxu0  ;;  %5678 = vmatmul.mubr.msk.f32.gmra.mrb[122].mxu0 %vm220_vm1, %v7421_v29  ;;  %v4911_v1 = vld [vmem:[%s5948_s9 + $0x12a] sm:$0xff] }
 0x116   : > { %1001 = vst.msk [vmem:[#allocation2] sm:$0xff] %vm546_vm2, %v969_v2  ;;  %v5317_v26 = vpop.f32.mrb[18].mxu1  ;;  %5680 = vmatprep.mubr.msk.f32.mxu0 %vm220_vm1, %v7422_v30  ;;  %v947_v2 = vld [vmem:[#allocation2 + $0x50] sm:$0xff] }
 0x117   : > { %v972_v19 = vadd.f32 %v5317_v26, %v940_v16  ;;  %v788_v8 = vpop.f32.mrb[19].mxu1  ;;  %5631 = vmatmul.mubr.msk.f32.gmra.mrb[124].mxu1 %vm220_vm1, %v6293_v39  ;;  %v4847_v16 = vld [vmem:[%s5948_s9 + $0x141] sm:$0xff] }
 0x118   : > { %v971_v11 = vadd.f32 %v939_v20, %v788_v8  ;;  %5633 = vmatprep.mubr.msk.f32.mxu1 %vm220_vm1, %v6296_v41  ;;  %v5367_v23 = vpop.f32.mrb[18].mxu0  ;;  %v4906_v41 = vld [vmem:[%s5948_s9 + $0xf2] sm:$0xff] }
 0x119   : > { %1004 = vst.msk [vmem:[#allocation2 + $0x18] sm:$0xff] %vm546_vm2, %v972_v19  ;;  %v1242_v29 = vpop.f32.mrb[19].mxu0  ;;  %5681 = vmatmul.mubr.msk.f32.gmra.mrb[124].mxu0 %vm220_vm1, %v7423_v33 }
 0x11a   : > { %1003 = vst.msk [vmem:[#allocation2 + $0x10] sm:$0xff] %vm546_vm2, %v971_v11  ;;  %v5320_v30 = vpop.f32.mrb[20].mxu1  ;;  %5683 = vmatprep.mubr.msk.f32.mxu0 %vm220_vm1, %v7424_v34  ;;  %v4848_v11 = vld [vmem:[%s5948_s9 + $0x151] sm:$0xff] }
 0x11b   : > { %v974_v27 = vadd.f32 %v5320_v30, %v942_v24  ;;  %v798_v39 = vpop.f32.mrb[21].mxu1  ;;  %5634 = vmatmul.mubr.msk.f32.gmra.mrb[126].mxu1 %vm220_vm1, %v6313_v0  ;;  %v950_v24 = vld [vmem:[#allocation2 + $0x68] sm:$0xff] }
 0x11c   : > { %v973_v55 = vadd.f32 %v941_v31, %v798_v39  ;;  %v1392_v6 = vld [vmem:[#allocation2 + $0x8] sm:$0xff]  ;;  %5636 = vmatprep.mubr.msk.f32.mxu1 %vm220_vm1, %v6316_v63  ;;  %v5370_v33 = vpop.f32.mrb[20].mxu0 }
 0x11d   : > { %1006 = vst.msk [vmem:[#allocation2 + $0x28] sm:$0xff] %vm546_vm2, %v974_v27  ;;  %v1424_v7 = vadd.f32 %v5364_v15, %v1392_v6  ;;  %v1391_v10 = vld [vmem:[#allocation2] sm:$0xff]  ;;  %v1252_v34 = vpop.f32.mrb[21].mxu0  ;;  %5684 = vmatmul.mubr.msk.f32.gmra.mrb[126].mxu0 %vm220_vm1, %v7425_v3 }
 0x11e   : > { %1005 = vst.msk [vmem:[#allocation2 + $0x20] sm:$0xff] %vm546_vm2, %v973_v55  ;;  %v1423_v0 = vadd.f32 %v1391_v10, %v1232_v25  ;;  %v5323_v13 = vpop.f32.mrb[22].mxu1  ;;  %5686 = vmatprep.mubr.msk.f32.mxu0 %vm220_vm1, %v4906_v41  ;;  %v4912_v15 = vld [vmem:[%s5948_s9 + $0x13a] sm:$0xff]  ;;  %v4913_v27 = vld [vmem:[%s5948_s9 + $0x142] sm:$0xff]  ;;  %v4914_v55 = vld [vmem:[%s5948_s9 + $0x152] sm:$0xff] }
 0x11f   : > { %1456 = vst.msk [vmem:[#allocation2 + $0x8] sm:$0xff] %vm546_vm2, %v1424_v7  ;;  %v976_v63 = vadd.f32 %v5323_v13, %v944_v40  ;;  %v808_v42 = vpop.f32.mrb[23].mxu1  ;;  %5637 = vmatmul.mubr.msk.f32.gmra.mrb[128].mxu1 %vm220_vm1, %v6333_v60  ;;  %v949_v41 = vld [vmem:[#allocation2 + $0x60] sm:$0xff]  ;;  %v4850_v13 = vld [vmem:[%s5948_s9 + $0x169] sm:$0xff] }
 0x120   : > { %1455 = vst.msk [vmem:[#allocation2] sm:$0xff] %vm546_vm2, %v1423_v0  ;;  %v975_v3 = vadd.f32 %v943_v35, %v808_v42  ;;  %v1394_v47 = vld [vmem:[#allocation2 + $0x18] sm:$0xff]  ;;  %5639 = vmatprep.mubr.msk.f32.mxu1 %vm220_vm1, %v6336_v59  ;;  %v5373_v37 = vpop.f32.mrb[22].mxu0 }
 0x121   : > { %1008 = vst.msk [vmem:[#allocation2 + $0x38] sm:$0xff] %vm546_vm2, %v976_v63  ;;  %v1426_v46 = vadd.f32 %v5367_v23, %v1394_v47  ;;  %v1393_v4 = vld [vmem:[#allocation2 + $0x10] sm:$0xff]  ;;  %v1262_v49 = vpop.f32.mrb[23].mxu0  ;;  %5687 = vmatmul.mubr.msk.f32.gmra.mrb[128].mxu0 %vm220_vm1, %v4907_v38  ;;  %v4849_v7 = vld [vmem:[%s5948_s9 + $0x159] sm:$0xff] }
 0x122   : > { %1007 = vst.msk [vmem:[#allocation2 + $0x30] sm:$0xff] %vm546_vm2, %v975_v3  ;;  %v1425_v60 = vadd.f32 %v1393_v4, %v1242_v29  ;;  %v5326_v50 = vpop.f32.mrb[24].mxu1  ;;  %5689 = vmatprep.mubr.msk.f32.mxu0 %vm220_vm1, %v4908_v45  ;;  %v952_v42 = vld [vmem:[#allocation2 + $0x78] sm:$0xff]  ;;  %v951_v47 = vld [vmem:[#allocation2 + $0x70] sm:$0xff] }
 0x123   : > { %1458 = vst.msk [vmem:[#allocation2 + $0x18] sm:$0xff] %vm546_vm2, %v1426_v46  ;;  %v978_v59 = vadd.f32 %v5326_v50, %v946_v32  ;;  %v818_v53 = vpop.f32.mrb[25].mxu1  ;;  %5640 = vmatmul.mubr.msk.f32.gmra.mrb[130].mxu1 %vm220_vm1, %v6353_v56  ;;  %v4915_v35 = vld [vmem:[%s5948_s9 + $0x15a] sm:$0xff] }
 0x124   : > { %1457 = vst.msk [vmem:[#allocation2 + $0x10] sm:$0xff] %vm546_vm2, %v1425_v60  ;;  %v977_v51 = vadd.f32 %v945_v54, %v818_v53  ;;  %v1396_v57 = vld [vmem:[#allocation2 + $0x28] sm:$0xff]  ;;  %5642 = vmatprep.mubr.msk.f32.mxu1 %vm220_vm1, %v4844_v5  ;;  %v5376_v17 = vpop.f32.mrb[24].mxu0  ;;  %v4851_v5 = vld [vmem:[%s5948_s9 + $0x171] sm:$0xff] }
 0x125   : > { %1010 = vst.msk [vmem:[#allocation2 + $0x48] sm:$0xff] %vm546_vm2, %v978_v59  ;;  %v1428_v18 = vadd.f32 %v5370_v33, %v1396_v57  ;;  %v1395_v61 = vld [vmem:[#allocation2 + $0x20] sm:$0xff]  ;;  %v1272_v52 = vpop.f32.mrb[25].mxu0  ;;  %5690 = vmatmul.mubr.msk.f32.gmra.mrb[130].mxu0 %vm220_vm1, %v4909_v48  ;;  %v954_v53 = vld [vmem:[#allocation2 + $0x88] sm:$0xff]  ;;  %v4917_v54 = vld [vmem:[%s5948_s9 + $0x172] sm:$0xff] }
 0x126   : > { %1009 = vst.msk [vmem:[#allocation2 + $0x40] sm:$0xff] %vm546_vm2, %v977_v51  ;;  %v1427_v56 = vadd.f32 %v1395_v61, %v1252_v34  ;;  %v5329_v21 = vpop.f32.mrb[26].mxu1  ;;  %5692 = vmatprep.mubr.msk.f32.mxu0 %vm220_vm1, %v4910_v14  ;;  %v953_v57 = vld [vmem:[#allocation2 + $0x80] sm:$0xff] }
 0x127   : > { %1460 = vst.msk [vmem:[#allocation2 + $0x28] sm:$0xff] %vm546_vm2, %v1428_v18  ;;  %v980_v9 = vadd.f32 %v5329_v21, %v948_v22  ;;  %v828_v12 = vpop.f32.mrb[27].mxu1  ;;  %5643 = vmatmul.mubr.msk.f32.gmra.mrb[132].mxu1 %vm220_vm1, %v4845_v58 }
 0x128   : > { %1459 = vst.msk [vmem:[#allocation2 + $0x20] sm:$0xff] %vm546_vm2, %v1427_v56  ;;  %v979_v25 = vadd.f32 %v947_v2, %v828_v12  ;;  %v1398_v26 = vld [vmem:[#allocation2 + $0x38] sm:$0xff]  ;;  %5645 = vmatprep.mubr.msk.f32.mxu1 %vm220_vm1, %v4846_v62  ;;  %v5379_v19 = vpop.f32.mrb[26].mxu0  ;;  %v955_v12 = vld [vmem:[#allocation2 + $0x90] sm:$0xff] }
 0x129   : > { %1012 = vst.msk [vmem:[#allocation2 + $0x58] sm:$0xff] %vm546_vm2, %v980_v9  ;;  %v1430_v8 = vadd.f32 %v5373_v37, %v1398_v26  ;;  %v1397_v20 = vld [vmem:[#allocation2 + $0x30] sm:$0xff]  ;;  %v1282_v23 = vpop.f32.mrb[27].mxu0  ;;  %5693 = vmatmul.mubr.msk.f32.gmra.mrb[132].mxu0 %vm220_vm1, %v4911_v1  ;;  %v956_v1 = vld [vmem:[#allocation2 + $0x98] sm:$0xff]  ;;  %v4855_v26 = vld [vmem:[%s5948_s9 + $0x1a1] sm:$0xff] }
 0x12a   : > { %1011 = vst.msk [vmem:[#allocation2 + $0x50] sm:$0xff] %vm546_vm2, %v979_v25  ;;  %v1429_v29 = vadd.f32 %v1397_v20, %v1262_v49  ;;  %v5332_v30 = vpop.f32.mrb[28].mxu1  ;;  %5695 = vmatprep.mubr.msk.f32.mxu0 %vm220_vm1, %v4912_v15  ;;  %v4916_v37 = vld [vmem:[%s5948_s9 + $0x16a] sm:$0xff]  ;;  %v4920_v2 = vld [vmem:[%s5948_s9 + $0x19a] sm:$0xff] }
 0x12b   : > { %1462 = vst.msk [vmem:[#allocation2 + $0x38] sm:$0xff] %vm546_vm2, %v1430_v8  ;;  %v982_v39 = vadd.f32 %v5332_v30, %v950_v24  ;;  %v838_v31 = vpop.f32.mrb[29].mxu1  ;;  %5646 = vmatmul.mubr.msk.f32.gmra.mrb[134].mxu1 %vm220_vm1, %v4847_v16  ;;  %v957_v24 = vld [vmem:[#allocation2 + $0xa0] sm:$0xff] }
 0x12c   : > { %1461 = vst.msk [vmem:[#allocation2 + $0x30] sm:$0xff] %vm546_vm2, %v1429_v29  ;;  %v981_v6 = vadd.f32 %v949_v41, %v838_v31  ;;  %v1400_v33 = vld [vmem:[#allocation2 + $0x48] sm:$0xff]  ;;  %5648 = vmatprep.mubr.msk.f32.mxu1 %vm220_vm1, %v4848_v11  ;;  %v5382_v10 = vpop.f32.mrb[28].mxu0 }
 0x12d   : > { %1014 = vst.msk [vmem:[#allocation2 + $0x68] sm:$0xff] %vm546_vm2, %v982_v39  ;;  %v1432_v34 = vadd.f32 %v5376_v17, %v1400_v33  ;;  %v1399_v0 = vld [vmem:[#allocation2 + $0x40] sm:$0xff]  ;;  %v1292_v40 = vpop.f32.mrb[29].mxu0  ;;  %5696 = vmatmul.mubr.msk.f32.gmra.mrb[134].mxu0 %vm220_vm1, %v4913_v27  ;;  %v958_v11 = vld [vmem:[#allocation2 + $0xa8] sm:$0xff] }
 0x12e   : > { %1013 = vst.msk [vmem:[#allocation2 + $0x60] sm:$0xff] %vm546_vm2, %v981_v6  ;;  %v1431_v38 = vadd.f32 %v1399_v0, %v1272_v52  ;;  %v5335_v63 = vpop.f32.mrb[30].mxu1  ;;  %5698 = vmatprep.mubr.msk.f32.mxu0 %vm220_vm1, %v4914_v55  ;;  %v4854_v52 = vld [vmem:[%s5948_s9 + $0x199] sm:$0xff]  ;;  %v959_v0 = vld [vmem:[#allocation2 + $0xb0] sm:$0xff] }
 0x12f   : > { %1464 = vst.msk [vmem:[#allocation2 + $0x48] sm:$0xff] %vm546_vm2, %v1432_v34  ;;  %v984_v45 = vadd.f32 %v5335_v63, %v952_v42  ;;  %v848_v3 = vpop.f32.mrb[31].mxu1  ;;  %5649 = vmatmul.mubr.msk.f32.gmra.mrb[136].mxu1 %vm220_vm1, %v4849_v7  ;;  %v960_v7 = vld [vmem:[#allocation2 + $0xb8] sm:$0xff] }
 0x130   : > { %1463 = vst.msk [vmem:[#allocation2 + $0x40] sm:$0xff] %vm546_vm2, %v1431_v38  ;;  %v983_v46 = vadd.f32 %v951_v47, %v848_v3  ;;  %v1402_v4 = vld [vmem:[#allocation2 + $0x58] sm:$0xff]  ;;  %5651 = vmatprep.mubr.msk.f32.mxu1 %vm220_vm1, %v4850_v13  ;;  %v5385_v49 = vpop.f32.mrb[30].mxu0  ;;  %v962_v47 = vld [vmem:[#allocation2 + $0xc8] sm:$0xff] }
 0x131   : > { %1016 = vst.msk [vmem:[#allocation2 + $0x78] sm:$0xff] %vm546_vm2, %v984_v45  ;;  %v1434_v60 = vadd.f32 %v5379_v19, %v1402_v4  ;;  %v1401_v50 = vld [vmem:[#allocation2 + $0x50] sm:$0xff]  ;;  %v1302_v32 = vpop.f32.mrb[31].mxu0  ;;  %5699 = vmatmul.mubr.msk.f32.gmra.mrb[136].mxu0 %vm220_vm1, %v4915_v35  ;;  %v961_v4 = vld [vmem:[#allocation2 + $0xc0] sm:$0xff] }
 0x132   : > { %1015 = vst.msk [vmem:[#allocation2 + $0x70] sm:$0xff] %vm546_vm2, %v983_v46  ;;  %v1433_v48 = vadd.f32 %v1401_v50, %v1282_v23  ;;  %v5338_v59 = vpop.f32.mrb[32].mxu1  ;;  %5701 = vmatprep.mubr.msk.f32.mxu0 %vm220_vm1, %v4916_v37  ;;  %v4921_v23 = vld [vmem:[%s5948_s9 + $0x1a2] sm:$0xff]  ;;  %s7125_s9 = scalar_lea.vmem [#allocation3], %s7114_s8 }
 0x133   : > { %1466 = vst.msk [vmem:[#allocation2 + $0x58] sm:$0xff] %vm546_vm2, %v1434_v60  ;;  %v986_v14 = vadd.f32 %v5338_v59, %v954_v53  ;;  %v858_v51 = vpop.f32.mrb[33].mxu1  ;;  %5652 = vmatmul.mubr.msk.f32.gmra.mrb[138].mxu1 %vm220_vm1, %v4851_v5  ;;  %s4369_s11 = sshll.u32 %s7125_s9, 4  ;;  %s7270_s11 = int_to_ptr.vmem [resolvable:$true] %s4369_s11 }
 0x134   : > { %1465 = vst.msk [vmem:[#allocation2 + $0x50] sm:$0xff] %vm546_vm2, %v1433_v48  ;;  %v985_v58 = vadd.f32 %v953_v57, %v858_v51  ;;  %v1404_v17 = vld [vmem:[#allocation2 + $0x68] sm:$0xff]  ;;  %5654 = vmatprep.mubr.msk.f32.mxu1 %vm220_vm1, %v6586_v44  ;;  %v5388_v18 = vpop.f32.mrb[32].mxu0  ;;  %v963_v57 = vld [vmem:[#allocation2 + $0xd0] sm:$0xff]  ;;  %s5770_s23 = scalar_lea.vmem %s7270_s11, 4096  ;;  %p5777_p1 = scmp.lt.s32.totalorder %s7270_s11, %s5775_s27 }
 0x135   : > { %1018 = vst.msk [vmem:[#allocation2 + $0x88] sm:$0xff] %vm546_vm2, %v986_v14  ;;  %v1436_v61 = vadd.f32 %v5382_v10, %v1404_v17  ;;  %v1403_v62 = vld [vmem:[#allocation2 + $0x60] sm:$0xff]  ;;  %v1312_v56 = vpop.f32.mrb[33].mxu0  ;;  %5702 = vmatmul.mubr.msk.f32.gmra.mrb[138].mxu0 %vm220_vm1, %v4917_v54  ;;  %v964_v54 = vld [vmem:[#allocation2 + $0xd8] sm:$0xff]  ;;  %p5771_p12 = scmp.ne.s32.totalorder %s7270_s11, %s5770_s23  ;;  %p5778_p2 = scmp.lt.s32.totalorder %s5776_s28, %s5770_s23 }
 0x136   : > { %1017 = vst.msk [vmem:[#allocation2 + $0x80] sm:$0xff] %vm546_vm2, %v985_v58  ;;  %v1435_v21 = vadd.f32 %v1403_v62, %v1292_v40  ;;  %v5341_v22 = vpop.f32.mrb[34].mxu1  ;;  %5704 = vmatprep.mubr.msk.f32.mxu0 %vm220_vm1, %v6723_v28 }
 0x137   : > { %1468 = vst.msk [vmem:[#allocation2 + $0x68] sm:$0xff] %vm546_vm2, %v1436_v61  ;;  %v988_v44 = vadd.f32 %v5341_v22, %v956_v1  ;;  %v868_v9 = vpop.f32.mrb[35].mxu1  ;;  %5655 = vmatmul.mubr.msk.f32.gmra.mrb[140].mxu1 %vm220_vm1, %v6598_v43  ;;  %v966_v22 = vld [vmem:[#allocation2 + $0xe8] sm:$0xff]  ;;  %p5772_p13 = pnand %p5771_p12, %p5913_p4  ;;  %p5779_p3 = por %p5778_p2, %p5777_p1 }
 0x138   : > { %1467 = vst.msk [vmem:[#allocation2 + $0x60] sm:$0xff] %vm546_vm2, %v1435_v21  ;;  %v987_v15 = vadd.f32 %v955_v12, %v868_v9  ;;  %v1406_v25 = vld [vmem:[#allocation2 + $0x78] sm:$0xff]  ;;  %5657 = vmatprep.mubr.msk.f32.mxu1 %vm220_vm1, %v4854_v52  ;;  %v5391_v16 = vpop.f32.mrb[34].mxu0  ;;  %v965_v9 = vld [vmem:[#allocation2 + $0xe0] sm:$0xff] }
 0x139   : > { %1020 = vst.msk [vmem:[#allocation2 + $0x98] sm:$0xff] %vm546_vm2, %v988_v44  ;;  %v1438_v28 = vadd.f32 %v5385_v49, %v1406_v25  ;;  %v1405_v19 = vld [vmem:[#allocation2 + $0x70] sm:$0xff]  ;;  %v1322_v8 = vpop.f32.mrb[35].mxu0  ;;  %5705 = vmatmul.mubr.msk.f32.gmra.mrb[140].mxu0 %vm220_vm1, %v6739_v36  ;;  %p5773_p0 = pneg %p5772_p13 }
 0x13a   : > { %1019 = vst.msk [vmem:[#allocation2 + $0x90] sm:$0xff] %vm546_vm2, %v987_v15  ;;  %v1437_v43 = vadd.f32 %v1405_v19, %v1302_v32  ;;  %v5344_v20 = vpop.f32.mrb[36].mxu1  ;;  %5707 = vmatprep.mubr.msk.f32.mxu0 %vm220_vm1, %v4920_v2 }
 0x13b   : > { %1470 = vst.msk [vmem:[#allocation2 + $0x78] sm:$0xff] %vm546_vm2, %v1438_v28  ;;  %v990_v29 = vadd.f32 %v5344_v20, %v958_v11  ;;  %v878_v30 = vpop.f32.mrb[37].mxu1  ;;  %5658 = vmatmul.mubr.msk.f32.gmra.mrb[142].mxu1 %vm220_vm1, %v4855_v26  ;;  %v967_v11 = vld [vmem:[#allocation2 + $0xf0] sm:$0xff]  ;;  %p5780_p5 = pnand %p5779_p3, %p5773_p0 }
 0x13c   : > { %1469 = vst.msk [vmem:[#allocation2 + $0x70] sm:$0xff] %vm546_vm2, %v1437_v43  ;;  %v989_v27 = vadd.f32 %v957_v24, %v878_v30  ;;  %v1408_v39 = vld [vmem:[#allocation2 + $0x88] sm:$0xff]  ;;  %v5394_v36 = vpop.f32.mrb[36].mxu0 }
 0x13d   : > { %1022 = vst.msk [vmem:[#allocation2 + $0xa8] sm:$0xff] %vm546_vm2, %v990_v29  ;;  %v1440_v31 = vadd.f32 %v5388_v18, %v1408_v39  ;;  %v1407_v41 = vld [vmem:[#allocation2 + $0x80] sm:$0xff]  ;;  %v1332_v55 = vpop.f32.mrb[37].mxu0  ;;  %5708 = vmatmul.mubr.msk.f32.gmra.mrb[142].mxu0 %vm220_vm1, %v4921_v23 }
 0x13e   : > { %1021 = vst.msk [vmem:[#allocation2 + $0xa0] sm:$0xff] %vm546_vm2, %v989_v27  ;;  %v1439_v6 = vadd.f32 %v1407_v41, %v1312_v56  ;;  %v5347_v33 = vpop.f32.mrb[38].mxu1  ;;  %v1849_v41 = vld [vmem:[#allocation2 + $0x8] sm:$0xff] }
 0x13f   : > { %1472 = vst.msk [vmem:[#allocation2 + $0x88] sm:$0xff] %vm546_vm2, %v1440_v31  ;;  %v992_v10 = vadd.f32 %v5347_v33, %v960_v7  ;;  %v888_v34 = vpop.f32.mrb[39].mxu1  ;;  %v1848_v33 = vld [vmem:[#allocation2] sm:$0xff] }
 0x140   : > { %1471 = vst.msk [vmem:[#allocation2 + $0x80] sm:$0xff] %vm546_vm2, %v1439_v6  ;;  %v991_v13 = vadd.f32 %v959_v0, %v888_v34  ;;  %v1410_v40 = vld [vmem:[#allocation2 + $0x98] sm:$0xff]  ;;  %v5397_v38 = vpop.f32.mrb[38].mxu0 }
 0x141   : > { %1024 = vst.msk [vmem:[#allocation2 + $0xb8] sm:$0xff] %vm546_vm2, %v992_v10  ;;  %v1442_v63 = vadd.f32 %v5391_v16, %v1410_v40  ;;  %v1409_v42 = vld [vmem:[#allocation2 + $0x90] sm:$0xff]  ;;  %v1342_v35 = vpop.f32.mrb[39].mxu0 }
 0x142   : > { %1023 = vst.msk [vmem:[#allocation2 + $0xb0] sm:$0xff] %vm546_vm2, %v991_v13  ;;  %v1441_v45 = vadd.f32 %v1409_v42, %v1322_v8  ;;  %v5350_v3 = vpop.f32.mrb[40].mxu1  ;;  %v968_v8 = vld [vmem:[#allocation2 + $0xf8] sm:$0xff] }
 0x143   : > { %1474 = vst.msk [vmem:[#allocation2 + $0x98] sm:$0xff] %vm546_vm2, %v1442_v63  ;;  %v994_v37 = vadd.f32 %v5350_v3, %v962_v47  ;;  %v898_v46 = vpop.f32.mrb[41].mxu1  ;;  %v1851_v42 = vld [vmem:[#allocation2 + $0x18] sm:$0xff]  ;;  %v1850_v3 = vld [vmem:[#allocation2 + $0x10] sm:$0xff] }
 0x144   : > { %1473 = vst.msk [vmem:[#allocation2 + $0x90] sm:$0xff] %vm546_vm2, %v1441_v45  ;;  %v993_v5 = vadd.f32 %v961_v4, %v898_v46  ;;  %v1412_v49 = vld [vmem:[#allocation2 + $0xa8] sm:$0xff]  ;;  %v5400_v60 = vpop.f32.mrb[40].mxu0 }
 0x145   : > { %1026 = vst.msk [vmem:[#allocation2 + $0xc8] sm:$0xff] %vm546_vm2, %v994_v37  ;;  %v1444_v50 = vadd.f32 %v5394_v36, %v1412_v49  ;;  %v1411_v32 = vld [vmem:[#allocation2 + $0xa0] sm:$0xff]  ;;  %v1352_v48 = vpop.f32.mrb[41].mxu0 }
 0x146   : > { %1025 = vst.msk [vmem:[#allocation2 + $0xc0] sm:$0xff] %vm546_vm2, %v993_v5  ;;  %v1443_v59 = vadd.f32 %v1411_v32, %v1332_v55  ;;  %v5353_v53 = vpop.f32.mrb[42].mxu1  ;;  %v1853_v32 = vld [vmem:[#allocation2 + $0x28] sm:$0xff] }
 0x147   : > { %1476 = vst.msk [vmem:[#allocation2 + $0xa8] sm:$0xff] %vm546_vm2, %v1444_v50  ;;  %v996_v14 = vadd.f32 %v5353_v53, %v964_v54  ;;  %v908_v51 = vpop.f32.mrb[43].mxu1  ;;  %v1852_v53 = vld [vmem:[#allocation2 + $0x20] sm:$0xff] }
 0x148   : > { %1475 = vst.msk [vmem:[#allocation2 + $0xa0] sm:$0xff] %vm546_vm2, %v1443_v59  ;;  %v995_v58 = vadd.f32 %v963_v57, %v908_v51  ;;  %v1414_v17 = vld [vmem:[#allocation2 + $0xb8] sm:$0xff]  ;;  %v5403_v18 = vpop.f32.mrb[42].mxu0 }
 0x149   : > { %1028 = vst.msk [vmem:[#allocation2 + $0xd8] sm:$0xff] %vm546_vm2, %v996_v14  ;;  %v1446_v61 = vadd.f32 %v5397_v38, %v1414_v17  ;;  %v1413_v62 = vld [vmem:[#allocation2 + $0xb0] sm:$0xff]  ;;  %v1362_v52 = vpop.f32.mrb[43].mxu0 }
 0x14a   : > { %1027 = vst.msk [vmem:[#allocation2 + $0xd0] sm:$0xff] %vm546_vm2, %v995_v58  ;;  %v1445_v56 = vadd.f32 %v1413_v62, %v1342_v35  ;;  %v5356_v21 = vpop.f32.mrb[44].mxu1  ;;  %v1855_v62 = vld [vmem:[#allocation2 + $0x38] sm:$0xff] }
 0x14b   : > { %1478 = vst.msk [vmem:[#allocation2 + $0xb8] sm:$0xff] %vm546_vm2, %v1446_v61  ;;  %v998_v1 = vadd.f32 %v5356_v21, %v966_v22  ;;  %v918_v44 = vpop.f32.mrb[45].mxu1  ;;  %v1854_v21 = vld [vmem:[#allocation2 + $0x30] sm:$0xff] }
 0x14c   : > { %1477 = vst.msk [vmem:[#allocation2 + $0xb0] sm:$0xff] %vm546_vm2, %v1445_v56  ;;  %v997_v12 = vadd.f32 %v965_v9, %v918_v44  ;;  %v1416_v2 = vld [vmem:[#allocation2 + $0xc8] sm:$0xff]  ;;  %v5406_v15 = vpop.f32.mrb[44].mxu0 }
 0x14d   : > { %1030 = vst.msk [vmem:[#allocation2 + $0xe8] sm:$0xff] %vm546_vm2, %v998_v1  ;;  %v1448_v25 = vadd.f32 %v5400_v60, %v1416_v2  ;;  %v1415_v26 = vld [vmem:[#allocation2 + $0xc0] sm:$0xff]  ;;  %v1372_v16 = vpop.f32.mrb[45].mxu0 }
 0x14e   : > { %1029 = vst.msk [vmem:[#allocation2 + $0xe0] sm:$0xff] %vm546_vm2, %v997_v12  ;;  %v1447_v28 = vadd.f32 %v1415_v26, %v1352_v48  ;;  %v5359_v19 = vpop.f32.mrb[46].mxu1  ;;  %v1857_v26 = vld [vmem:[#allocation2 + $0x48] sm:$0xff] }
 0x14f   : > { %1480 = vst.msk [vmem:[#allocation2 + $0xc8] sm:$0xff] %vm546_vm2, %v1448_v25  ;;  %v1000_v43 = vadd.f32 %v5359_v19, %v968_v8  ;;  %v928_v20 = vpop.f32.mrb[47].mxu1  ;;  %v1856_v19 = vld [vmem:[#allocation2 + $0x40] sm:$0xff] }
 0x150   : > { %1479 = vst.msk [vmem:[#allocation2 + $0xc0] sm:$0xff] %vm546_vm2, %v1447_v28  ;;  %v999_v23 = vadd.f32 %v967_v11, %v928_v20  ;;  %v1418_v29 = vld [vmem:[#allocation2 + $0xd8] sm:$0xff]  ;;  %v5409_v30 = vpop.f32.mrb[46].mxu0 }
 0x151   : > { %1032 = vst.msk [vmem:[#allocation2 + $0xf8] sm:$0xff] %vm546_vm2, %v1000_v43  ;;  %v1450_v24 = vadd.f32 %v5403_v18, %v1418_v29  ;;  %v1417_v27 = vld [vmem:[#allocation2 + $0xd0] sm:$0xff]  ;;  %v1382_v39 = vpop.f32.mrb[47].mxu0 }
 0x152   : > { %1031 = vst.msk [vmem:[#allocation2 + $0xf0] sm:$0xff] %vm546_vm2, %v999_v23  ;;  %v1449_v36 = vadd.f32 %v1417_v27, %v1362_v52  ;;  %v5414_v31 = vpop.f32.mrb[48].mxu1  ;;  %v1859_v27 = vld [vmem:[#allocation2 + $0x58] sm:$0xff] }
 0x153   : > { %1482 = vst.msk [vmem:[#allocation2 + $0xd8] sm:$0xff] %vm546_vm2, %v1450_v24  ;;  %v1881_v55 = vadd.f32 %v5414_v31, %v1849_v41  ;;  %v1689_v6 = vpop.f32.mrb[49].mxu1  ;;  %v1858_v31 = vld [vmem:[#allocation2 + $0x50] sm:$0xff] }
 0x154   : > { %1481 = vst.msk [vmem:[#allocation2 + $0xd0] sm:$0xff] %vm546_vm2, %v1449_v36  ;;  %v1420_v7 = vld [vmem:[#allocation2 + $0xe8] sm:$0xff]  ;;  %v1880_v10 = vadd.f32 %v1848_v33, %v1689_v6  ;;  %v5464_v34 = vpop.f32.mrb[48].mxu0 }
 0x155   : > { %1913 = vst.msk [vmem:[#allocation2 + $0x8] sm:$0xff] %vm546_vm2, %v1881_v55  ;;  %v1452_v0 = vadd.f32 %v5406_v15, %v1420_v7  ;;  %v1419_v13 = vld [vmem:[#allocation2 + $0xe0] sm:$0xff]  ;;  %v2143_v40 = vpop.f32.mrb[49].mxu0 }
 0x156   : > { %1912 = vst.msk [vmem:[#allocation2] sm:$0xff] %vm546_vm2, %v1880_v10  ;;  %v1451_v38 = vadd.f32 %v1419_v13, %v1372_v16  ;;  %v5417_v63 = vpop.f32.mrb[50].mxu1  ;;  %v1861_v13 = vld [vmem:[#allocation2 + $0x68] sm:$0xff] }
 0x157   : > { %1484 = vst.msk [vmem:[#allocation2 + $0xe8] sm:$0xff] %vm546_vm2, %v1452_v0  ;;  %v1883_v35 = vadd.f32 %v5417_v63, %v1851_v42  ;;  %v1699_v45 = vpop.f32.mrb[51].mxu1  ;;  %v1860_v63 = vld [vmem:[#allocation2 + $0x60] sm:$0xff] }
 0x158   : > { %1483 = vst.msk [vmem:[#allocation2 + $0xe0] sm:$0xff] %vm546_vm2, %v1451_v38  ;;  %v1422_v47 = vld [vmem:[#allocation2 + $0xf8] sm:$0xff]  ;;  %v1882_v37 = vadd.f32 %v1850_v3, %v1699_v45  ;;  %v5467_v46 = vpop.f32.mrb[50].mxu0 }
 0x159   : > { %1915 = vst.msk [vmem:[#allocation2 + $0x18] sm:$0xff] %vm546_vm2, %v1883_v35  ;;  %v1454_v4 = vadd.f32 %v5409_v30, %v1422_v47  ;;  %v1421_v5 = vld [vmem:[#allocation2 + $0xf0] sm:$0xff]  ;;  %v2153_v49 = vpop.f32.mrb[51].mxu0 }
 0x15a   : > { %1914 = vst.msk [vmem:[#allocation2 + $0x10] sm:$0xff] %vm546_vm2, %v1882_v37  ;;  %v1453_v60 = vadd.f32 %v1421_v5, %v1382_v39  ;;  %v5420_v50 = vpop.f32.mrb[52].mxu1  ;;  %v1863_v5 = vld [vmem:[#allocation2 + $0x78] sm:$0xff] }
 0x15b   : > { %1486 = vst.msk [vmem:[#allocation2 + $0xf8] sm:$0xff] %vm546_vm2, %v1454_v4  ;;  %v1885_v48 = vadd.f32 %v5420_v50, %v1853_v32  ;;  %v1709_v59 = vpop.f32.mrb[53].mxu1  ;;  %v1862_v50 = vld [vmem:[#allocation2 + $0x70] sm:$0xff] }
 0x15c   : > { %1485 = vst.msk [vmem:[#allocation2 + $0xf0] sm:$0xff] %vm546_vm2, %v1453_v60  ;;  %v1884_v54 = vadd.f32 %v1852_v53, %v1709_v59  ;;  %v2303_v14 = vld [vmem:[#allocation2 + $0x8] sm:$0xff]  ;;  %v5470_v51 = vpop.f32.mrb[52].mxu0 }
 0x15d   : > { %1917 = vst.msk [vmem:[#allocation2 + $0x28] sm:$0xff] %vm546_vm2, %v1885_v48  ;;  %v2335_v57 = vadd.f32 %v5464_v34, %v2303_v14  ;;  %v2302_v58 = vld [vmem:[#allocation2] sm:$0xff]  ;;  %v2163_v17 = vpop.f32.mrb[53].mxu0 }
 0x15e   : > { %1916 = vst.msk [vmem:[#allocation2 + $0x20] sm:$0xff] %vm546_vm2, %v1884_v54  ;;  %v2334_v18 = vadd.f32 %v2302_v58, %v2143_v40  ;;  %v5423_v61 = vpop.f32.mrb[54].mxu1  ;;  %v1865_v58 = vld [vmem:[#allocation2 + $0x88] sm:$0xff] }
 0x15f   : > { %2367 = vst.msk [vmem:[#allocation2 + $0x8] sm:$0xff] %vm546_vm2, %v2335_v57  ;;  %v1887_v52 = vadd.f32 %v5423_v61, %v1855_v62  ;;  %v1719_v56 = vpop.f32.mrb[55].mxu1  ;;  %v1864_v61 = vld [vmem:[#allocation2 + $0x80] sm:$0xff] }
 0x160   : > { %2366 = vst.msk [vmem:[#allocation2] sm:$0xff] %vm546_vm2, %v2334_v18  ;;  %v1886_v22 = vadd.f32 %v1854_v21, %v1719_v56  ;;  %v2305_v1 = vld [vmem:[#allocation2 + $0x18] sm:$0xff]  ;;  %v5473_v44 = vpop.f32.mrb[54].mxu0 }
 0x161   : > { %1919 = vst.msk [vmem:[#allocation2 + $0x38] sm:$0xff] %vm546_vm2, %v1887_v52  ;;  %v2337_v9 = vadd.f32 %v5467_v46, %v2305_v1  ;;  %v2304_v12 = vld [vmem:[#allocation2 + $0x10] sm:$0xff]  ;;  %v2173_v2 = vpop.f32.mrb[55].mxu0 }
 0x162   : > { %1918 = vst.msk [vmem:[#allocation2 + $0x30] sm:$0xff] %vm546_vm2, %v1886_v22  ;;  %v2336_v15 = vadd.f32 %v2304_v12, %v2153_v49  ;;  %v5426_v25 = vpop.f32.mrb[56].mxu1  ;;  %v1867_v12 = vld [vmem:[#allocation2 + $0x98] sm:$0xff] }
 0x163   : > { %2369 = vst.msk [vmem:[#allocation2 + $0x18] sm:$0xff] %vm546_vm2, %v2337_v9  ;;  %v1889_v16 = vadd.f32 %v5426_v25, %v1857_v26  ;;  %v1729_v28 = vpop.f32.mrb[57].mxu1  ;;  %v1866_v25 = vld [vmem:[#allocation2 + $0x90] sm:$0xff] }
 0x164   : > { %2368 = vst.msk [vmem:[#allocation2 + $0x10] sm:$0xff] %vm546_vm2, %v2336_v15  ;;  %v1888_v8 = vadd.f32 %v1856_v19, %v1729_v28  ;;  %v2307_v43 = vld [vmem:[#allocation2 + $0x28] sm:$0xff]  ;;  %v5476_v20 = vpop.f32.mrb[56].mxu0 }
 0x165   : > { %1921 = vst.msk [vmem:[#allocation2 + $0x48] sm:$0xff] %vm546_vm2, %v1889_v16  ;;  %v2339_v11 = vadd.f32 %v5470_v51, %v2307_v43  ;;  %v2306_v23 = vld [vmem:[#allocation2 + $0x20] sm:$0xff]  ;;  %v2183_v29 = vpop.f32.mrb[57].mxu0 }
 0x166   : > { %1920 = vst.msk [vmem:[#allocation2 + $0x40] sm:$0xff] %vm546_vm2, %v1888_v8  ;;  %v2338_v30 = vadd.f32 %v2306_v23, %v2163_v17  ;;  %v5429_v24 = vpop.f32.mrb[58].mxu1  ;;  %v1869_v23 = vld [vmem:[#allocation2 + $0xa8] sm:$0xff] }
 0x167   : > { %2371 = vst.msk [vmem:[#allocation2 + $0x28] sm:$0xff] %vm546_vm2, %v2339_v11  ;;  %v1891_v39 = vadd.f32 %v5429_v24, %v1859_v27  ;;  %v1739_v36 = vpop.f32.mrb[59].mxu1  ;;  %v1868_v24 = vld [vmem:[#allocation2 + $0xa0] sm:$0xff] }
 0x168   : > { %2370 = vst.msk [vmem:[#allocation2 + $0x20] sm:$0xff] %vm546_vm2, %v2338_v30  ;;  %v1890_v41 = vadd.f32 %v1858_v31, %v1739_v36  ;;  %v2309_v55 = vld [vmem:[#allocation2 + $0x38] sm:$0xff]  ;;  %v5479_v6 = vpop.f32.mrb[58].mxu0 }
 0x169   : > { %1923 = vst.msk [vmem:[#allocation2 + $0x58] sm:$0xff] %vm546_vm2, %v1891_v39  ;;  %v2341_v33 = vadd.f32 %v5473_v44, %v2309_v55  ;;  %v2308_v7 = vld [vmem:[#allocation2 + $0x30] sm:$0xff]  ;;  %v2193_v10 = vpop.f32.mrb[59].mxu0 }
 0x16a   : > { %1922 = vst.msk [vmem:[#allocation2 + $0x50] sm:$0xff] %vm546_vm2, %v1890_v41  ;;  %v2340_v34 = vadd.f32 %v2308_v7, %v2173_v2  ;;  %v5432_v0 = vpop.f32.mrb[60].mxu1  ;;  %v1871_v7 = vld [vmem:[#allocation2 + $0xb8] sm:$0xff] }
 0x16b   : > { %2373 = vst.msk [vmem:[#allocation2 + $0x38] sm:$0xff] %vm546_vm2, %v2341_v33  ;;  %v1893_v40 = vadd.f32 %v5432_v0, %v1861_v13  ;;  %v1749_v38 = vpop.f32.mrb[61].mxu1  ;;  %v1870_v0 = vld [vmem:[#allocation2 + $0xb0] sm:$0xff] }
 0x16c   : > { %2372 = vst.msk [vmem:[#allocation2 + $0x30] sm:$0xff] %vm546_vm2, %v2340_v34  ;;  %v1892_v42 = vadd.f32 %v1860_v63, %v1749_v38  ;;  %v2311_v35 = vld [vmem:[#allocation2 + $0x48] sm:$0xff]  ;;  %v5482_v45 = vpop.f32.mrb[60].mxu0 }
 0x16d   : > { %1925 = vst.msk [vmem:[#allocation2 + $0x68] sm:$0xff] %vm546_vm2, %v1893_v40  ;;  %v2343_v3 = vadd.f32 %v5476_v20, %v2311_v35  ;;  %v2310_v47 = vld [vmem:[#allocation2 + $0x40] sm:$0xff]  ;;  %v2203_v37 = vpop.f32.mrb[61].mxu0 }
 0x16e   : > { %1924 = vst.msk [vmem:[#allocation2 + $0x60] sm:$0xff] %vm546_vm2, %v1892_v42  ;;  %v2342_v46 = vadd.f32 %v2310_v47, %v2183_v29  ;;  %v5435_v4 = vpop.f32.mrb[62].mxu1  ;;  %v1873_v47 = vld [vmem:[#allocation2 + $0xc8] sm:$0xff] }
 0x16f   : > { %2375 = vst.msk [vmem:[#allocation2 + $0x48] sm:$0xff] %vm546_vm2, %v2343_v3  ;;  %v1895_v49 = vadd.f32 %v5435_v4, %v1863_v5  ;;  %v1759_v60 = vpop.f32.mrb[63].mxu1  ;;  %v1872_v4 = vld [vmem:[#allocation2 + $0xc0] sm:$0xff] }
 0x170   : > { %2374 = vst.msk [vmem:[#allocation2 + $0x40] sm:$0xff] %vm546_vm2, %v2342_v46  ;;  %v1894_v32 = vadd.f32 %v1862_v50, %v1759_v60  ;;  %v2313_v48 = vld [vmem:[#allocation2 + $0x58] sm:$0xff]  ;;  %v5485_v59 = vpop.f32.mrb[62].mxu0 }
 0x171   : > { %1927 = vst.msk [vmem:[#allocation2 + $0x78] sm:$0xff] %vm546_vm2, %v1895_v49  ;;  %v2345_v53 = vadd.f32 %v5479_v6, %v2313_v48  ;;  %v2312_v54 = vld [vmem:[#allocation2 + $0x50] sm:$0xff]  ;;  %v2213_v14 = vpop.f32.mrb[63].mxu0 }
 0x172   : > { %1926 = vst.msk [vmem:[#allocation2 + $0x70] sm:$0xff] %vm546_vm2, %v1894_v32  ;;  %v2344_v51 = vadd.f32 %v2312_v54, %v2193_v10  ;;  %v5438_v57 = vpop.f32.mrb[64].mxu1  ;;  %v1875_v54 = vld [vmem:[#allocation2 + $0xd8] sm:$0xff] }
 0x173   : > { %2377 = vst.msk [vmem:[#allocation2 + $0x58] sm:$0xff] %vm546_vm2, %v2345_v53  ;;  %v1897_v17 = vadd.f32 %v5438_v57, %v1865_v58  ;;  %v1769_v18 = vpop.f32.mrb[65].mxu1  ;;  %v1874_v57 = vld [vmem:[#allocation2 + $0xd0] sm:$0xff] }
 0x174   : > { %2376 = vst.msk [vmem:[#allocation2 + $0x50] sm:$0xff] %vm546_vm2, %v2344_v51  ;;  %v1896_v62 = vadd.f32 %v1864_v61, %v1769_v18  ;;  %v2315_v52 = vld [vmem:[#allocation2 + $0x68] sm:$0xff]  ;;  %v5488_v56 = vpop.f32.mrb[64].mxu0 }
 0x175   : > { %1929 = vst.msk [vmem:[#allocation2 + $0x88] sm:$0xff] %vm546_vm2, %v1897_v17  ;;  %v2347_v21 = vadd.f32 %v5482_v45, %v2315_v52  ;;  %v2314_v22 = vld [vmem:[#allocation2 + $0x60] sm:$0xff]  ;;  %v2223_v1 = vpop.f32.mrb[65].mxu0 }
 0x176   : > { %1928 = vst.msk [vmem:[#allocation2 + $0x80] sm:$0xff] %vm546_vm2, %v1896_v62  ;;  %v2346_v44 = vadd.f32 %v2314_v22, %v2203_v37  ;;  %v5441_v9 = vpop.f32.mrb[66].mxu1  ;;  %v1877_v22 = vld [vmem:[#allocation2 + $0xe8] sm:$0xff] }
 0x177   : > { %2379 = vst.msk [vmem:[#allocation2 + $0x68] sm:$0xff] %vm546_vm2, %v2347_v21  ;;  %v1899_v2 = vadd.f32 %v5441_v9, %v1867_v12  ;;  %v1779_v15 = vpop.f32.mrb[67].mxu1  ;;  %v1876_v9 = vld [vmem:[#allocation2 + $0xe0] sm:$0xff] }
 0x178   : > { %2378 = vst.msk [vmem:[#allocation2 + $0x60] sm:$0xff] %vm546_vm2, %v2346_v44  ;;  %v1898_v26 = vadd.f32 %v1866_v25, %v1779_v15  ;;  %v2317_v16 = vld [vmem:[#allocation2 + $0x78] sm:$0xff]  ;;  %v5491_v28 = vpop.f32.mrb[66].mxu0 }
 0x179   : > { %1931 = vst.msk [vmem:[#allocation2 + $0x98] sm:$0xff] %vm546_vm2, %v1899_v2  ;;  %v2349_v19 = vadd.f32 %v5485_v59, %v2317_v16  ;;  %v2316_v8 = vld [vmem:[#allocation2 + $0x70] sm:$0xff]  ;;  %v2233_v43 = vpop.f32.mrb[67].mxu0 }
 0x17a   : > { %1930 = vst.msk [vmem:[#allocation2 + $0x90] sm:$0xff] %vm546_vm2, %v1898_v26  ;;  %v2348_v20 = vadd.f32 %v2316_v8, %v2213_v14  ;;  %v5444_v11 = vpop.f32.mrb[68].mxu1  ;;  %v1879_v8 = vld [vmem:[#allocation2 + $0xf8] sm:$0xff] }
 0x17b   : > { %2381 = vst.msk [vmem:[#allocation2 + $0x78] sm:$0xff] %vm546_vm2, %v2349_v19  ;;  %v1901_v29 = vadd.f32 %v5444_v11, %v1869_v23  ;;  %v1789_v30 = vpop.f32.mrb[69].mxu1  ;;  %v1878_v11 = vld [vmem:[#allocation2 + $0xf0] sm:$0xff] }
 0x17c   : > { %2380 = vst.msk [vmem:[#allocation2 + $0x70] sm:$0xff] %vm546_vm2, %v2348_v20  ;;  %v1900_v27 = vadd.f32 %v1868_v24, %v1789_v30  ;;  %v2319_v39 = vld [vmem:[#allocation2 + $0x88] sm:$0xff]  ;;  %v5494_v36 = vpop.f32.mrb[68].mxu0 }
 0x17d   : > { %1933 = vst.msk [vmem:[#allocation2 + $0xa8] sm:$0xff] %vm546_vm2, %v1901_v29  ;;  %v2351_v31 = vadd.f32 %v5488_v56, %v2319_v39  ;;  %v2318_v41 = vld [vmem:[#allocation2 + $0x80] sm:$0xff]  ;;  %v2243_v55 = vpop.f32.mrb[69].mxu0 }
 0x17e   : > { %1932 = vst.msk [vmem:[#allocation2 + $0xa0] sm:$0xff] %vm546_vm2, %v1900_v27  ;;  %v2350_v6 = vadd.f32 %v2318_v41, %v2223_v1  ;;  %v5447_v33 = vpop.f32.mrb[70].mxu1  ;;  %v2757_v41 = vld [vmem:[#allocation2 + $0x8] sm:$0xff] }
 0x17f   : > { %2383 = vst.msk [vmem:[#allocation2 + $0x88] sm:$0xff] %vm546_vm2, %v2351_v31  ;;  %v1903_v10 = vadd.f32 %v5447_v33, %v1871_v7  ;;  %v1799_v34 = vpop.f32.mrb[71].mxu1  ;;  %v2756_v33 = vld [vmem:[#allocation2] sm:$0xff] }
 0x180   : > { %2382 = vst.msk [vmem:[#allocation2 + $0x80] sm:$0xff] %vm546_vm2, %v2350_v6  ;;  %v1902_v13 = vadd.f32 %v1870_v0, %v1799_v34  ;;  %v2321_v40 = vld [vmem:[#allocation2 + $0x98] sm:$0xff]  ;;  %v5497_v38 = vpop.f32.mrb[70].mxu0 }
 0x181   : > { %1935 = vst.msk [vmem:[#allocation2 + $0xb8] sm:$0xff] %vm546_vm2, %v1903_v10  ;;  %v2353_v63 = vadd.f32 %v5491_v28, %v2321_v40  ;;  %v2320_v42 = vld [vmem:[#allocation2 + $0x90] sm:$0xff]  ;;  %v2253_v35 = vpop.f32.mrb[71].mxu0 }
 0x182   : > { %1934 = vst.msk [vmem:[#allocation2 + $0xb0] sm:$0xff] %vm546_vm2, %v1902_v13  ;;  %v2352_v45 = vadd.f32 %v2320_v42, %v2233_v43  ;;  %v5450_v3 = vpop.f32.mrb[72].mxu1  ;;  %v2759_v42 = vld [vmem:[#allocation2 + $0x18] sm:$0xff] }
 0x183   : > { %2385 = vst.msk [vmem:[#allocation2 + $0x98] sm:$0xff] %vm546_vm2, %v2353_v63  ;;  %v1905_v37 = vadd.f32 %v5450_v3, %v1873_v47  ;;  %v1809_v46 = vpop.f32.mrb[73].mxu1  ;;  %v2758_v3 = vld [vmem:[#allocation2 + $0x10] sm:$0xff] }
 0x184   : > { %2384 = vst.msk [vmem:[#allocation2 + $0x90] sm:$0xff] %vm546_vm2, %v2352_v45  ;;  %v1904_v5 = vadd.f32 %v1872_v4, %v1809_v46  ;;  %v2323_v49 = vld [vmem:[#allocation2 + $0xa8] sm:$0xff]  ;;  %v5500_v60 = vpop.f32.mrb[72].mxu0 }
 0x185   : > { %1937 = vst.msk [vmem:[#allocation2 + $0xc8] sm:$0xff] %vm546_vm2, %v1905_v37  ;;  %v2355_v50 = vadd.f32 %v5494_v36, %v2323_v49  ;;  %v2322_v32 = vld [vmem:[#allocation2 + $0xa0] sm:$0xff]  ;;  %v2263_v48 = vpop.f32.mrb[73].mxu0 }
 0x186   : > { %1936 = vst.msk [vmem:[#allocation2 + $0xc0] sm:$0xff] %vm546_vm2, %v1904_v5  ;;  %v2354_v59 = vadd.f32 %v2322_v32, %v2243_v55  ;;  %v5453_v53 = vpop.f32.mrb[74].mxu1  ;;  %v2761_v32 = vld [vmem:[#allocation2 + $0x28] sm:$0xff] }
 0x187   : > { %2387 = vst.msk [vmem:[#allocation2 + $0xa8] sm:$0xff] %vm546_vm2, %v2355_v50  ;;  %v1907_v14 = vadd.f32 %v5453_v53, %v1875_v54  ;;  %v1819_v51 = vpop.f32.mrb[75].mxu1  ;;  %v2760_v53 = vld [vmem:[#allocation2 + $0x20] sm:$0xff] }
 0x188   : > { %2386 = vst.msk [vmem:[#allocation2 + $0xa0] sm:$0xff] %vm546_vm2, %v2354_v59  ;;  %v1906_v58 = vadd.f32 %v1874_v57, %v1819_v51  ;;  %v2325_v17 = vld [vmem:[#allocation2 + $0xb8] sm:$0xff]  ;;  %v5503_v18 = vpop.f32.mrb[74].mxu0 }
 0x189   : > { %1939 = vst.msk [vmem:[#allocation2 + $0xd8] sm:$0xff] %vm546_vm2, %v1907_v14  ;;  %v2357_v61 = vadd.f32 %v5497_v38, %v2325_v17  ;;  %v2324_v62 = vld [vmem:[#allocation2 + $0xb0] sm:$0xff]  ;;  %v2273_v52 = vpop.f32.mrb[75].mxu0 }
 0x18a   : > { %1938 = vst.msk [vmem:[#allocation2 + $0xd0] sm:$0xff] %vm546_vm2, %v1906_v58  ;;  %v2356_v56 = vadd.f32 %v2324_v62, %v2253_v35  ;;  %v5456_v21 = vpop.f32.mrb[76].mxu1  ;;  %v2763_v62 = vld [vmem:[#allocation2 + $0x38] sm:$0xff] }
 0x18b   : > { %2389 = vst.msk [vmem:[#allocation2 + $0xb8] sm:$0xff] %vm546_vm2, %v2357_v61  ;;  %v1909_v1 = vadd.f32 %v5456_v21, %v1877_v22  ;;  %v1829_v44 = vpop.f32.mrb[77].mxu1  ;;  %v2762_v21 = vld [vmem:[#allocation2 + $0x30] sm:$0xff] }
 0x18c   : > { %2388 = vst.msk [vmem:[#allocation2 + $0xb0] sm:$0xff] %vm546_vm2, %v2356_v56  ;;  %v1908_v12 = vadd.f32 %v1876_v9, %v1829_v44  ;;  %v2327_v2 = vld [vmem:[#allocation2 + $0xc8] sm:$0xff]  ;;  %v5506_v15 = vpop.f32.mrb[76].mxu0 }
 0x18d   : > { %1941 = vst.msk [vmem:[#allocation2 + $0xe8] sm:$0xff] %vm546_vm2, %v1909_v1  ;;  %v2359_v25 = vadd.f32 %v5500_v60, %v2327_v2  ;;  %v2326_v26 = vld [vmem:[#allocation2 + $0xc0] sm:$0xff]  ;;  %v2283_v16 = vpop.f32.mrb[77].mxu0 }
 0x18e   : > { %1940 = vst.msk [vmem:[#allocation2 + $0xe0] sm:$0xff] %vm546_vm2, %v1908_v12  ;;  %v2358_v28 = vadd.f32 %v2326_v26, %v2263_v48  ;;  %v5459_v19 = vpop.f32.mrb[78].mxu1  ;;  %v2765_v26 = vld [vmem:[#allocation2 + $0x48] sm:$0xff] }
 0x18f   : > { %2391 = vst.msk [vmem:[#allocation2 + $0xc8] sm:$0xff] %vm546_vm2, %v2359_v25  ;;  %v1911_v43 = vadd.f32 %v5459_v19, %v1879_v8  ;;  %v1839_v20 = vpop.f32.mrb[79].mxu1  ;;  %v2764_v19 = vld [vmem:[#allocation2 + $0x40] sm:$0xff] }
 0x190   : > { %2390 = vst.msk [vmem:[#allocation2 + $0xc0] sm:$0xff] %vm546_vm2, %v2358_v28  ;;  %v1910_v23 = vadd.f32 %v1878_v11, %v1839_v20  ;;  %v2329_v29 = vld [vmem:[#allocation2 + $0xd8] sm:$0xff]  ;;  %v5509_v30 = vpop.f32.mrb[78].mxu0 }
 0x191   : > { %1943 = vst.msk [vmem:[#allocation2 + $0xf8] sm:$0xff] %vm546_vm2, %v1911_v43  ;;  %v2361_v24 = vadd.f32 %v5503_v18, %v2329_v29  ;;  %v2328_v27 = vld [vmem:[#allocation2 + $0xd0] sm:$0xff]  ;;  %v2293_v39 = vpop.f32.mrb[79].mxu0 }
 0x192   : > { %1942 = vst.msk [vmem:[#allocation2 + $0xf0] sm:$0xff] %vm546_vm2, %v1910_v23  ;;  %v2360_v36 = vadd.f32 %v2328_v27, %v2273_v52  ;;  %v5514_v31 = vpop.f32.mrb[80].mxu1  ;;  %v2767_v27 = vld [vmem:[#allocation2 + $0x58] sm:$0xff] }
 0x193   : > { %2393 = vst.msk [vmem:[#allocation2 + $0xd8] sm:$0xff] %vm546_vm2, %v2361_v24  ;;  %v2789_v55 = vadd.f32 %v5514_v31, %v2757_v41  ;;  %v2597_v6 = vpop.f32.mrb[81].mxu1  ;;  %v2766_v31 = vld [vmem:[#allocation2 + $0x50] sm:$0xff] }
 0x194   : > { %2392 = vst.msk [vmem:[#allocation2 + $0xd0] sm:$0xff] %vm546_vm2, %v2360_v36  ;;  %v2331_v7 = vld [vmem:[#allocation2 + $0xe8] sm:$0xff]  ;;  %v2788_v10 = vadd.f32 %v2756_v33, %v2597_v6  ;;  %v5564_v34 = vpop.f32.mrb[80].mxu0 }
 0x195   : > { %2821 = vst.msk [vmem:[#allocation2 + $0x8] sm:$0xff] %vm546_vm2, %v2789_v55  ;;  %v2363_v0 = vadd.f32 %v5506_v15, %v2331_v7  ;;  %v2330_v13 = vld [vmem:[#allocation2 + $0xe0] sm:$0xff]  ;;  %v3054_v40 = vpop.f32.mrb[81].mxu0 }
 0x196   : > { %2820 = vst.msk [vmem:[#allocation2] sm:$0xff] %vm546_vm2, %v2788_v10  ;;  %v2362_v38 = vadd.f32 %v2330_v13, %v2283_v16  ;;  %v5517_v63 = vpop.f32.mrb[82].mxu1  ;;  %v2769_v13 = vld [vmem:[#allocation2 + $0x68] sm:$0xff] }
 0x197   : > { %2395 = vst.msk [vmem:[#allocation2 + $0xe8] sm:$0xff] %vm546_vm2, %v2363_v0  ;;  %v2791_v35 = vadd.f32 %v5517_v63, %v2759_v42  ;;  %v2607_v45 = vpop.f32.mrb[83].mxu1  ;;  %v2768_v63 = vld [vmem:[#allocation2 + $0x60] sm:$0xff] }
 0x198   : > { %2394 = vst.msk [vmem:[#allocation2 + $0xe0] sm:$0xff] %vm546_vm2, %v2362_v38  ;;  %v2333_v47 = vld [vmem:[#allocation2 + $0xf8] sm:$0xff]  ;;  %v2790_v37 = vadd.f32 %v2758_v3, %v2607_v45  ;;  %v5567_v46 = vpop.f32.mrb[82].mxu0 }
 0x199   : > { %2823 = vst.msk [vmem:[#allocation2 + $0x18] sm:$0xff] %vm546_vm2, %v2791_v35  ;;  %v2365_v4 = vadd.f32 %v5509_v30, %v2333_v47  ;;  %v2332_v5 = vld [vmem:[#allocation2 + $0xf0] sm:$0xff]  ;;  %v3064_v49 = vpop.f32.mrb[83].mxu0 }
 0x19a   : > { %2822 = vst.msk [vmem:[#allocation2 + $0x10] sm:$0xff] %vm546_vm2, %v2790_v37  ;;  %v2364_v60 = vadd.f32 %v2332_v5, %v2293_v39  ;;  %v5520_v50 = vpop.f32.mrb[84].mxu1  ;;  %v2771_v5 = vld [vmem:[#allocation2 + $0x78] sm:$0xff] }
 0x19b   : > { %2397 = vst.msk [vmem:[#allocation2 + $0xf8] sm:$0xff] %vm546_vm2, %v2365_v4  ;;  %v2793_v48 = vadd.f32 %v5520_v50, %v2761_v32  ;;  %v2617_v59 = vpop.f32.mrb[85].mxu1  ;;  %v2770_v50 = vld [vmem:[#allocation2 + $0x70] sm:$0xff] }
 0x19c   : > { %2396 = vst.msk [vmem:[#allocation2 + $0xf0] sm:$0xff] %vm546_vm2, %v2364_v60  ;;  %v2792_v54 = vadd.f32 %v2760_v53, %v2617_v59  ;;  %v3214_v14 = vld [vmem:[#allocation2 + $0x8] sm:$0xff]  ;;  %v5570_v51 = vpop.f32.mrb[84].mxu0 }
 0x19d   : > { %2825 = vst.msk [vmem:[#allocation2 + $0x28] sm:$0xff] %vm546_vm2, %v2793_v48  ;;  %v3246_v57 = vadd.f32 %v5564_v34, %v3214_v14  ;;  %v3213_v58 = vld [vmem:[#allocation2] sm:$0xff]  ;;  %v3074_v17 = vpop.f32.mrb[85].mxu0 }
 0x19e   : > { %2824 = vst.msk [vmem:[#allocation2 + $0x20] sm:$0xff] %vm546_vm2, %v2792_v54  ;;  %v3245_v18 = vadd.f32 %v3213_v58, %v3054_v40  ;;  %v5523_v61 = vpop.f32.mrb[86].mxu1  ;;  %v2773_v58 = vld [vmem:[#allocation2 + $0x88] sm:$0xff] }
 0x19f   : > { %3278 = vst.msk [vmem:[#allocation2 + $0x8] sm:$0xff] %vm546_vm2, %v3246_v57  ;;  %v2795_v52 = vadd.f32 %v5523_v61, %v2763_v62  ;;  %v2627_v56 = vpop.f32.mrb[87].mxu1  ;;  %v2772_v61 = vld [vmem:[#allocation2 + $0x80] sm:$0xff] }
 0x1a0   : > { %3277 = vst.msk [vmem:[#allocation2] sm:$0xff] %vm546_vm2, %v3245_v18  ;;  %v2794_v22 = vadd.f32 %v2762_v21, %v2627_v56  ;;  %v3216_v1 = vld [vmem:[#allocation2 + $0x18] sm:$0xff]  ;;  %v5573_v44 = vpop.f32.mrb[86].mxu0 }
 0x1a1   : > { %2827 = vst.msk [vmem:[#allocation2 + $0x38] sm:$0xff] %vm546_vm2, %v2795_v52  ;;  %v3248_v9 = vadd.f32 %v5567_v46, %v3216_v1  ;;  %v3215_v12 = vld [vmem:[#allocation2 + $0x10] sm:$0xff]  ;;  %v3084_v2 = vpop.f32.mrb[87].mxu0 }
 0x1a2   : > { %2826 = vst.msk [vmem:[#allocation2 + $0x30] sm:$0xff] %vm546_vm2, %v2794_v22  ;;  %v3247_v15 = vadd.f32 %v3215_v12, %v3064_v49  ;;  %v5526_v25 = vpop.f32.mrb[88].mxu1  ;;  %v2775_v12 = vld [vmem:[#allocation2 + $0x98] sm:$0xff] }
 0x1a3   : > { %3280 = vst.msk [vmem:[#allocation2 + $0x18] sm:$0xff] %vm546_vm2, %v3248_v9  ;;  %v2797_v16 = vadd.f32 %v5526_v25, %v2765_v26  ;;  %v2637_v28 = vpop.f32.mrb[89].mxu1  ;;  %v2774_v25 = vld [vmem:[#allocation2 + $0x90] sm:$0xff] }
 0x1a4   : > { %3279 = vst.msk [vmem:[#allocation2 + $0x10] sm:$0xff] %vm546_vm2, %v3247_v15  ;;  %v2796_v8 = vadd.f32 %v2764_v19, %v2637_v28  ;;  %v3218_v43 = vld [vmem:[#allocation2 + $0x28] sm:$0xff]  ;;  %v5576_v20 = vpop.f32.mrb[88].mxu0 }
 0x1a5   : > { %2829 = vst.msk [vmem:[#allocation2 + $0x48] sm:$0xff] %vm546_vm2, %v2797_v16  ;;  %v3250_v11 = vadd.f32 %v5570_v51, %v3218_v43  ;;  %v3217_v23 = vld [vmem:[#allocation2 + $0x20] sm:$0xff]  ;;  %v3094_v29 = vpop.f32.mrb[89].mxu0 }
 0x1a6   : > { %2828 = vst.msk [vmem:[#allocation2 + $0x40] sm:$0xff] %vm546_vm2, %v2796_v8  ;;  %v3249_v30 = vadd.f32 %v3217_v23, %v3074_v17  ;;  %v5529_v24 = vpop.f32.mrb[90].mxu1  ;;  %v2777_v23 = vld [vmem:[#allocation2 + $0xa8] sm:$0xff] }
 0x1a7   : > { %3282 = vst.msk [vmem:[#allocation2 + $0x28] sm:$0xff] %vm546_vm2, %v3250_v11  ;;  %v2799_v39 = vadd.f32 %v5529_v24, %v2767_v27  ;;  %v2647_v36 = vpop.f32.mrb[91].mxu1  ;;  %v2776_v24 = vld [vmem:[#allocation2 + $0xa0] sm:$0xff] }
 0x1a8   : > { %3281 = vst.msk [vmem:[#allocation2 + $0x20] sm:$0xff] %vm546_vm2, %v3249_v30  ;;  %v2798_v41 = vadd.f32 %v2766_v31, %v2647_v36  ;;  %v3220_v55 = vld [vmem:[#allocation2 + $0x38] sm:$0xff]  ;;  %v5579_v6 = vpop.f32.mrb[90].mxu0 }
 0x1a9   : > { %2831 = vst.msk [vmem:[#allocation2 + $0x58] sm:$0xff] %vm546_vm2, %v2799_v39  ;;  %v3252_v33 = vadd.f32 %v5573_v44, %v3220_v55  ;;  %v3219_v7 = vld [vmem:[#allocation2 + $0x30] sm:$0xff]  ;;  %v3104_v10 = vpop.f32.mrb[91].mxu0 }
 0x1aa   : > { %2830 = vst.msk [vmem:[#allocation2 + $0x50] sm:$0xff] %vm546_vm2, %v2798_v41  ;;  %v3251_v34 = vadd.f32 %v3219_v7, %v3084_v2  ;;  %v5532_v0 = vpop.f32.mrb[92].mxu1  ;;  %v2779_v7 = vld [vmem:[#allocation2 + $0xb8] sm:$0xff] }
 0x1ab   : > { %3284 = vst.msk [vmem:[#allocation2 + $0x38] sm:$0xff] %vm546_vm2, %v3252_v33  ;;  %v2801_v40 = vadd.f32 %v5532_v0, %v2769_v13  ;;  %v2657_v38 = vpop.f32.mrb[93].mxu1  ;;  %v2778_v0 = vld [vmem:[#allocation2 + $0xb0] sm:$0xff] }
 0x1ac   : > { %3283 = vst.msk [vmem:[#allocation2 + $0x30] sm:$0xff] %vm546_vm2, %v3251_v34  ;;  %v2800_v42 = vadd.f32 %v2768_v63, %v2657_v38  ;;  %v3222_v35 = vld [vmem:[#allocation2 + $0x48] sm:$0xff]  ;;  %v5582_v45 = vpop.f32.mrb[92].mxu0 }
 0x1ad   : > { %2833 = vst.msk [vmem:[#allocation2 + $0x68] sm:$0xff] %vm546_vm2, %v2801_v40  ;;  %v3254_v3 = vadd.f32 %v5576_v20, %v3222_v35  ;;  %v3221_v47 = vld [vmem:[#allocation2 + $0x40] sm:$0xff]  ;;  %v3114_v37 = vpop.f32.mrb[93].mxu0 }
 0x1ae   : > { %2832 = vst.msk [vmem:[#allocation2 + $0x60] sm:$0xff] %vm546_vm2, %v2800_v42  ;;  %v3253_v46 = vadd.f32 %v3221_v47, %v3094_v29  ;;  %v5535_v4 = vpop.f32.mrb[94].mxu1  ;;  %v2781_v47 = vld [vmem:[#allocation2 + $0xc8] sm:$0xff] }
 0x1af   : > { %3286 = vst.msk [vmem:[#allocation2 + $0x48] sm:$0xff] %vm546_vm2, %v3254_v3  ;;  %v2803_v49 = vadd.f32 %v5535_v4, %v2771_v5  ;;  %v2667_v60 = vpop.f32.mrb[95].mxu1  ;;  %v2780_v4 = vld [vmem:[#allocation2 + $0xc0] sm:$0xff] }
 0x1b0   : > { %3285 = vst.msk [vmem:[#allocation2 + $0x40] sm:$0xff] %vm546_vm2, %v3253_v46  ;;  %v2802_v32 = vadd.f32 %v2770_v50, %v2667_v60  ;;  %v3224_v48 = vld [vmem:[#allocation2 + $0x58] sm:$0xff]  ;;  %v5585_v59 = vpop.f32.mrb[94].mxu0 }
 0x1b1   : > { %2835 = vst.msk [vmem:[#allocation2 + $0x78] sm:$0xff] %vm546_vm2, %v2803_v49  ;;  %v3256_v53 = vadd.f32 %v5579_v6, %v3224_v48  ;;  %v3223_v54 = vld [vmem:[#allocation2 + $0x50] sm:$0xff]  ;;  %v3124_v14 = vpop.f32.mrb[95].mxu0 }
 0x1b2   : > { %2834 = vst.msk [vmem:[#allocation2 + $0x70] sm:$0xff] %vm546_vm2, %v2802_v32  ;;  %v3255_v51 = vadd.f32 %v3223_v54, %v3104_v10  ;;  %v5538_v57 = vpop.f32.mrb[96].mxu1  ;;  %v2783_v54 = vld [vmem:[#allocation2 + $0xd8] sm:$0xff] }
 0x1b3   : > { %3288 = vst.msk [vmem:[#allocation2 + $0x58] sm:$0xff] %vm546_vm2, %v3256_v53  ;;  %v2805_v17 = vadd.f32 %v5538_v57, %v2773_v58  ;;  %v2677_v18 = vpop.f32.mrb[97].mxu1  ;;  %v2782_v57 = vld [vmem:[#allocation2 + $0xd0] sm:$0xff] }
 0x1b4   : > { %3287 = vst.msk [vmem:[#allocation2 + $0x50] sm:$0xff] %vm546_vm2, %v3255_v51  ;;  %v2804_v62 = vadd.f32 %v2772_v61, %v2677_v18  ;;  %v3226_v52 = vld [vmem:[#allocation2 + $0x68] sm:$0xff]  ;;  %v5588_v56 = vpop.f32.mrb[96].mxu0 }
 0x1b5   : > { %2837 = vst.msk [vmem:[#allocation2 + $0x88] sm:$0xff] %vm546_vm2, %v2805_v17  ;;  %v3258_v21 = vadd.f32 %v5582_v45, %v3226_v52  ;;  %v3225_v22 = vld [vmem:[#allocation2 + $0x60] sm:$0xff]  ;;  %v3134_v1 = vpop.f32.mrb[97].mxu0 }
 0x1b6   : > { %2836 = vst.msk [vmem:[#allocation2 + $0x80] sm:$0xff] %vm546_vm2, %v2804_v62  ;;  %v3257_v44 = vadd.f32 %v3225_v22, %v3114_v37  ;;  %v5541_v9 = vpop.f32.mrb[98].mxu1  ;;  %v2785_v22 = vld [vmem:[#allocation2 + $0xe8] sm:$0xff] }
 0x1b7   : > { %3290 = vst.msk [vmem:[#allocation2 + $0x68] sm:$0xff] %vm546_vm2, %v3258_v21  ;;  %v2807_v2 = vadd.f32 %v5541_v9, %v2775_v12  ;;  %v2687_v15 = vpop.f32.mrb[99].mxu1  ;;  %v2784_v9 = vld [vmem:[#allocation2 + $0xe0] sm:$0xff] }
 0x1b8   : > { %3289 = vst.msk [vmem:[#allocation2 + $0x60] sm:$0xff] %vm546_vm2, %v3257_v44  ;;  %v2806_v26 = vadd.f32 %v2774_v25, %v2687_v15  ;;  %v3228_v16 = vld [vmem:[#allocation2 + $0x78] sm:$0xff]  ;;  %v5591_v28 = vpop.f32.mrb[98].mxu0 }
 0x1b9   : > { %2839 = vst.msk [vmem:[#allocation2 + $0x98] sm:$0xff] %vm546_vm2, %v2807_v2  ;;  %v3260_v19 = vadd.f32 %v5585_v59, %v3228_v16  ;;  %v3227_v8 = vld [vmem:[#allocation2 + $0x70] sm:$0xff]  ;;  %v3144_v43 = vpop.f32.mrb[99].mxu0 }
 0x1ba   : > { %2838 = vst.msk [vmem:[#allocation2 + $0x90] sm:$0xff] %vm546_vm2, %v2806_v26  ;;  %v3259_v20 = vadd.f32 %v3227_v8, %v3124_v14  ;;  %v5544_v11 = vpop.f32.mrb[100].mxu1  ;;  %v2787_v8 = vld [vmem:[#allocation2 + $0xf8] sm:$0xff] }
 0x1bb   : > { %3292 = vst.msk [vmem:[#allocation2 + $0x78] sm:$0xff] %vm546_vm2, %v3260_v19  ;;  %v2809_v29 = vadd.f32 %v5544_v11, %v2777_v23  ;;  %v2697_v30 = vpop.f32.mrb[101].mxu1  ;;  %v2786_v11 = vld [vmem:[#allocation2 + $0xf0] sm:$0xff] }
 0x1bc   : > { %3291 = vst.msk [vmem:[#allocation2 + $0x70] sm:$0xff] %vm546_vm2, %v3259_v20  ;;  %v2808_v27 = vadd.f32 %v2776_v24, %v2697_v30  ;;  %v3230_v39 = vld [vmem:[#allocation2 + $0x88] sm:$0xff]  ;;  %v5594_v36 = vpop.f32.mrb[100].mxu0 }
 0x1bd   : > { %2841 = vst.msk [vmem:[#allocation2 + $0xa8] sm:$0xff] %vm546_vm2, %v2809_v29  ;;  %v3262_v31 = vadd.f32 %v5588_v56, %v3230_v39  ;;  %v3229_v41 = vld [vmem:[#allocation2 + $0x80] sm:$0xff]  ;;  %v3154_v55 = vpop.f32.mrb[101].mxu0 }
 0x1be   : > { %2840 = vst.msk [vmem:[#allocation2 + $0xa0] sm:$0xff] %vm546_vm2, %v2808_v27  ;;  %v3261_v6 = vadd.f32 %v3229_v41, %v3134_v1  ;;  %v5547_v33 = vpop.f32.mrb[102].mxu1  ;;  %v3668_v41 = vld [vmem:[#allocation2 + $0x8] sm:$0xff] }
 0x1bf   : > { %3294 = vst.msk [vmem:[#allocation2 + $0x88] sm:$0xff] %vm546_vm2, %v3262_v31  ;;  %v2811_v10 = vadd.f32 %v5547_v33, %v2779_v7  ;;  %v2707_v34 = vpop.f32.mrb[103].mxu1  ;;  %v3667_v33 = vld [vmem:[#allocation2] sm:$0xff] }
 0x1c0   : > { %3293 = vst.msk [vmem:[#allocation2 + $0x80] sm:$0xff] %vm546_vm2, %v3261_v6  ;;  %v2810_v13 = vadd.f32 %v2778_v0, %v2707_v34  ;;  %v3232_v40 = vld [vmem:[#allocation2 + $0x98] sm:$0xff]  ;;  %v5597_v38 = vpop.f32.mrb[102].mxu0 }
 0x1c1   : > { %2843 = vst.msk [vmem:[#allocation2 + $0xb8] sm:$0xff] %vm546_vm2, %v2811_v10  ;;  %v3264_v63 = vadd.f32 %v5591_v28, %v3232_v40  ;;  %v3231_v42 = vld [vmem:[#allocation2 + $0x90] sm:$0xff]  ;;  %v3164_v35 = vpop.f32.mrb[103].mxu0 }
 0x1c2   : > { %2842 = vst.msk [vmem:[#allocation2 + $0xb0] sm:$0xff] %vm546_vm2, %v2810_v13  ;;  %v3263_v45 = vadd.f32 %v3231_v42, %v3144_v43  ;;  %v5550_v3 = vpop.f32.mrb[104].mxu1  ;;  %v3670_v42 = vld [vmem:[#allocation2 + $0x18] sm:$0xff] }
 0x1c3   : > { %3296 = vst.msk [vmem:[#allocation2 + $0x98] sm:$0xff] %vm546_vm2, %v3264_v63  ;;  %v2813_v37 = vadd.f32 %v5550_v3, %v2781_v47  ;;  %v2717_v46 = vpop.f32.mrb[105].mxu1  ;;  %v3669_v3 = vld [vmem:[#allocation2 + $0x10] sm:$0xff] }
 0x1c4   : > { %3295 = vst.msk [vmem:[#allocation2 + $0x90] sm:$0xff] %vm546_vm2, %v3263_v45  ;;  %v2812_v5 = vadd.f32 %v2780_v4, %v2717_v46  ;;  %v3234_v49 = vld [vmem:[#allocation2 + $0xa8] sm:$0xff]  ;;  %v5600_v60 = vpop.f32.mrb[104].mxu0 }
 0x1c5   : > { %2845 = vst.msk [vmem:[#allocation2 + $0xc8] sm:$0xff] %vm546_vm2, %v2813_v37  ;;  %v3266_v50 = vadd.f32 %v5594_v36, %v3234_v49  ;;  %v3233_v32 = vld [vmem:[#allocation2 + $0xa0] sm:$0xff]  ;;  %v3174_v48 = vpop.f32.mrb[105].mxu0 }
 0x1c6   : > { %2844 = vst.msk [vmem:[#allocation2 + $0xc0] sm:$0xff] %vm546_vm2, %v2812_v5  ;;  %v3265_v59 = vadd.f32 %v3233_v32, %v3154_v55  ;;  %v5553_v53 = vpop.f32.mrb[106].mxu1  ;;  %v3672_v32 = vld [vmem:[#allocation2 + $0x28] sm:$0xff] }
 0x1c7   : > { %3298 = vst.msk [vmem:[#allocation2 + $0xa8] sm:$0xff] %vm546_vm2, %v3266_v50  ;;  %v2815_v14 = vadd.f32 %v5553_v53, %v2783_v54  ;;  %v2727_v51 = vpop.f32.mrb[107].mxu1  ;;  %v3671_v53 = vld [vmem:[#allocation2 + $0x20] sm:$0xff] }
 0x1c8   : > { %3297 = vst.msk [vmem:[#allocation2 + $0xa0] sm:$0xff] %vm546_vm2, %v3265_v59  ;;  %v2814_v58 = vadd.f32 %v2782_v57, %v2727_v51  ;;  %v3236_v17 = vld [vmem:[#allocation2 + $0xb8] sm:$0xff]  ;;  %v5603_v18 = vpop.f32.mrb[106].mxu0 }
 0x1c9   : > { %2847 = vst.msk [vmem:[#allocation2 + $0xd8] sm:$0xff] %vm546_vm2, %v2815_v14  ;;  %v3268_v61 = vadd.f32 %v5597_v38, %v3236_v17  ;;  %v3235_v62 = vld [vmem:[#allocation2 + $0xb0] sm:$0xff]  ;;  %v3184_v52 = vpop.f32.mrb[107].mxu0 }
 0x1ca   : > { %2846 = vst.msk [vmem:[#allocation2 + $0xd0] sm:$0xff] %vm546_vm2, %v2814_v58  ;;  %v3267_v56 = vadd.f32 %v3235_v62, %v3164_v35  ;;  %v5556_v21 = vpop.f32.mrb[108].mxu1  ;;  %v3674_v62 = vld [vmem:[#allocation2 + $0x38] sm:$0xff] }
 0x1cb   : > { %3300 = vst.msk [vmem:[#allocation2 + $0xb8] sm:$0xff] %vm546_vm2, %v3268_v61  ;;  %v2817_v1 = vadd.f32 %v5556_v21, %v2785_v22  ;;  %v2737_v44 = vpop.f32.mrb[109].mxu1  ;;  %v3673_v21 = vld [vmem:[#allocation2 + $0x30] sm:$0xff] }
 0x1cc   : > { %3299 = vst.msk [vmem:[#allocation2 + $0xb0] sm:$0xff] %vm546_vm2, %v3267_v56  ;;  %v2816_v12 = vadd.f32 %v2784_v9, %v2737_v44  ;;  %v3238_v2 = vld [vmem:[#allocation2 + $0xc8] sm:$0xff]  ;;  %v5606_v15 = vpop.f32.mrb[108].mxu0 }
 0x1cd   : > { %2849 = vst.msk [vmem:[#allocation2 + $0xe8] sm:$0xff] %vm546_vm2, %v2817_v1  ;;  %v3270_v25 = vadd.f32 %v5600_v60, %v3238_v2  ;;  %v3237_v26 = vld [vmem:[#allocation2 + $0xc0] sm:$0xff]  ;;  %v3194_v16 = vpop.f32.mrb[109].mxu0 }
 0x1ce   : > { %2848 = vst.msk [vmem:[#allocation2 + $0xe0] sm:$0xff] %vm546_vm2, %v2816_v12  ;;  %v3269_v28 = vadd.f32 %v3237_v26, %v3174_v48  ;;  %v5559_v19 = vpop.f32.mrb[110].mxu1  ;;  %v3676_v26 = vld [vmem:[#allocation2 + $0x48] sm:$0xff] }
 0x1cf   : > { %3302 = vst.msk [vmem:[#allocation2 + $0xc8] sm:$0xff] %vm546_vm2, %v3270_v25  ;;  %v2819_v43 = vadd.f32 %v5559_v19, %v2787_v8  ;;  %v2747_v20 = vpop.f32.mrb[111].mxu1  ;;  %v3675_v19 = vld [vmem:[#allocation2 + $0x40] sm:$0xff] }
 0x1d0   : > { %3301 = vst.msk [vmem:[#allocation2 + $0xc0] sm:$0xff] %vm546_vm2, %v3269_v28  ;;  %v2818_v23 = vadd.f32 %v2786_v11, %v2747_v20  ;;  %v3240_v29 = vld [vmem:[#allocation2 + $0xd8] sm:$0xff]  ;;  %v5609_v30 = vpop.f32.mrb[110].mxu0  ;;  %v7109_v8 = vld [vmem:[%s7326_s2] ss:$0 sm:$0xff] }
 0x1d1   : > { %2851 = vst.msk [vmem:[#allocation2 + $0xf8] sm:$0xff] %vm546_vm2, %v2819_v43  ;;  %v3272_v24 = vadd.f32 %v5603_v18, %v3240_v29  ;;  %v3239_v27 = vld [vmem:[#allocation2 + $0xd0] sm:$0xff]  ;;  %v3204_v39 = vpop.f32.mrb[111].mxu0 }
 0x1d2   : > { %2850 = vst.msk [vmem:[#allocation2 + $0xf0] sm:$0xff] %vm546_vm2, %v2818_v23  ;;  %v3271_v36 = vadd.f32 %v3239_v27, %v3184_v52  ;;  %v5614_v31 = vpop.f32.mrb[112].mxu1 }
 0x1d3   : > { %3304 = vst.msk [vmem:[#allocation2 + $0xd8] sm:$0xff] %vm546_vm2, %v3272_v24  ;;  %v3700_v55 = vadd.f32 %v5614_v31, %v3668_v41  ;;  %v3508_v6 = vpop.f32.mrb[113].mxu1 }
 0x1d4   : > { %3303 = vst.msk [vmem:[#allocation2 + $0xd0] sm:$0xff] %vm546_vm2, %v3271_v36  ;;  %v3242_v7 = vld [vmem:[#allocation2 + $0xe8] sm:$0xff]  ;;  %v3699_v10 = vadd.f32 %v3667_v33, %v3508_v6  ;;  %v5664_v34 = vpop.f32.mrb[112].mxu0  ;;  %v3678_v36 = vld [vmem:[#allocation2 + $0x58] sm:$0xff]  ;;  %v3677_v33 = vld [vmem:[#allocation2 + $0x50] sm:$0xff] }
 0x1d5   : > { %3732 = vst.msk [vmem:[#allocation2 + $0x8] sm:$0xff] %vm546_vm2, %v3700_v55  ;;  %v3274_v0 = vadd.f32 %v5606_v15, %v3242_v7  ;;  %v3241_v13 = vld [vmem:[#allocation2 + $0xe0] sm:$0xff]  ;;  %v3962_v40 = vpop.f32.mrb[113].mxu0 }
 0x1d6   : > { %3731 = vst.msk [vmem:[#allocation2] sm:$0xff] %vm546_vm2, %v3699_v10  ;;  %v3273_v38 = vadd.f32 %v3241_v13, %v3194_v16  ;;  %v5617_v63 = vpop.f32.mrb[114].mxu1 }
 0x1d7   : > { %3306 = vst.msk [vmem:[#allocation2 + $0xe8] sm:$0xff] %vm546_vm2, %v3274_v0  ;;  %v3702_v35 = vadd.f32 %v5617_v63, %v3670_v42  ;;  %v3518_v45 = vpop.f32.mrb[115].mxu1 }
 0x1d8   : > { %3305 = vst.msk [vmem:[#allocation2 + $0xe0] sm:$0xff] %vm546_vm2, %v3273_v38  ;;  %v3244_v47 = vld [vmem:[#allocation2 + $0xf8] sm:$0xff]  ;;  %v3701_v37 = vadd.f32 %v3669_v3, %v3518_v45  ;;  %v5667_v46 = vpop.f32.mrb[114].mxu0 }
 0x1d9   : > { %3734 = vst.msk [vmem:[#allocation2 + $0x18] sm:$0xff] %vm546_vm2, %v3702_v35  ;;  %v3276_v4 = vadd.f32 %v5609_v30, %v3244_v47  ;;  %v3243_v5 = vld [vmem:[#allocation2 + $0xf0] sm:$0xff]  ;;  %v3972_v49 = vpop.f32.mrb[115].mxu0  ;;  %v3680_v47 = vld [vmem:[#allocation2 + $0x68] sm:$0xff] }
 0x1da   : > { %3733 = vst.msk [vmem:[#allocation2 + $0x10] sm:$0xff] %vm546_vm2, %v3701_v37  ;;  %v3275_v60 = vadd.f32 %v3243_v5, %v3204_v39  ;;  %v5620_v50 = vpop.f32.mrb[116].mxu1 }
 0x1db   : > { %3308 = vst.msk [vmem:[#allocation2 + $0xf8] sm:$0xff] %vm546_vm2, %v3276_v4  ;;  %v3704_v48 = vadd.f32 %v5620_v50, %v3672_v32  ;;  %v3528_v59 = vpop.f32.mrb[117].mxu1 }
 0x1dc   : > { %3307 = vst.msk [vmem:[#allocation2 + $0xf0] sm:$0xff] %vm546_vm2, %v3275_v60  ;;  %v3703_v54 = vadd.f32 %v3671_v53, %v3528_v59  ;;  %v4122_v14 = vld [vmem:[#allocation2 + $0x8] sm:$0xff]  ;;  %v5670_v51 = vpop.f32.mrb[116].mxu0 }
 0x1dd   : > { %3736 = vst.msk [vmem:[#allocation2 + $0x28] sm:$0xff] %vm546_vm2, %v3704_v48  ;;  %v4154_v57 = vadd.f32 %v5664_v34, %v4122_v14  ;;  %v4121_v58 = vld [vmem:[#allocation2] sm:$0xff]  ;;  %v3982_v17 = vpop.f32.mrb[117].mxu0 }
 0x1de   : > { %3735 = vst.msk [vmem:[#allocation2 + $0x20] sm:$0xff] %vm546_vm2, %v3703_v54  ;;  %v4153_v18 = vadd.f32 %v4121_v58, %v3962_v40  ;;  %v5623_v61 = vpop.f32.mrb[118].mxu1 }
 0x1df   : > { %4186 = vst.msk [vmem:[#allocation2 + $0x8] sm:$0xff] %vm546_vm2, %v4154_v57  ;;  %v3706_v52 = vadd.f32 %v5623_v61, %v3674_v62  ;;  %v3538_v56 = vpop.f32.mrb[119].mxu1 }
 0x1e0   : > { %4185 = vst.msk [vmem:[#allocation2] sm:$0xff] %vm546_vm2, %v4153_v18  ;;  %v3705_v22 = vadd.f32 %v3673_v21, %v3538_v56  ;;  %v4124_v1 = vld [vmem:[#allocation2 + $0x18] sm:$0xff]  ;;  %v5673_v44 = vpop.f32.mrb[118].mxu0  ;;  %v3681_v21 = vld [vmem:[#allocation2 + $0x70] sm:$0xff] }
 0x1e1   : > { %3738 = vst.msk [vmem:[#allocation2 + $0x38] sm:$0xff] %vm546_vm2, %v3706_v52  ;;  %v4156_v9 = vadd.f32 %v5667_v46, %v4124_v1  ;;  %v4123_v12 = vld [vmem:[#allocation2 + $0x10] sm:$0xff]  ;;  %v3992_v2 = vpop.f32.mrb[119].mxu0  ;;  %v3682_v18 = vld [vmem:[#allocation2 + $0x78] sm:$0xff] }
 0x1e2   : > { %3737 = vst.msk [vmem:[#allocation2 + $0x30] sm:$0xff] %vm546_vm2, %v3705_v22  ;;  %v4155_v15 = vadd.f32 %v4123_v12, %v3972_v49  ;;  %v5626_v25 = vpop.f32.mrb[120].mxu1  ;;  %v3679_v49 = vld [vmem:[#allocation2 + $0x60] sm:$0xff] }
 0x1e3   : > { %4188 = vst.msk [vmem:[#allocation2 + $0x18] sm:$0xff] %vm546_vm2, %v4156_v9  ;;  %v3708_v16 = vadd.f32 %v5626_v25, %v3676_v26  ;;  %v3548_v28 = vpop.f32.mrb[121].mxu1 }
 0x1e4   : > { %4187 = vst.msk [vmem:[#allocation2 + $0x10] sm:$0xff] %vm546_vm2, %v4155_v15  ;;  %v3707_v43 = vadd.f32 %v3675_v19, %v3548_v28  ;;  %v4126_v20 = vld [vmem:[#allocation2 + $0x28] sm:$0xff]  ;;  %v5676_v11 = vpop.f32.mrb[120].mxu0 }
 0x1e5   : > { %3740 = vst.msk [vmem:[#allocation2 + $0x48] sm:$0xff] %vm546_vm2, %v3708_v16  ;;  %v4158_v23 = vadd.f32 %v5670_v51, %v4126_v20  ;;  %v4125_v29 = vld [vmem:[#allocation2 + $0x20] sm:$0xff]  ;;  %v4002_v30 = vpop.f32.mrb[121].mxu0 }
 0x1e6   : > { %v4218_v24 = vld [vmem:[#allocation2 + $0x8] sm:$0xff]  ;;  %3739 = vst.msk [vmem:[#allocation2 + $0x40] sm:$0xff] %vm546_vm2, %v3707_v43  ;;  %v4157_v27 = vadd.f32 %v4125_v29, %v3982_v17  ;;  %v5629_v39 = vpop.f32.mrb[122].mxu1 }
 0x1e7   : > { %v4257_v31 = vadd.f32 %v7109_v8, %v4218_v24  ;;  %v4217_v41 = vld [vmem:[#allocation2] sm:$0xff]  ;;  %4190 = vst.msk [vmem:[#allocation2 + $0x28] sm:$0xff] %vm546_vm2, %v4158_v23  ;;  %v3710_v55 = vadd.f32 %v5629_v39, %v3678_v36  ;;  %v3558_v6 = vpop.f32.mrb[123].mxu1  ;;  %v3684_v43 = vld [vmem:[#allocation2 + $0x88] sm:$0xff] }
 0x1e8   : > { %v4256_v7 = vadd.f32 %v7109_v8, %v4217_v41  ;;  %4189 = vst.msk [vmem:[#allocation2 + $0x20] sm:$0xff] %vm546_vm2, %v4157_v27  ;;  %v3709_v10 = vadd.f32 %v3677_v33, %v3558_v6  ;;  %v4128_v34 = vld [vmem:[#allocation2 + $0x38] sm:$0xff]  ;;  %v5679_v0 = vpop.f32.mrb[122].mxu0 }
 0x1e9   : > { %v4289_v13 = vmax.f32 %v4257_v31, 0.0  ;;  %3742 = vst.msk [vmem:[#allocation2 + $0x58] sm:$0xff] %vm546_vm2, %v3710_v55  ;;  %v4160_v40 = vadd.f32 %v5673_v44, %v4128_v34  ;;  %v4127_v38 = vld [vmem:[#allocation2 + $0x30] sm:$0xff]  ;;  %v4012_v63 = vpop.f32.mrb[123].mxu0 }
 0x1ea   : > { %v4288_v42 = vmax.f32 %v4256_v7, 0.0  ;;  %v4220_v35 = vld [vmem:[#allocation2 + $0x18] sm:$0xff]  ;;  %3741 = vst.msk [vmem:[#allocation2 + $0x50] sm:$0xff] %vm546_vm2, %v3709_v10  ;;  %v4159_v45 = vadd.f32 %v4127_v38, %v3992_v2  ;;  %v5632_v3 = vpop.f32.mrb[124].mxu1 }
 0x1eb   : > { %4321 = vst.msk [vmem:[%s7125_s9 + $0x8] sm:$0xff] %vm546_vm2, %v4289_v13  ;;  %v4259_v37 = vadd.f32 %v7109_v8, %v4220_v35  ;;  %v4219_v46 = vld [vmem:[#allocation2 + $0x10] sm:$0xff]  ;;  %4192 = vst.msk [vmem:[#allocation2 + $0x38] sm:$0xff] %vm546_vm2, %v4160_v40  ;;  %v3712_v4 = vadd.f32 %v5632_v3, %v3680_v47  ;;  %v3568_v5 = vpop.f32.mrb[125].mxu1 }
 0x1ec   : > { %4320 = vst.msk [vmem:[%s7125_s9] sm:$0xff] %vm546_vm2, %v4288_v42  ;;  %v4258_v60 = vadd.f32 %v7109_v8, %v4219_v46  ;;  %4191 = vst.msk [vmem:[#allocation2 + $0x30] sm:$0xff] %vm546_vm2, %v4159_v45  ;;  %v3711_v50 = vadd.f32 %v3679_v49, %v3568_v5  ;;  %v4130_v32 = vld [vmem:[#allocation2 + $0x48] sm:$0xff]  ;;  %v5682_v48 = vpop.f32.mrb[124].mxu0  ;;  %v3685_v42 = vld [vmem:[#allocation2 + $0x90] sm:$0xff] }
 0x1ed   : > { %v4291_v59 = vmax.f32 %v4259_v37, 0.0  ;;  %3744 = vst.msk [vmem:[#allocation2 + $0x68] sm:$0xff] %vm546_vm2, %v3712_v4  ;;  %v4162_v53 = vadd.f32 %v5676_v11, %v4130_v32  ;;  %v4129_v54 = vld [vmem:[#allocation2 + $0x40] sm:$0xff]  ;;  %v4022_v14 = vpop.f32.mrb[125].mxu0 }
 0x1ee   : > { %v4290_v51 = vmax.f32 %v4258_v60, 0.0  ;;  %v4222_v57 = vld [vmem:[#allocation2 + $0x28] sm:$0xff]  ;;  %3743 = vst.msk [vmem:[#allocation2 + $0x60] sm:$0xff] %vm546_vm2, %v3711_v50  ;;  %v4161_v58 = vadd.f32 %v4129_v54, %v4002_v30  ;;  %v5635_v17 = vpop.f32.mrb[126].mxu1  ;;  %v3683_v30 = vld [vmem:[#allocation2 + $0x80] sm:$0xff] }
 0x1ef   : > { %4323 = vst.msk [vmem:[%s7125_s9 + $0x18] sm:$0xff] %vm546_vm2, %v4291_v59  ;;  %v4261_v61 = vadd.f32 %v7109_v8, %v4222_v57  ;;  %v4221_v62 = vld [vmem:[#allocation2 + $0x20] sm:$0xff]  ;;  %4194 = vst.msk [vmem:[#allocation2 + $0x48] sm:$0xff] %vm546_vm2, %v4162_v53  ;;  %v3714_v52 = vadd.f32 %v5635_v17, %v3682_v18  ;;  %v3578_v56 = vpop.f32.mrb[127].mxu1 }
 0x1f0   : > { %4322 = vst.msk [vmem:[%s7125_s9 + $0x10] sm:$0xff] %vm546_vm2, %v4290_v51  ;;  %v4260_v22 = vadd.f32 %v7109_v8, %v4221_v62  ;;  %4193 = vst.msk [vmem:[#allocation2 + $0x40] sm:$0xff] %vm546_vm2, %v4161_v58  ;;  %v3713_v1 = vadd.f32 %v3681_v21, %v3578_v56  ;;  %v4132_v44 = vld [vmem:[#allocation2 + $0x58] sm:$0xff]  ;;  %v5685_v9 = vpop.f32.mrb[126].mxu0  ;;  %v3687_v51 = vld [vmem:[#allocation2 + $0xa0] sm:$0xff] }
 0x1f1   : > { %v4293_v12 = vmax.f32 %v4261_v61, 0.0  ;;  %3746 = vst.msk [vmem:[#allocation2 + $0x78] sm:$0xff] %vm546_vm2, %v3714_v52  ;;  %v4164_v2 = vadd.f32 %v5679_v0, %v4132_v44  ;;  %v4131_v15 = vld [vmem:[#allocation2 + $0x50] sm:$0xff]  ;;  %v4032_v25 = vpop.f32.mrb[127].mxu0  ;;  %v3686_v0 = vld [vmem:[#allocation2 + $0x98] sm:$0xff] }
 0x1f2   : > { %v4292_v26 = vmax.f32 %v4260_v22, 0.0  ;;  %v4224_v16 = vld [vmem:[#allocation2 + $0x38] sm:$0xff]  ;;  %3745 = vst.msk [vmem:[#allocation2 + $0x70] sm:$0xff] %vm546_vm2, %v3713_v1  ;;  %v4163_v28 = vadd.f32 %v4131_v15, %v4012_v63  ;;  %v5638_v19 = vpop.f32.mrb[128].mxu1 }
 0x1f3   : > { %4325 = vst.msk [vmem:[%s7125_s9 + $0x28] sm:$0xff] %vm546_vm2, %v4293_v12  ;;  %v4263_v20 = vadd.f32 %v7109_v8, %v4224_v16  ;;  %v4223_v11 = vld [vmem:[#allocation2 + $0x30] sm:$0xff]  ;;  %4196 = vst.msk [vmem:[#allocation2 + $0x58] sm:$0xff] %vm546_vm2, %v4164_v2  ;;  %v3716_v23 = vadd.f32 %v5638_v19, %v3684_v43  ;;  %v3588_v29 = vpop.f32.mrb[129].mxu1 }
 0x1f4   : > { %4324 = vst.msk [vmem:[%s7125_s9 + $0x20] sm:$0xff] %vm546_vm2, %v4292_v26  ;;  %v4262_v24 = vadd.f32 %v7109_v8, %v4223_v11  ;;  %4195 = vst.msk [vmem:[#allocation2 + $0x50] sm:$0xff] %vm546_vm2, %v4163_v28  ;;  %v3715_v27 = vadd.f32 %v3683_v30, %v3588_v29  ;;  %v4134_v39 = vld [vmem:[#allocation2 + $0x68] sm:$0xff]  ;;  %v5688_v36 = vpop.f32.mrb[128].mxu0  ;;  %v3689_v26 = vld [vmem:[#allocation2 + $0xb0] sm:$0xff] }
 0x1f5   : > { %v4295_v31 = vmax.f32 %v4263_v20, 0.0  ;;  %3748 = vst.msk [vmem:[#allocation2 + $0x88] sm:$0xff] %vm546_vm2, %v3716_v23  ;;  %v4166_v41 = vadd.f32 %v5682_v48, %v4134_v39  ;;  %v4133_v55 = vld [vmem:[#allocation2 + $0x60] sm:$0xff]  ;;  %v4042_v6 = vpop.f32.mrb[129].mxu0  ;;  %v3688_v48 = vld [vmem:[#allocation2 + $0xa8] sm:$0xff] }
 0x1f6   : > { %v4294_v33 = vmax.f32 %v4262_v24, 0.0  ;;  %v4226_v7 = vld [vmem:[#allocation2 + $0x48] sm:$0xff]  ;;  %3747 = vst.msk [vmem:[#allocation2 + $0x80] sm:$0xff] %vm546_vm2, %v3715_v27  ;;  %v4165_v10 = vadd.f32 %v4133_v55, %v4022_v14  ;;  %v5641_v34 = vpop.f32.mrb[130].mxu1 }
 0x1f7   : > { %4327 = vst.msk [vmem:[%s7125_s9 + $0x38] sm:$0xff] %vm546_vm2, %v4295_v31  ;;  %v4265_v13 = vadd.f32 %v7109_v8, %v4226_v7  ;;  %v4225_v40 = vld [vmem:[#allocation2 + $0x40] sm:$0xff]  ;;  %4198 = vst.msk [vmem:[#allocation2 + $0x68] sm:$0xff] %vm546_vm2, %v4166_v41  ;;  %v3718_v38 = vadd.f32 %v5641_v34, %v3686_v0  ;;  %v3598_v63 = vpop.f32.mrb[131].mxu1 }
 0x1f8   : > { %4326 = vst.msk [vmem:[%s7125_s9 + $0x30] sm:$0xff] %vm546_vm2, %v4294_v33  ;;  %v4264_v35 = vadd.f32 %v7109_v8, %v4225_v40  ;;  %4197 = vst.msk [vmem:[#allocation2 + $0x60] sm:$0xff] %vm546_vm2, %v4165_v10  ;;  %v3717_v45 = vadd.f32 %v3685_v42, %v3598_v63  ;;  %v4136_v3 = vld [vmem:[#allocation2 + $0x78] sm:$0xff]  ;;  %v5691_v47 = vpop.f32.mrb[130].mxu0  ;;  %v3691_v33 = vld [vmem:[#allocation2 + $0xc0] sm:$0xff] }
 0x1f9   : > { %v4297_v37 = vmax.f32 %v4265_v13, 0.0  ;;  %3750 = vst.msk [vmem:[#allocation2 + $0x98] sm:$0xff] %vm546_vm2, %v3718_v38  ;;  %v4168_v46 = vadd.f32 %v5685_v9, %v4136_v3  ;;  %v4135_v4 = vld [vmem:[#allocation2 + $0x70] sm:$0xff]  ;;  %v4052_v5 = vpop.f32.mrb[131].mxu0  ;;  %v3690_v9 = vld [vmem:[#allocation2 + $0xb8] sm:$0xff] }
 0x1fa   : > { %v4296_v49 = vmax.f32 %v4264_v35, 0.0  ;;  %v4228_v60 = vld [vmem:[#allocation2 + $0x58] sm:$0xff]  ;;  %3749 = vst.msk [vmem:[#allocation2 + $0x90] sm:$0xff] %vm546_vm2, %v3717_v45  ;;  %v4167_v50 = vadd.f32 %v4135_v4, %v4032_v25  ;;  %v5644_v32 = vpop.f32.mrb[132].mxu1 }
 0x1fb   : > { %4329 = vst.msk [vmem:[%s7125_s9 + $0x48] sm:$0xff] %vm546_vm2, %v4297_v37  ;;  %v4267_v59 = vadd.f32 %v7109_v8, %v4228_v60  ;;  %v4227_v53 = vld [vmem:[#allocation2 + $0x50] sm:$0xff]  ;;  %4200 = vst.msk [vmem:[#allocation2 + $0x78] sm:$0xff] %vm546_vm2, %v4168_v46  ;;  %v3720_v54 = vadd.f32 %v5644_v32, %v3688_v48  ;;  %v3608_v14 = vpop.f32.mrb[133].mxu1 }
 0x1fc   : > { %4328 = vst.msk [vmem:[%s7125_s9 + $0x40] sm:$0xff] %vm546_vm2, %v4296_v49  ;;  %v4266_v57 = vadd.f32 %v7109_v8, %v4227_v53  ;;  %4199 = vst.msk [vmem:[#allocation2 + $0x70] sm:$0xff] %vm546_vm2, %v4167_v50  ;;  %v3719_v58 = vadd.f32 %v3687_v51, %v3608_v14  ;;  %v4138_v17 = vld [vmem:[#allocation2 + $0x88] sm:$0xff]  ;;  %v5694_v18 = vpop.f32.mrb[132].mxu0  ;;  %v3693_v49 = vld [vmem:[#allocation2 + $0xd0] sm:$0xff] }
 0x1fd   : > { %v4299_v61 = vmax.f32 %v4267_v59, 0.0  ;;  %3752 = vst.msk [vmem:[#allocation2 + $0xa8] sm:$0xff] %vm546_vm2, %v3720_v54  ;;  %v4170_v62 = vadd.f32 %v5688_v36, %v4138_v17  ;;  %v4137_v52 = vld [vmem:[#allocation2 + $0x80] sm:$0xff]  ;;  %v4062_v56 = vpop.f32.mrb[133].mxu0  ;;  %v3692_v36 = vld [vmem:[#allocation2 + $0xc8] sm:$0xff] }
 0x1fe   : > { %v4298_v21 = vmax.f32 %v4266_v57, 0.0  ;;  %v4230_v22 = vld [vmem:[#allocation2 + $0x68] sm:$0xff]  ;;  %3751 = vst.msk [vmem:[#allocation2 + $0xa0] sm:$0xff] %vm546_vm2, %v3719_v58  ;;  %v4169_v1 = vadd.f32 %v4137_v52, %v4042_v6  ;;  %v5647_v44 = vpop.f32.mrb[134].mxu1 }
 0x1ff   : > { %4331 = vst.msk [vmem:[%s7125_s9 + $0x58] sm:$0xff] %vm546_vm2, %v4299_v61  ;;  %v4269_v12 = vadd.f32 %v7109_v8, %v4230_v22  ;;  %v4229_v2 = vld [vmem:[#allocation2 + $0x60] sm:$0xff]  ;;  %4202 = vst.msk [vmem:[#allocation2 + $0x88] sm:$0xff] %vm546_vm2, %v4170_v62  ;;  %v3722_v15 = vadd.f32 %v5647_v44, %v3690_v9  ;;  %v3618_v25 = vpop.f32.mrb[135].mxu1 }
 0x200   : > { %4330 = vst.msk [vmem:[%s7125_s9 + $0x50] sm:$0xff] %vm546_vm2, %v4298_v21  ;;  %v4268_v16 = vadd.f32 %v7109_v8, %v4229_v2  ;;  %4201 = vst.msk [vmem:[#allocation2 + $0x80] sm:$0xff] %vm546_vm2, %v4169_v1  ;;  %v3721_v28 = vadd.f32 %v3689_v26, %v3618_v25  ;;  %v4140_v19 = vld [vmem:[#allocation2 + $0x98] sm:$0xff]  ;;  %v5697_v43 = vpop.f32.mrb[134].mxu0  ;;  %v3695_v21 = vld [vmem:[#allocation2 + $0xe0] sm:$0xff] }
 0x201   : > { %v4301_v20 = vmax.f32 %v4269_v12, 0.0  ;;  %3754 = vst.msk [vmem:[#allocation2 + $0xb8] sm:$0xff] %vm546_vm2, %v3722_v15  ;;  %v4172_v11 = vadd.f32 %v5691_v47, %v4140_v19  ;;  %v4139_v23 = vld [vmem:[#allocation2 + $0x90] sm:$0xff]  ;;  %v4072_v29 = vpop.f32.mrb[135].mxu0  ;;  %v3694_v47 = vld [vmem:[#allocation2 + $0xd8] sm:$0xff] }
 0x202   : > { %v4300_v30 = vmax.f32 %v4268_v16, 0.0  ;;  %v4232_v24 = vld [vmem:[#allocation2 + $0x78] sm:$0xff]  ;;  %3753 = vst.msk [vmem:[#allocation2 + $0xb0] sm:$0xff] %vm546_vm2, %v3721_v28  ;;  %v4171_v27 = vadd.f32 %v4139_v23, %v4052_v5  ;;  %v5650_v39 = vpop.f32.mrb[136].mxu1 }
 0x203   : > { %4333 = vst.msk [vmem:[%s7125_s9 + $0x68] sm:$0xff] %vm546_vm2, %v4301_v20  ;;  %v4271_v31 = vadd.f32 %v7109_v8, %v4232_v24  ;;  %v4231_v41 = vld [vmem:[#allocation2 + $0x70] sm:$0xff]  ;;  %4204 = vst.msk [vmem:[#allocation2 + $0x98] sm:$0xff] %vm546_vm2, %v4172_v11  ;;  %v3724_v55 = vadd.f32 %v5650_v39, %v3692_v36  ;;  %v3628_v6 = vpop.f32.mrb[137].mxu1 }
 0x204   : > { %4332 = vst.msk [vmem:[%s7125_s9 + $0x60] sm:$0xff] %vm546_vm2, %v4300_v30  ;;  %v4270_v7 = vadd.f32 %v7109_v8, %v4231_v41  ;;  %4203 = vst.msk [vmem:[#allocation2 + $0x90] sm:$0xff] %vm546_vm2, %v4171_v27  ;;  %v3723_v10 = vadd.f32 %v3691_v33, %v3628_v6  ;;  %v4142_v34 = vld [vmem:[#allocation2 + $0xa8] sm:$0xff]  ;;  %v5700_v0 = vpop.f32.mrb[136].mxu0  ;;  %v3697_v30 = vld [vmem:[#allocation2 + $0xf0] sm:$0xff] }
 0x205   : > { %v4303_v13 = vmax.f32 %v4271_v31, 0.0  ;;  %3756 = vst.msk [vmem:[#allocation2 + $0xc8] sm:$0xff] %vm546_vm2, %v3724_v55  ;;  %v4174_v40 = vadd.f32 %v5694_v18, %v4142_v34  ;;  %v4141_v38 = vld [vmem:[#allocation2 + $0xa0] sm:$0xff]  ;;  %v4082_v63 = vpop.f32.mrb[137].mxu0  ;;  %v3696_v18 = vld [vmem:[#allocation2 + $0xe8] sm:$0xff] }
 0x206   : > { %v4302_v42 = vmax.f32 %v4270_v7, 0.0  ;;  %v4234_v35 = vld [vmem:[#allocation2 + $0x88] sm:$0xff]  ;;  %3755 = vst.msk [vmem:[#allocation2 + $0xc0] sm:$0xff] %vm546_vm2, %v3723_v10  ;;  %v4173_v45 = vadd.f32 %v4141_v38, %v4062_v56  ;;  %v5653_v3 = vpop.f32.mrb[138].mxu1 }
 0x207   : > { %4335 = vst.msk [vmem:[%s7125_s9 + $0x78] sm:$0xff] %vm546_vm2, %v4303_v13  ;;  %v4273_v37 = vadd.f32 %v7109_v8, %v4234_v35  ;;  %v4233_v46 = vld [vmem:[#allocation2 + $0x80] sm:$0xff]  ;;  %4206 = vst.msk [vmem:[#allocation2 + $0xa8] sm:$0xff] %vm546_vm2, %v4174_v40  ;;  %v3726_v4 = vadd.f32 %v5653_v3, %v3694_v47  ;;  %v3638_v5 = vpop.f32.mrb[139].mxu1 }
 0x208   : > { %4334 = vst.msk [vmem:[%s7125_s9 + $0x70] sm:$0xff] %vm546_vm2, %v4302_v42  ;;  %v4272_v60 = vadd.f32 %v7109_v8, %v4233_v46  ;;  %4205 = vst.msk [vmem:[#allocation2 + $0xa0] sm:$0xff] %vm546_vm2, %v4173_v45  ;;  %v3725_v50 = vadd.f32 %v3693_v49, %v3638_v5  ;;  %v4144_v32 = vld [vmem:[#allocation2 + $0xb8] sm:$0xff]  ;;  %v5703_v48 = vpop.f32.mrb[138].mxu0 }
 0x209   : > { %v4305_v59 = vmax.f32 %v4273_v37, 0.0  ;;  %3758 = vst.msk [vmem:[#allocation2 + $0xd8] sm:$0xff] %vm546_vm2, %v3726_v4  ;;  %v4176_v53 = vadd.f32 %v5697_v43, %v4144_v32  ;;  %v4143_v54 = vld [vmem:[#allocation2 + $0xb0] sm:$0xff]  ;;  %v4092_v14 = vpop.f32.mrb[139].mxu0  ;;  %v3698_v43 = vld [vmem:[#allocation2 + $0xf8] sm:$0xff] }
 0x20a   : > { %v4304_v51 = vmax.f32 %v4272_v60, 0.0  ;;  %v4236_v57 = vld [vmem:[#allocation2 + $0x98] sm:$0xff]  ;;  %3757 = vst.msk [vmem:[#allocation2 + $0xd0] sm:$0xff] %vm546_vm2, %v3725_v50  ;;  %v4175_v58 = vadd.f32 %v4143_v54, %v4072_v29  ;;  %v5656_v17 = vpop.f32.mrb[140].mxu1 }
 0x20b   : > { %4337 = vst.msk [vmem:[%s7125_s9 + $0x88] sm:$0xff] %vm546_vm2, %v4305_v59  ;;  %v4275_v61 = vadd.f32 %v7109_v8, %v4236_v57  ;;  %v4235_v62 = vld [vmem:[#allocation2 + $0x90] sm:$0xff]  ;;  %4208 = vst.msk [vmem:[#allocation2 + $0xb8] sm:$0xff] %vm546_vm2, %v4176_v53  ;;  %v3728_v52 = vadd.f32 %v5656_v17, %v3696_v18  ;;  %v3648_v56 = vpop.f32.mrb[141].mxu1 }
 0x20c   : > { %4336 = vst.msk [vmem:[%s7125_s9 + $0x80] sm:$0xff] %vm546_vm2, %v4304_v51  ;;  %v4274_v22 = vadd.f32 %v7109_v8, %v4235_v62  ;;  %4207 = vst.msk [vmem:[#allocation2 + $0xb0] sm:$0xff] %vm546_vm2, %v4175_v58  ;;  %v3727_v1 = vadd.f32 %v3695_v21, %v3648_v56  ;;  %v4146_v44 = vld [vmem:[#allocation2 + $0xc8] sm:$0xff]  ;;  %v5706_v9 = vpop.f32.mrb[140].mxu0 }
 0x20d   : > { %v4307_v12 = vmax.f32 %v4275_v61, 0.0  ;;  %3760 = vst.msk [vmem:[#allocation2 + $0xe8] sm:$0xff] %vm546_vm2, %v3728_v52  ;;  %v4178_v2 = vadd.f32 %v5700_v0, %v4146_v44  ;;  %v4145_v15 = vld [vmem:[#allocation2 + $0xc0] sm:$0xff]  ;;  %v4102_v25 = vpop.f32.mrb[141].mxu0 }
 0x20e   : > { %v4306_v26 = vmax.f32 %v4274_v22, 0.0  ;;  %v4238_v16 = vld [vmem:[#allocation2 + $0xa8] sm:$0xff]  ;;  %3759 = vst.msk [vmem:[#allocation2 + $0xe0] sm:$0xff] %vm546_vm2, %v3727_v1  ;;  %v4177_v28 = vadd.f32 %v4145_v15, %v4082_v63  ;;  %v5659_v19 = vpop.f32.mrb[142].mxu1 }
 0x20f   : > { %4339 = vst.msk [vmem:[%s7125_s9 + $0x98] sm:$0xff] %vm546_vm2, %v4307_v12  ;;  %v4277_v20 = vadd.f32 %v7109_v8, %v4238_v16  ;;  %v4237_v11 = vld [vmem:[#allocation2 + $0xa0] sm:$0xff]  ;;  %4210 = vst.msk [vmem:[#allocation2 + $0xc8] sm:$0xff] %vm546_vm2, %v4178_v2  ;;  %v3730_v23 = vadd.f32 %v5659_v19, %v3698_v43  ;;  %v3658_v29 = vpop.f32.mrb[143].mxu1 }
 0x210   : > { %4338 = vst.msk [vmem:[%s7125_s9 + $0x90] sm:$0xff] %vm546_vm2, %v4306_v26  ;;  %v4276_v24 = vadd.f32 %v7109_v8, %v4237_v11  ;;  %4209 = vst.msk [vmem:[#allocation2 + $0xc0] sm:$0xff] %vm546_vm2, %v4177_v28  ;;  %v3729_v27 = vadd.f32 %v3697_v30, %v3658_v29  ;;  %v4148_v39 = vld [vmem:[#allocation2 + $0xd8] sm:$0xff]  ;;  %v5709_v36 = vpop.f32.mrb[142].mxu0 }
 0x211   : > { %v4309_v31 = vmax.f32 %v4277_v20, 0.0  ;;  %3762 = vst.msk [vmem:[#allocation2 + $0xf8] sm:$0xff] %vm546_vm2, %v3730_v23  ;;  %v4180_v41 = vadd.f32 %v5703_v48, %v4148_v39  ;;  %v4147_v55 = vld [vmem:[#allocation2 + $0xd0] sm:$0xff]  ;;  %v4112_v6 = vpop.f32.mrb[143].mxu0 }
 0x212   : > { %v4308_v33 = vmax.f32 %v4276_v24, 0.0  ;;  %v4240_v7 = vld [vmem:[#allocation2 + $0xb8] sm:$0xff]  ;;  %3761 = vst.msk [vmem:[#allocation2 + $0xf0] sm:$0xff] %vm546_vm2, %v3729_v27  ;;  %v4179_v10 = vadd.f32 %v4147_v55, %v4092_v14 }
 0x213   : > { %4341 = vst.msk [vmem:[%s7125_s9 + $0xa8] sm:$0xff] %vm546_vm2, %v4309_v31  ;;  %v4279_v34 = vadd.f32 %v7109_v8, %v4240_v7  ;;  %v4239_v0 = vld [vmem:[#allocation2 + $0xb0] sm:$0xff]  ;;  %4212 = vst.msk [vmem:[#allocation2 + $0xd8] sm:$0xff] %vm546_vm2, %v4180_v41 }
 0x214   : > { %4340 = vst.msk [vmem:[%s7125_s9 + $0xa0] sm:$0xff] %vm546_vm2, %v4308_v33  ;;  %v4278_v13 = vadd.f32 %v7109_v8, %v4239_v0  ;;  %4211 = vst.msk [vmem:[#allocation2 + $0xd0] sm:$0xff] %vm546_vm2, %v4179_v10  ;;  %v4150_v40 = vld [vmem:[#allocation2 + $0xe8] sm:$0xff] }
 0x215   : > { %v4311_v38 = vmax.f32 %v4279_v34, 0.0  ;;  %v4182_v63 = vadd.f32 %v5706_v9, %v4150_v40  ;;  %v4149_v42 = vld [vmem:[#allocation2 + $0xe0] sm:$0xff] }
 0x216   : > { %v4310_v35 = vmax.f32 %v4278_v13, 0.0  ;;  %v4242_v45 = vld [vmem:[#allocation2 + $0xc8] sm:$0xff]  ;;  %v4181_v3 = vadd.f32 %v4149_v42, %v4102_v25 }
 0x217   : > { %4343 = vst.msk [vmem:[%s7125_s9 + $0xb8] sm:$0xff] %vm546_vm2, %v4311_v38  ;;  %v4281_v47 = vadd.f32 %v7109_v8, %v4242_v45  ;;  %v4241_v37 = vld [vmem:[#allocation2 + $0xc0] sm:$0xff]  ;;  %4214 = vst.msk [vmem:[#allocation2 + $0xe8] sm:$0xff] %vm546_vm2, %v4182_v63 }
 0x218   : > { %4342 = vst.msk [vmem:[%s7125_s9 + $0xb0] sm:$0xff] %vm546_vm2, %v4310_v35  ;;  %v4280_v46 = vadd.f32 %v7109_v8, %v4241_v37  ;;  %4213 = vst.msk [vmem:[#allocation2 + $0xe0] sm:$0xff] %vm546_vm2, %v4181_v3  ;;  %v4152_v4 = vld [vmem:[#allocation2 + $0xf8] sm:$0xff] }
 0x219   : > { %v4313_v5 = vmax.f32 %v4281_v47, 0.0  ;;  %v4184_v49 = vadd.f32 %v5709_v36, %v4152_v4  ;;  %v4151_v60 = vld [vmem:[#allocation2 + $0xf0] sm:$0xff] }
 0x21a   : > { %v4312_v50 = vmax.f32 %v4280_v46, 0.0  ;;  %v4244_v32 = vld [vmem:[#allocation2 + $0xd8] sm:$0xff]  ;;  %v4183_v48 = vadd.f32 %v4151_v60, %v4112_v6 }
 0x21b   : > { %4345 = vst.msk [vmem:[%s7125_s9 + $0xc8] sm:$0xff] %vm546_vm2, %v4313_v5  ;;  %v4283_v59 = vadd.f32 %v7109_v8, %v4244_v32  ;;  %v4243_v53 = vld [vmem:[#allocation2 + $0xd0] sm:$0xff]  ;;  %4216 = vst.msk [vmem:[#allocation2 + $0xf8] sm:$0xff] %vm546_vm2, %v4184_v49 }
 0x21c   : > { %4344 = vst.msk [vmem:[%s7125_s9 + $0xc0] sm:$0xff] %vm546_vm2, %v4312_v50  ;;  %v4282_v54 = vadd.f32 %v7109_v8, %v4243_v53  ;;  %4215 = vst.msk [vmem:[#allocation2 + $0xf0] sm:$0xff] %vm546_vm2, %v4183_v48 }
 0x21d   : > { %v4315_v14 = vmax.f32 %v4283_v59, 0.0 }
 0x21e   : > { %v4314_v51 = vmax.f32 %v4282_v54, 0.0  ;;  %v4246_v57 = vld [vmem:[#allocation2 + $0xe8] sm:$0xff] }
 0x21f   : > { %4347 = vst.msk [vmem:[%s7125_s9 + $0xd8] sm:$0xff] %vm546_vm2, %v4315_v14  ;;  %v4285_v58 = vadd.f32 %v7109_v8, %v4246_v57  ;;  %v4245_v17 = vld [vmem:[#allocation2 + $0xe0] sm:$0xff] }
 0x220   : > { %4346 = vst.msk [vmem:[%s7125_s9 + $0xd0] sm:$0xff] %vm546_vm2, %v4314_v51  ;;  %v4284_v18 = vadd.f32 %v7109_v8, %v4245_v17 }
 0x221   : > { %v4317_v61 = vmax.f32 %v4285_v58, 0.0 }
 0x222   : > { %v4316_v62 = vmax.f32 %v4284_v18, 0.0  ;;  %v4248_v52 = vld [vmem:[#allocation2 + $0xf8] sm:$0xff] }
 0x223   : > { %4349 = vst.msk [vmem:[%s7125_s9 + $0xe8] sm:$0xff] %vm546_vm2, %v4317_v61  ;;  %v4287_v56 = vadd.f32 %v7109_v8, %v4248_v52  ;;  %v4247_v21 = vld [vmem:[#allocation2 + $0xf0] sm:$0xff] }
 0x224   : > { %4348 = vst.msk [vmem:[%s7125_s9 + $0xe0] sm:$0xff] %vm546_vm2, %v4316_v62  ;;  %v4286_v22 = vadd.f32 %v7109_v8, %v4247_v21 }
 0x225   : > { %v4319_v1 = vmax.f32 %v4287_v56, 0.0 }
 0x226   : > { %v4318_v44 = vmax.f32 %v4286_v22, 0.0 }
 0x227   : > { %4351 = vst.msk [vmem:[%s7125_s9 + $0xf8] sm:$0xff] %vm546_vm2, %v4319_v1 }
 0x228   : > { %4350 = vst.msk [vmem:[%s7125_s9 + $0xf0] sm:$0xff] %vm546_vm2, %v4318_v44 }
 0x229   : > { %5783 = shalt.err (!%p5780_p5)
}
 0x22a   : > { %s5784_s29 = scalar_lea.hbm %s7268_s21, 4096  ;;  %s5788_s5 = scalar_lea.hbm %s7327_s3, 8192 }
 0x22b   : > { %p5785_p6 = scmp.ne.s32.totalorder %s7268_s21, %s5784_s29  ;;  %p5789_p10 = scmp.lt.u32.totalorder %s7268_s21, %s7327_s3 }
 0x22c   : > { %p5790_p11 = scmp.lt.u32.totalorder %s5788_s5, %s5784_s29  ;;  %p5792_p13 = scmp.lt.u32.totalorder %s5784_s29, %s7268_s21 }
 0x22d   : > { %p5786_p7 = pnand %p5785_p6, %p5913_p4 }
 0x22e   : > { %p5791_p12 = por %p5790_p11, %p5789_p10 }
 0x22f   : > { %p5787_p9 = pneg %p5786_p7 }
 0x230   : > { %p5793_p0 = por %p5792_p13, %p5791_p12 }
 0x232   : > { %p5794_p1 = pnand %p5793_p0, %p5787_p9 }
 0x234   : > { %5797 = shalt.err (!%p5794_p1)
}
 0x235   : > { %s5851_s8 = smov 128   ;;  %s5852_s9 = smov 8  }
 0x236   : > { %5713 = dma.vmem_to_hbm [thread:$0]  (%p5913_p4), %s7270_s11, 4096, %s7268_s21, %s7278_s15, %s5851_s8, %s5851_s8, %s5852_s9  }
 0x237 PF: > { %p5719_p2 = scmp.ge.s32.totalorder %s5848_s17, 2  ;;  %s4384_s10 = sand.u32 1, %s5828_s12  }
 0x238   : > { %s4385_s18 = scalar_lea.sflag [#allocation4], %s4384_s10 }
 0x239   : > { %p5716_p3 = pnand %p5719_p2, %p5920_p8 }
 0x23b   : > { %5823 = dma.done.wait (!%p5716_p3), %s4385_s18, 4096  }
 0x23c   : > { %5825 = vsyncadd (!%p5716_p3), %s4385_s18, 4294963200  ;;  %s16_s17 = sadd.s32 1, %s5848_s17   ;;  %s7435_s12 = smov %s5832_s13 }
 0x23d   : > { %p13_p5 = scmp.ge.s32.totalorder %s16_s17, 4   ;;  %s7436_s13 = smov %s5836_s14 }
 0x23e   : > { %s7437_s14 = smov %s5926_s25  ;;  %s7438_s15 = smov %s5844_s16 }
 0x23f   : > { %s7439_s16 = smov %s7441_s20  ;;  %15 = sbr.rel (!%p13_p5) target bundleno = 4 (0x4), region = 78 }
 0x246   :  { %4390 = vsyncpa [#allocation4], 1 }
 0x247   :  { %4392 = vsyncpa [#allocation4 + $0x1], 1 }

</bundles_post_ra>
